<compile_context>
chip_gen: v7x
topology: tpu7x:2x2x1
jax: 0.10.0
libtpu: 0.0.40
codegen_flags: <defaults>
</compile_context>

<pallas_src>
import jax
import jax.numpy as jnp
from jax.experimental import pallas as pl
from jax.experimental.pallas import tpu as pltpu

HIDDEN = 300          # module's hidden width
HIDDEN_PAD = 384      # 3 * 128 -> lane-dense hidden width inside the kernel
OUT_PAD = 128         # lane-dense final output width (real logit in column 0)
EPS = 1e-5            # BatchNorm1d default eps


# ----------------------------------------------------------------------------
# Kernel
# ----------------------------------------------------------------------------
def pu_mlp_kernel(x_ref, w1_ref, wmid_hbm, w5_hbm, p_ref, o_ref,
                  wbuf, w5buf, sem):
    """Fused 5-layer MLP: bf16 MXU operands, f32 accumulation, f32 BatchNorm.

    wmid_hbm (3,384,384) and w5_hbm stay in HBM; they are manually
    double-buffered into `wbuf` / `w5buf` so their DMA overlaps the preceding
    layers' matmuls.
    """
    # Kick off later-layer weight prefetches immediately: they overlap with the
    # layer-1 matmul + BN below.
    pltpu.make_async_copy(wmid_hbm.at[0], wbuf.at[0], sem.at[0]).start()
    pltpu.make_async_copy(wmid_hbm.at[1], wbuf.at[1], sem.at[1]).start()
    pltpu.make_async_copy(w5_hbm, w5buf, sem.at[2]).start()

    def bn_relu_bf16(h, layer):
        # Training-mode BatchNorm1d (batch stats, biased variance, eps=1e-5)
        # with the affine folded into a single scale/shift, fused ReLU and
        # bf16 cast for the next matmul.  Padded columns stay exactly 0
        # because their gamma/beta pads are 0.
        mean = jnp.mean(h, axis=0, keepdims=True)
        var = jnp.mean(h * h, axis=0, keepdims=True) - mean * mean
        var = jnp.maximum(var, 0.0)                       # guard f32 rounding
        g = p_ref[layer:layer + 1, :]                     # (1, HIDDEN_PAD)
        b = p_ref[layer + 4:layer + 5, :]
        scale = g * jax.lax.rsqrt(var + EPS)              # rsqrt -> EUP slot
        shift = b - mean * scale
        return jnp.maximum(h * scale + shift, 0.0).astype(jnp.bfloat16)

    # Layer 1: cast x to bf16 in-kernel (no wrapper pad/cast pass over HBM).
    h = jnp.dot(x_ref[...].astype(jnp.bfloat16), w1_ref[...],
                preferred_element_type=jnp.float32)
    h = bn_relu_bf16(h, 0)

    # Layer 2 (weights were prefetched into slot 0 during layer 1).
    pltpu.make_async_copy(wmid_hbm.at[0], wbuf.at[0], sem.at[0]).wait()
    h = jnp.dot(h, wbuf[0], preferred_element_type=jnp.float32)
    h = bn_relu_bf16(h, 1)
    # Slot 0 consumed -> prefetch layer-4 weights into it.
    pltpu.make_async_copy(wmid_hbm.at[2], wbuf.at[0], sem.at[0]).start()

    # Layer 3.
    pltpu.make_async_copy(wmid_hbm.at[1], wbuf.at[1], sem.at[1]).wait()
    h = jnp.dot(h, wbuf[1], preferred_element_type=jnp.float32)
    h = bn_relu_bf16(h, 2)

    # Layer 4.
    pltpu.make_async_copy(wmid_hbm.at[2], wbuf.at[0], sem.at[0]).wait()
    h = jnp.dot(h, wbuf[0], preferred_element_type=jnp.float32)
    h = bn_relu_bf16(h, 3)

    # Layer 5: Linear(300, 1) with bias.  Output padded to 128 lanes so this
    # store is a full unmasked lane-dense vst; the real logit is column 0.
    pltpu.make_async_copy(w5_hbm, w5buf, sem.at[2]).wait()
    o_ref[...] = (jnp.dot(h, w5buf[...], preferred_element_type=jnp.float32)
                  + p_ref[8:9, :OUT_PAD])


# ----------------------------------------------------------------------------
# Parameter preparation (one-time) + wrapper
# ----------------------------------------------------------------------------
def _pad_to(a, shape):
    pads = [(0, t - s) for s, t in zip(a.shape, shape)]
    return jnp.pad(a, pads)


def prepare_params(params):
    """One-time layout/dtype prep, hoisted out of the per-call wrapper.

    - hidden 300 -> 384 (3*128), fc5 out 1 -> 128; all pads are zero.
    - weights cast to bf16 (MXU-native; halves weight DMA bytes).
    - w2/w3/w4 stacked into one (3, 384, 384) tensor for in-kernel prefetch.
    - gamma1..4 / beta1..4 / fc5-bias packed into one (16, 384) f32 tensor
      (rows 0-3 gamma, 4-7 beta, 8 bias).  Zero gamma/beta pads keep padded
      feature columns exactly 0 through BatchNorm + ReLU.
    """
    (w1, g1, b1, w2, g2, b2, w3, g3, b3, w4, g4, b4, w5, b5) = params
    n_inputs = w1.shape[0]

    w1p = _pad_to(w1, (n_inputs, HIDDEN_PAD)).astype(jnp.bfloat16)
    wmid = jnp.stack(
        [_pad_to(w, (HIDDEN_PAD, HIDDEN_PAD)) for w in (w2, w3, w4)]
    ).astype(jnp.bfloat16)
    w5p = _pad_to(w5, (HIDDEN_PAD, OUT_PAD)).astype(jnp.bfloat16)

    rows = [g1, g2, g3, g4, b1, b2, b3, b4, b5]
    packed = jnp.zeros((16, HIDDEN_PAD), jnp.float32)
    for i, r in enumerate(rows):
        packed = packed.at[i, :r.shape[1]].set(r[0].astype(jnp.float32))

    return (w1p, wmid, w5p, packed)


def pu_model_forward(x_nchw, prepared):
    """Flatten input (x.view(B, -1)) and run the fused Pallas kernel."""
    w1p, wmid, w5p, packed = prepared
    B = x_nchw.shape[0]
    x = x_nchw.reshape(B, -1).astype(jnp.float32)           # x.view(B, -1)
    assert x.shape[1] == w1p.shape[0]

    out = pl.pallas_call(
        pu_mlp_kernel,
        out_shape=jax.ShapeDtypeStruct((B, OUT_PAD), jnp.float32),
        in_specs=[
            pl.BlockSpec(memory_space=pltpu.MemorySpace.VMEM),   # x (f32)
            pl.BlockSpec(memory_space=pltpu.MemorySpace.VMEM),   # w1 (bf16)
            pl.BlockSpec(memory_space=pl.ANY),                   # w2/3/4 in HBM
            pl.BlockSpec(memory_space=pl.ANY),                   # w5 in HBM
            pl.BlockSpec(memory_space=pltpu.MemorySpace.VMEM),   # packed BN/bias
        ],
        out_specs=pl.BlockSpec(memory_space=pltpu.MemorySpace.VMEM),
        scratch_shapes=[
            pltpu.VMEM((2, HIDDEN_PAD, HIDDEN_PAD), jnp.bfloat16),  # w2-4 dbl buf
            pltpu.VMEM((HIDDEN_PAD, OUT_PAD), jnp.bfloat16),        # w5 buffer
            pltpu.SemaphoreType.DMA((3,)),
        ],
        compiler_params=pltpu.CompilerParams(
            vmem_limit_bytes=32 * 1024 * 1024),
    )(x, w1p, wmid, w5p, packed)

    return out[:, :1]    # real logit lives in column 0


# ----------------------------------------------------------------------------
# Deterministic init + pure-JAX references
# ----------------------------------------------------------------------------
def init_params(key, n_inputs):
    """Parameter shapes match PUModel.__init__ (Linear weights stored (in, out))."""
    ks = jax.random.split(key, 16)

    def linear_w(k, fan_in, fan_out):
        bound = 1.0 / jnp.sqrt(fan_in)
        return jax.random.uniform(k, (fan_in, fan_out), jnp.float32, -bound, bound)

    w1 = linear_w(ks[0], n_inputs, HIDDEN)
    w2 = linear_w(ks[1], HIDDEN, HIDDEN)
    w3 = linear_w(ks[2], HIDDEN, HIDDEN)
    w4 = linear_w(ks[3], HIDDEN, HIDDEN)
    w5 = linear_w(ks[4], HIDDEN, 1)
    b5 = jax.random.uniform(ks[5], (1, 1), jnp.float32,
                            -1.0 / jnp.sqrt(HIDDEN), 1.0 / jnp.sqrt(HIDDEN))

    def bn_params(kg, kb):
        g = 1.0 + 0.1 * jax.random.normal(kg, (1, HIDDEN), jnp.float32)
        b = 0.1 * jax.random.normal(kb, (1, HIDDEN), jnp.float32)
        return g, b

    g1, b1 = bn_params(ks[6], ks[7])
    g2, b2 = bn_params(ks[8], ks[9])
    g3, b3 = bn_params(ks[10], ks[11])
    g4, b4 = bn_params(ks[12], ks[13])

    return (w1, g1, b1, w2, g2, b2, w3, g3, b3, w4, g4, b4, w5, b5)


def reference_forward(x_nchw, params, operand_dtype=jnp.float32):
    """Pure-JAX reference of the PyTorch forward (training-mode BatchNorm).

    operand_dtype=jnp.bfloat16 mirrors the kernel's matmul-operand precision
    (bf16 operands, f32 accumulation); jnp.float32 is the exact module math.
    """
    (w1, g1, b1, w2, g2, b2, w3, g3, b3, w4, g4, b4, w5, b5) = params
    x = x_nchw.reshape(x_nchw.shape[0], -1).astype(jnp.float32)

    def q(a):
        return a.astype(operand_dtype).astype(jnp.float32)

    def bn_relu(h, g, b):
        mean = jnp.mean(h, axis=0, keepdims=True)
        var = jnp.mean((h - mean) ** 2, axis=0, keepdims=True)
        return jnp.maximum((h - mean) / jnp.sqrt(var + EPS) * g + b, 0.0)

    h = bn_relu(q(x) @ q(w1), g1, b1)
    h = bn_relu(q(h) @ q(w2), g2, b2)
    h = bn_relu(q(h) @ q(w3), g3, b3)
    h = bn_relu(q(h) @ q(w4), g4, b4)
    return q(h) @ q(w5) + b5


# ----------------------------------------------------------------------------
if __name__ == "__main__":
    key = jax.random.PRNGKey(0)
    k_x, k_p = jax.random.split(key)

    # Small image-like input flattened to n_inputs = 1024.  Batch stays modest
    # but > 1 because training-mode BatchNorm needs batch statistics.
    B, C, H, W = 32, 4, 16, 16
    x = jax.random.normal(k_x, (B, C, H, W), jnp.float32)

    params = init_params(k_p, n_inputs=C * H * W)
    prepared = prepare_params(params)

    out = pu_model_forward(x, prepared)
    out = jax.block_until_ready(out)
    assert out.shape == (B, 1), out.shape

    # Primary check: reference run at the kernel's operand precision
    # (bf16 matmul operands, f32 accumulation / BN) -- must match tightly.
    ref_bf16 = reference_forward(x, params, operand_dtype=jnp.bfloat16)
    err_bf16 = jnp.max(jnp.abs(out - ref_bf16))
    assert jnp.allclose(out, ref_bf16, atol=5e-3, rtol=5e-3), (
        f"max abs err vs bf16-operand reference: {err_bf16}")

    # Sanity bound vs the exact f32 module semantics: bf16 operand quantization
    # only perturbs the logits slightly because BatchNorm renormalizes every layer.
    ref_f32 = reference_forward(x, params, operand_dtype=jnp.float32)
    err_f32 = jnp.max(jnp.abs(out - ref_f32))
    assert err_f32 < 1e-1, f"max abs err vs f32 reference: {err_f32}"

    print("KERNEL_OK")
</pallas_src>

<mosaic_0001>
module attributes {stable_mosaic.version = 11 : i64} {
  func.func @pu_mlp_kernel(%arg0: memref<32x1024xf32, #tpu.memory_space<vmem>>, %arg1: memref<1024x384xbf16, #tpu.memory_space<vmem>>, %arg2: memref<3x384x384xbf16, #tpu.memory_space<any>>, %arg3: memref<384x128xbf16, #tpu.memory_space<any>>, %arg4: memref<16x384xf32, #tpu.memory_space<vmem>>, %arg5: memref<32x128xf32, #tpu.memory_space<vmem>>, %arg6: memref<2x384x384xbf16, #tpu.memory_space<vmem>>, %arg7: memref<384x128xbf16, #tpu.memory_space<vmem>>, %arg8: memref<3x!tpu.dma_semaphore, #tpu.memory_space<semaphore_mem>>) attributes {dimension_semantics = [], scalar_prefetch = 0 : i64, scratch_operands = 3 : i64, tpu.core_type = #tpu.core_type<tc>} {
    %c0_i32 = arith.constant 0 : i32
    %c0_i32_0 = arith.constant 0 : i32
    %c0_i32_1 = arith.constant 0 : i32
    %c0_i32_2 = arith.constant 0 : i32
    %c0_i32_3 = arith.constant 0 : i32
    %0 = tpu.memref_slice %arg2[%c0_i32, %c0_i32_2, %c0_i32_3] : memref<3x384x384xbf16, #tpu.memory_space<any>> -> memref<1x384x384xbf16, #tpu.memory_space<any>>
    %1 = tpu.memref_squeeze %0 : memref<1x384x384xbf16, #tpu.memory_space<any>> -> memref<384x384xbf16, #tpu.memory_space<any>>
    %c0_i32_4 = arith.constant 0 : i32
    %c0_i32_5 = arith.constant 0 : i32
    %2 = tpu.memref_slice %arg6[%c0_i32_0, %c0_i32_4, %c0_i32_5] : memref<2x384x384xbf16, #tpu.memory_space<vmem>> -> memref<1x384x384xbf16, #tpu.memory_space<vmem>>
    %3 = tpu.memref_squeeze %2 : memref<1x384x384xbf16, #tpu.memory_space<vmem>> -> memref<384x384xbf16, #tpu.memory_space<vmem>>
    %4 = tpu.memref_slice %arg8[%c0_i32_1] : memref<3x!tpu.dma_semaphore, #tpu.memory_space<semaphore_mem>> -> memref<1x!tpu.dma_semaphore, #tpu.memory_space<semaphore_mem>>
    %5 = tpu.memref_squeeze %4 : memref<1x!tpu.dma_semaphore, #tpu.memory_space<semaphore_mem>> -> memref<!tpu.dma_semaphore, #tpu.memory_space<semaphore_mem>>
    tpu.enqueue_dma source(%1 : memref<384x384xbf16, #tpu.memory_space<any>>) target(%3 : memref<384x384xbf16, #tpu.memory_space<vmem>>) target_semaphore(%5 : memref<!tpu.dma_semaphore, #tpu.memory_space<semaphore_mem>>)
    %c1_i32 = arith.constant 1 : i32
    %c1_i32_6 = arith.constant 1 : i32
    %c1_i32_7 = arith.constant 1 : i32
    %c0_i32_8 = arith.constant 0 : i32
    %c0_i32_9 = arith.constant 0 : i32
    %6 = tpu.memref_slice %arg2[%c1_i32, %c0_i32_8, %c0_i32_9] : memref<3x384x384xbf16, #tpu.memory_space<any>> -> memref<1x384x384xbf16, #tpu.memory_space<any>>
    %7 = tpu.memref_squeeze %6 : memref<1x384x384xbf16, #tpu.memory_space<any>> -> memref<384x384xbf16, #tpu.memory_space<any>>
    %c0_i32_10 = arith.constant 0 : i32
    %c0_i32_11 = arith.constant 0 : i32
    %8 = tpu.memref_slice %arg6[%c1_i32_6, %c0_i32_10, %c0_i32_11] : memref<2x384x384xbf16, #tpu.memory_space<vmem>> -> memref<1x384x384xbf16, #tpu.memory_space<vmem>>
    %9 = tpu.memref_squeeze %8 : memref<1x384x384xbf16, #tpu.memory_space<vmem>> -> memref<384x384xbf16, #tpu.memory_space<vmem>>
    %10 = tpu.memref_slice %arg8[%c1_i32_7] : memref<3x!tpu.dma_semaphore, #tpu.memory_space<semaphore_mem>> -> memref<1x!tpu.dma_semaphore, #tpu.memory_space<semaphore_mem>>
    %11 = tpu.memref_squeeze %10 : memref<1x!tpu.dma_semaphore, #tpu.memory_space<semaphore_mem>> -> memref<!tpu.dma_semaphore, #tpu.memory_space<semaphore_mem>>
    tpu.enqueue_dma source(%7 : memref<384x384xbf16, #tpu.memory_space<any>>) target(%9 : memref<384x384xbf16, #tpu.memory_space<vmem>>) target_semaphore(%11 : memref<!tpu.dma_semaphore, #tpu.memory_space<semaphore_mem>>)
    %c2_i32 = arith.constant 2 : i32
    %12 = tpu.memref_slice %arg8[%c2_i32] : memref<3x!tpu.dma_semaphore, #tpu.memory_space<semaphore_mem>> -> memref<1x!tpu.dma_semaphore, #tpu.memory_space<semaphore_mem>>
    %13 = tpu.memref_squeeze %12 : memref<1x!tpu.dma_semaphore, #tpu.memory_space<semaphore_mem>> -> memref<!tpu.dma_semaphore, #tpu.memory_space<semaphore_mem>>
    tpu.enqueue_dma source(%arg3 : memref<384x128xbf16, #tpu.memory_space<any>>) target(%arg7 : memref<384x128xbf16, #tpu.memory_space<vmem>>) target_semaphore(%13 : memref<!tpu.dma_semaphore, #tpu.memory_space<semaphore_mem>>)
    %c0 = arith.constant 0 : index
    %c0_12 = arith.constant 0 : index
    %14 = vector.load %arg0[%c0, %c0_12] : memref<32x1024xf32, #tpu.memory_space<vmem>>, vector<32x1024xf32>
    %15 = arith.truncf %14 : vector<32x1024xf32> to vector<32x1024xbf16>
    %c0_13 = arith.constant 0 : index
    %c0_14 = arith.constant 0 : index
    %16 = vector.load %arg1[%c0_13, %c0_14] : memref<1024x384xbf16, #tpu.memory_space<vmem>>, vector<1024x384xbf16>
    %cst = arith.constant dense<0.000000e+00> : vector<32x384xf32>
    %17 = tpu.matmul %15, %16, %cst {dimension_numbers = #tpu.dot_dimension_numbers<[1], [0], [0], [1], [0, 0, 1, 1], [], []>} : vector<32x1024xbf16>, vector<1024x384xbf16>, vector<32x384xf32> -> vector<32x384xf32>
    %cst_15 = arith.constant dense<0.000000e+00> : vector<384xf32>
    %18 = vector.multi_reduction <add>, %17, %cst_15 [0] : vector<32x384xf32> to vector<384xf32>
    %19 = vector.shape_cast %18 : vector<384xf32> to vector<1x384xf32>
    %cst_16 = arith.constant 3.200000e+01 : f32
    %20 = vector.broadcast %cst_16 : f32 to vector<1x384xf32>
    %21 = arith.divf %19, %20 : vector<1x384xf32>
    %22 = arith.mulf %17, %17 : vector<32x384xf32>
    %cst_17 = arith.constant dense<0.000000e+00> : vector<384xf32>
    %23 = vector.multi_reduction <add>, %22, %cst_17 [0] : vector<32x384xf32> to vector<384xf32>
    %24 = vector.shape_cast %23 : vector<384xf32> to vector<1x384xf32>
    %cst_18 = arith.constant 3.200000e+01 : f32
    %25 = vector.broadcast %cst_18 : f32 to vector<1x384xf32>
    %26 = arith.divf %24, %25 : vector<1x384xf32>
    %27 = arith.mulf %21, %21 : vector<1x384xf32>
    %28 = arith.subf %26, %27 : vector<1x384xf32>
    %cst_19 = arith.constant 0.000000e+00 : f32
    %29 = vector.broadcast %cst_19 : f32 to vector<1x384xf32>
    %30 = arith.maximumf %28, %29 : vector<1x384xf32>
    %c0_20 = arith.constant 0 : index
    %c0_21 = arith.constant 0 : index
    %31 = vector.load %arg4[%c0_20, %c0_21] : memref<16x384xf32, #tpu.memory_space<vmem>>, vector<1x384xf32>
    %c4 = arith.constant 4 : index
    %c0_22 = arith.constant 0 : index
    %32 = vector.load %arg4[%c4, %c0_22] : memref<16x384xf32, #tpu.memory_space<vmem>>, vector<1x384xf32>
    %cst_23 = arith.constant 9.99999974E-6 : f32
    %33 = vector.broadcast %cst_23 : f32 to vector<1x384xf32>
    %34 = arith.addf %30, %33 : vector<1x384xf32>
    %35 = math.rsqrt %34 : vector<1x384xf32>
    %36 = arith.mulf %31, %35 : vector<1x384xf32>
    %37 = arith.mulf %21, %36 : vector<1x384xf32>
    %38 = arith.subf %32, %37 : vector<1x384xf32>
    %39 = vector.broadcast %36 : vector<1x384xf32> to vector<32x384xf32>
    %40 = arith.mulf %17, %39 : vector<32x384xf32>
    %41 = vector.broadcast %38 : vector<1x384xf32> to vector<32x384xf32>
    %42 = arith.addf %40, %41 : vector<32x384xf32>
    %cst_24 = arith.constant 0.000000e+00 : f32
    %43 = vector.broadcast %cst_24 : f32 to vector<32x384xf32>
    %44 = arith.maximumf %42, %43 : vector<32x384xf32>
    %45 = arith.truncf %44 : vector<32x384xf32> to vector<32x384xbf16>
    %c0_i32_25 = arith.constant 0 : i32
    %c0_i32_26 = arith.constant 0 : i32
    %c0_i32_27 = arith.constant 0 : i32
    %c0_i32_28 = arith.constant 0 : i32
    %c0_i32_29 = arith.constant 0 : i32
    %46 = tpu.memref_slice %arg2[%c0_i32_25, %c0_i32_28, %c0_i32_29] : memref<3x384x384xbf16, #tpu.memory_space<any>> -> memref<1x384x384xbf16, #tpu.memory_space<any>>
    %47 = tpu.memref_squeeze %46 : memref<1x384x384xbf16, #tpu.memory_space<any>> -> memref<384x384xbf16, #tpu.memory_space<any>>
    %c0_i32_30 = arith.constant 0 : i32
    %c0_i32_31 = arith.constant 0 : i32
    %48 = tpu.memref_slice %arg6[%c0_i32_26, %c0_i32_30, %c0_i32_31] : memref<2x384x384xbf16, #tpu.memory_space<vmem>> -> memref<1x384x384xbf16, #tpu.memory_space<vmem>>
    %49 = tpu.memref_squeeze %48 : memref<1x384x384xbf16, #tpu.memory_space<vmem>> -> memref<384x384xbf16, #tpu.memory_space<vmem>>
    %50 = tpu.memref_slice %arg8[%c0_i32_27] : memref<3x!tpu.dma_semaphore, #tpu.memory_space<semaphore_mem>> -> memref<1x!tpu.dma_semaphore, #tpu.memory_space<semaphore_mem>>
    %51 = tpu.memref_squeeze %50 : memref<1x!tpu.dma_semaphore, #tpu.memory_space<semaphore_mem>> -> memref<!tpu.dma_semaphore, #tpu.memory_space<semaphore_mem>>
    tpu.wait_dma2 semaphore(%51 : memref<!tpu.dma_semaphore, #tpu.memory_space<semaphore_mem>>) src(%47 : memref<384x384xbf16, #tpu.memory_space<any>>) dst(%49 : memref<384x384xbf16, #tpu.memory_space<vmem>>)
    %c0_32 = arith.constant 0 : index
    %c0_33 = arith.constant 0 : index
    %c0_34 = arith.constant 0 : index
    %52 = vector.load %arg6[%c0_32, %c0_33, %c0_34] : memref<2x384x384xbf16, #tpu.memory_space<vmem>>, vector<1x384x384xbf16>
    %53 = vector.shape_cast %52 : vector<1x384x384xbf16> to vector<384x384xbf16>
    %cst_35 = arith.constant dense<0.000000e+00> : vector<32x384xf32>
    %54 = tpu.matmul %45, %53, %cst_35 {dimension_numbers = #tpu.dot_dimension_numbers<[1], [0], [0], [1], [0, 0, 1, 1], [], []>} : vector<32x384xbf16>, vector<384x384xbf16>, vector<32x384xf32> -> vector<32x384xf32>
    %cst_36 = arith.constant dense<0.000000e+00> : vector<384xf32>
    %55 = vector.multi_reduction <add>, %54, %cst_36 [0] : vector<32x384xf32> to vector<384xf32>
    %56 = vector.shape_cast %55 : vector<384xf32> to vector<1x384xf32>
    %cst_37 = arith.constant 3.200000e+01 : f32
    %57 = vector.broadcast %cst_37 : f32 to vector<1x384xf32>
    %58 = arith.divf %56, %57 : vector<1x384xf32>
    %59 = arith.mulf %54, %54 : vector<32x384xf32>
    %cst_38 = arith.constant dense<0.000000e+00> : vector<384xf32>
    %60 = vector.multi_reduction <add>, %59, %cst_38 [0] : vector<32x384xf32> to vector<384xf32>
    %61 = vector.shape_cast %60 : vector<384xf32> to vector<1x384xf32>
    %cst_39 = arith.constant 3.200000e+01 : f32
    %62 = vector.broadcast %cst_39 : f32 to vector<1x384xf32>
    %63 = arith.divf %61, %62 : vector<1x384xf32>
    %64 = arith.mulf %58, %58 : vector<1x384xf32>
    %65 = arith.subf %63, %64 : vector<1x384xf32>
    %cst_40 = arith.constant 0.000000e+00 : f32
    %66 = vector.broadcast %cst_40 : f32 to vector<1x384xf32>
    %67 = arith.maximumf %65, %66 : vector<1x384xf32>
    %c1 = arith.constant 1 : index
    %c0_41 = arith.constant 0 : index
    %68 = vector.load %arg4[%c1, %c0_41] : memref<16x384xf32, #tpu.memory_space<vmem>>, vector<1x384xf32>
    %c5 = arith.constant 5 : index
    %c0_42 = arith.constant 0 : index
    %69 = vector.load %arg4[%c5, %c0_42] : memref<16x384xf32, #tpu.memory_space<vmem>>, vector<1x384xf32>
    %cst_43 = arith.constant 9.99999974E-6 : f32
    %70 = vector.broadcast %cst_43 : f32 to vector<1x384xf32>
    %71 = arith.addf %67, %70 : vector<1x384xf32>
    %72 = math.rsqrt %71 : vector<1x384xf32>
    %73 = arith.mulf %68, %72 : vector<1x384xf32>
    %74 = arith.mulf %58, %73 : vector<1x384xf32>
    %75 = arith.subf %69, %74 : vector<1x384xf32>
    %76 = vector.broadcast %73 : vector<1x384xf32> to vector<32x384xf32>
    %77 = arith.mulf %54, %76 : vector<32x384xf32>
    %78 = vector.broadcast %75 : vector<1x384xf32> to vector<32x384xf32>
    %79 = arith.addf %77, %78 : vector<32x384xf32>
    %cst_44 = arith.constant 0.000000e+00 : f32
    %80 = vector.broadcast %cst_44 : f32 to vector<32x384xf32>
    %81 = arith.maximumf %79, %80 : vector<32x384xf32>
    %82 = arith.truncf %81 : vector<32x384xf32> to vector<32x384xbf16>
    %c2_i32_45 = arith.constant 2 : i32
    %c0_i32_46 = arith.constant 0 : i32
    %c0_i32_47 = arith.constant 0 : i32
    %c0_i32_48 = arith.constant 0 : i32
    %c0_i32_49 = arith.constant 0 : i32
    %83 = tpu.memref_slice %arg2[%c2_i32_45, %c0_i32_48, %c0_i32_49] : memref<3x384x384xbf16, #tpu.memory_space<any>> -> memref<1x384x384xbf16, #tpu.memory_space<any>>
    %84 = tpu.memref_squeeze %83 : memref<1x384x384xbf16, #tpu.memory_space<any>> -> memref<384x384xbf16, #tpu.memory_space<any>>
    %c0_i32_50 = arith.constant 0 : i32
    %c0_i32_51 = arith.constant 0 : i32
    %85 = tpu.memref_slice %arg6[%c0_i32_46, %c0_i32_50, %c0_i32_51] : memref<2x384x384xbf16, #tpu.memory_space<vmem>> -> memref<1x384x384xbf16, #tpu.memory_space<vmem>>
    %86 = tpu.memref_squeeze %85 : memref<1x384x384xbf16, #tpu.memory_space<vmem>> -> memref<384x384xbf16, #tpu.memory_space<vmem>>
    %87 = tpu.memref_slice %arg8[%c0_i32_47] : memref<3x!tpu.dma_semaphore, #tpu.memory_space<semaphore_mem>> -> memref<1x!tpu.dma_semaphore, #tpu.memory_space<semaphore_mem>>
    %88 = tpu.memref_squeeze %87 : memref<1x!tpu.dma_semaphore, #tpu.memory_space<semaphore_mem>> -> memref<!tpu.dma_semaphore, #tpu.memory_space<semaphore_mem>>
    tpu.enqueue_dma source(%84 : memref<384x384xbf16, #tpu.memory_space<any>>) target(%86 : memref<384x384xbf16, #tpu.memory_space<vmem>>) target_semaphore(%88 : memref<!tpu.dma_semaphore, #tpu.memory_space<semaphore_mem>>)
    %c1_i32_52 = arith.constant 1 : i32
    %c1_i32_53 = arith.constant 1 : i32
    %c1_i32_54 = arith.constant 1 : i32
    %c0_i32_55 = arith.constant 0 : i32
    %c0_i32_56 = arith.constant 0 : i32
    %89 = tpu.memref_slice %arg2[%c1_i32_52, %c0_i32_55, %c0_i32_56] : memref<3x384x384xbf16, #tpu.memory_space<any>> -> memref<1x384x384xbf16, #tpu.memory_space<any>>
    %90 = tpu.memref_squeeze %89 : memref<1x384x384xbf16, #tpu.memory_space<any>> -> memref<384x384xbf16, #tpu.memory_space<any>>
    %c0_i32_57 = arith.constant 0 : i32
    %c0_i32_58 = arith.constant 0 : i32
    %91 = tpu.memref_slice %arg6[%c1_i32_53, %c0_i32_57, %c0_i32_58] : memref<2x384x384xbf16, #tpu.memory_space<vmem>> -> memref<1x384x384xbf16, #tpu.memory_space<vmem>>
    %92 = tpu.memref_squeeze %91 : memref<1x384x384xbf16, #tpu.memory_space<vmem>> -> memref<384x384xbf16, #tpu.memory_space<vmem>>
    %93 = tpu.memref_slice %arg8[%c1_i32_54] : memref<3x!tpu.dma_semaphore, #tpu.memory_space<semaphore_mem>> -> memref<1x!tpu.dma_semaphore, #tpu.memory_space<semaphore_mem>>
    %94 = tpu.memref_squeeze %93 : memref<1x!tpu.dma_semaphore, #tpu.memory_space<semaphore_mem>> -> memref<!tpu.dma_semaphore, #tpu.memory_space<semaphore_mem>>
    tpu.wait_dma2 semaphore(%94 : memref<!tpu.dma_semaphore, #tpu.memory_space<semaphore_mem>>) src(%90 : memref<384x384xbf16, #tpu.memory_space<any>>) dst(%92 : memref<384x384xbf16, #tpu.memory_space<vmem>>)
    %c1_59 = arith.constant 1 : index
    %c0_60 = arith.constant 0 : index
    %c0_61 = arith.constant 0 : index
    %95 = vector.load %arg6[%c1_59, %c0_60, %c0_61] : memref<2x384x384xbf16, #tpu.memory_space<vmem>>, vector<1x384x384xbf16>
    %96 = vector.shape_cast %95 : vector<1x384x384xbf16> to vector<384x384xbf16>
    %cst_62 = arith.constant dense<0.000000e+00> : vector<32x384xf32>
    %97 = tpu.matmul %82, %96, %cst_62 {dimension_numbers = #tpu.dot_dimension_numbers<[1], [0], [0], [1], [0, 0, 1, 1], [], []>} : vector<32x384xbf16>, vector<384x384xbf16>, vector<32x384xf32> -> vector<32x384xf32>
    %cst_63 = arith.constant dense<0.000000e+00> : vector<384xf32>
    %98 = vector.multi_reduction <add>, %97, %cst_63 [0] : vector<32x384xf32> to vector<384xf32>
    %99 = vector.shape_cast %98 : vector<384xf32> to vector<1x384xf32>
    %cst_64 = arith.constant 3.200000e+01 : f32
    %100 = vector.broadcast %cst_64 : f32 to vector<1x384xf32>
    %101 = arith.divf %99, %100 : vector<1x384xf32>
    %102 = arith.mulf %97, %97 : vector<32x384xf32>
    %cst_65 = arith.constant dense<0.000000e+00> : vector<384xf32>
    %103 = vector.multi_reduction <add>, %102, %cst_65 [0] : vector<32x384xf32> to vector<384xf32>
    %104 = vector.shape_cast %103 : vector<384xf32> to vector<1x384xf32>
    %cst_66 = arith.constant 3.200000e+01 : f32
    %105 = vector.broadcast %cst_66 : f32 to vector<1x384xf32>
    %106 = arith.divf %104, %105 : vector<1x384xf32>
    %107 = arith.mulf %101, %101 : vector<1x384xf32>
    %108 = arith.subf %106, %107 : vector<1x384xf32>
    %cst_67 = arith.constant 0.000000e+00 : f32
    %109 = vector.broadcast %cst_67 : f32 to vector<1x384xf32>
    %110 = arith.maximumf %108, %109 : vector<1x384xf32>
    %c2 = arith.constant 2 : index
    %c0_68 = arith.constant 0 : index
    %111 = vector.load %arg4[%c2, %c0_68] : memref<16x384xf32, #tpu.memory_space<vmem>>, vector<1x384xf32>
    %c6 = arith.constant 6 : index
    %c0_69 = arith.constant 0 : index
    %112 = vector.load %arg4[%c6, %c0_69] : memref<16x384xf32, #tpu.memory_space<vmem>>, vector<1x384xf32>
    %cst_70 = arith.constant 9.99999974E-6 : f32
    %113 = vector.broadcast %cst_70 : f32 to vector<1x384xf32>
    %114 = arith.addf %110, %113 : vector<1x384xf32>
    %115 = math.rsqrt %114 : vector<1x384xf32>
    %116 = arith.mulf %111, %115 : vector<1x384xf32>
    %117 = arith.mulf %101, %116 : vector<1x384xf32>
    %118 = arith.subf %112, %117 : vector<1x384xf32>
    %119 = vector.broadcast %116 : vector<1x384xf32> to vector<32x384xf32>
    %120 = arith.mulf %97, %119 : vector<32x384xf32>
    %121 = vector.broadcast %118 : vector<1x384xf32> to vector<32x384xf32>
    %122 = arith.addf %120, %121 : vector<32x384xf32>
    %cst_71 = arith.constant 0.000000e+00 : f32
    %123 = vector.broadcast %cst_71 : f32 to vector<32x384xf32>
    %124 = arith.maximumf %122, %123 : vector<32x384xf32>
    %125 = arith.truncf %124 : vector<32x384xf32> to vector<32x384xbf16>
    %c2_i32_72 = arith.constant 2 : i32
    %c0_i32_73 = arith.constant 0 : i32
    %c0_i32_74 = arith.constant 0 : i32
    %c0_i32_75 = arith.constant 0 : i32
    %c0_i32_76 = arith.constant 0 : i32
    %126 = tpu.memref_slice %arg2[%c2_i32_72, %c0_i32_75, %c0_i32_76] : memref<3x384x384xbf16, #tpu.memory_space<any>> -> memref<1x384x384xbf16, #tpu.memory_space<any>>
    %127 = tpu.memref_squeeze %126 : memref<1x384x384xbf16, #tpu.memory_space<any>> -> memref<384x384xbf16, #tpu.memory_space<any>>
    %c0_i32_77 = arith.constant 0 : i32
    %c0_i32_78 = arith.constant 0 : i32
    %128 = tpu.memref_slice %arg6[%c0_i32_73, %c0_i32_77, %c0_i32_78] : memref<2x384x384xbf16, #tpu.memory_space<vmem>> -> memref<1x384x384xbf16, #tpu.memory_space<vmem>>
    %129 = tpu.memref_squeeze %128 : memref<1x384x384xbf16, #tpu.memory_space<vmem>> -> memref<384x384xbf16, #tpu.memory_space<vmem>>
    %130 = tpu.memref_slice %arg8[%c0_i32_74] : memref<3x!tpu.dma_semaphore, #tpu.memory_space<semaphore_mem>> -> memref<1x!tpu.dma_semaphore, #tpu.memory_space<semaphore_mem>>
    %131 = tpu.memref_squeeze %130 : memref<1x!tpu.dma_semaphore, #tpu.memory_space<semaphore_mem>> -> memref<!tpu.dma_semaphore, #tpu.memory_space<semaphore_mem>>
    tpu.wait_dma2 semaphore(%131 : memref<!tpu.dma_semaphore, #tpu.memory_space<semaphore_mem>>) src(%127 : memref<384x384xbf16, #tpu.memory_space<any>>) dst(%129 : memref<384x384xbf16, #tpu.memory_space<vmem>>)
    %c0_79 = arith.constant 0 : index
    %c0_80 = arith.constant 0 : index
    %c0_81 = arith.constant 0 : index
    %132 = vector.load %arg6[%c0_79, %c0_80, %c0_81] : memref<2x384x384xbf16, #tpu.memory_space<vmem>>, vector<1x384x384xbf16>
    %133 = vector.shape_cast %132 : vector<1x384x384xbf16> to vector<384x384xbf16>
    %cst_82 = arith.constant dense<0.000000e+00> : vector<32x384xf32>
    %134 = tpu.matmul %125, %133, %cst_82 {dimension_numbers = #tpu.dot_dimension_numbers<[1], [0], [0], [1], [0, 0, 1, 1], [], []>} : vector<32x384xbf16>, vector<384x384xbf16>, vector<32x384xf32> -> vector<32x384xf32>
    %cst_83 = arith.constant dense<0.000000e+00> : vector<384xf32>
    %135 = vector.multi_reduction <add>, %134, %cst_83 [0] : vector<32x384xf32> to vector<384xf32>
    %136 = vector.shape_cast %135 : vector<384xf32> to vector<1x384xf32>
    %cst_84 = arith.constant 3.200000e+01 : f32
    %137 = vector.broadcast %cst_84 : f32 to vector<1x384xf32>
    %138 = arith.divf %136, %137 : vector<1x384xf32>
    %139 = arith.mulf %134, %134 : vector<32x384xf32>
    %cst_85 = arith.constant dense<0.000000e+00> : vector<384xf32>
    %140 = vector.multi_reduction <add>, %139, %cst_85 [0] : vector<32x384xf32> to vector<384xf32>
    %141 = vector.shape_cast %140 : vector<384xf32> to vector<1x384xf32>
    %cst_86 = arith.constant 3.200000e+01 : f32
    %142 = vector.broadcast %cst_86 : f32 to vector<1x384xf32>
    %143 = arith.divf %141, %142 : vector<1x384xf32>
    %144 = arith.mulf %138, %138 : vector<1x384xf32>
    %145 = arith.subf %143, %144 : vector<1x384xf32>
    %cst_87 = arith.constant 0.000000e+00 : f32
    %146 = vector.broadcast %cst_87 : f32 to vector<1x384xf32>
    %147 = arith.maximumf %145, %146 : vector<1x384xf32>
    %c3 = arith.constant 3 : index
    %c0_88 = arith.constant 0 : index
    %148 = vector.load %arg4[%c3, %c0_88] : memref<16x384xf32, #tpu.memory_space<vmem>>, vector<1x384xf32>
    %c7 = arith.constant 7 : index
    %c0_89 = arith.constant 0 : index
    %149 = vector.load %arg4[%c7, %c0_89] : memref<16x384xf32, #tpu.memory_space<vmem>>, vector<1x384xf32>
    %cst_90 = arith.constant 9.99999974E-6 : f32
    %150 = vector.broadcast %cst_90 : f32 to vector<1x384xf32>
    %151 = arith.addf %147, %150 : vector<1x384xf32>
    %152 = math.rsqrt %151 : vector<1x384xf32>
    %153 = arith.mulf %148, %152 : vector<1x384xf32>
    %154 = arith.mulf %138, %153 : vector<1x384xf32>
    %155 = arith.subf %149, %154 : vector<1x384xf32>
    %156 = vector.broadcast %153 : vector<1x384xf32> to vector<32x384xf32>
    %157 = arith.mulf %134, %156 : vector<32x384xf32>
    %158 = vector.broadcast %155 : vector<1x384xf32> to vector<32x384xf32>
    %159 = arith.addf %157, %158 : vector<32x384xf32>
    %cst_91 = arith.constant 0.000000e+00 : f32
    %160 = vector.broadcast %cst_91 : f32 to vector<32x384xf32>
    %161 = arith.maximumf %159, %160 : vector<32x384xf32>
    %162 = arith.truncf %161 : vector<32x384xf32> to vector<32x384xbf16>
    %c2_i32_92 = arith.constant 2 : i32
    %163 = tpu.memref_slice %arg8[%c2_i32_92] : memref<3x!tpu.dma_semaphore, #tpu.memory_space<semaphore_mem>> -> memref<1x!tpu.dma_semaphore, #tpu.memory_space<semaphore_mem>>
    %164 = tpu.memref_squeeze %163 : memref<1x!tpu.dma_semaphore, #tpu.memory_space<semaphore_mem>> -> memref<!tpu.dma_semaphore, #tpu.memory_space<semaphore_mem>>
    tpu.wait_dma2 semaphore(%164 : memref<!tpu.dma_semaphore, #tpu.memory_space<semaphore_mem>>) src(%arg3 : memref<384x128xbf16, #tpu.memory_space<any>>) dst(%arg7 : memref<384x128xbf16, #tpu.memory_space<vmem>>)
    %c0_93 = arith.constant 0 : index
    %c0_94 = arith.constant 0 : index
    %165 = vector.load %arg7[%c0_93, %c0_94] : memref<384x128xbf16, #tpu.memory_space<vmem>>, vector<384x128xbf16>
    %cst_95 = arith.constant dense<0.000000e+00> : vector<32x128xf32>
    %166 = tpu.matmul %162, %165, %cst_95 {dimension_numbers = #tpu.dot_dimension_numbers<[1], [0], [0], [1], [0, 0, 1, 1], [], []>} : vector<32x384xbf16>, vector<384x128xbf16>, vector<32x128xf32> -> vector<32x128xf32>
    %c8 = arith.constant 8 : index
    %c0_96 = arith.constant 0 : index
    %167 = vector.load %arg4[%c8, %c0_96] : memref<16x384xf32, #tpu.memory_space<vmem>>, vector<1x128xf32>
    %168 = vector.broadcast %167 : vector<1x128xf32> to vector<32x128xf32>
    %169 = arith.addf %166, %168 : vector<32x128xf32>
    %c0_97 = arith.constant 0 : index
    %c0_98 = arith.constant 0 : index
    %170 = vector.load %arg5[%c0_97, %c0_98] : memref<32x128xf32, #tpu.memory_space<vmem>>, vector<32x128xf32>
    tpu.vector_store %arg5[%c0_97, %c0_98], %169 {strides = array<i32>} : memref<32x128xf32, #tpu.memory_space<vmem>>, vector<32x128xf32>,
    return
  }
}

</mosaic_0001>

<bundles_post_ra>
// kernel: tpu_custom_call.1
= control target key start
LH: loop header
LB: loop body
LE: loop exit
PB: predicated region body
PF: predicated region fallthrough
CT: control target
= control target key end

     0   :  { %10 = vsyncpa [#allocation6], 0  ;;  %s5507_s0 = inlined_call_operand.hbm [shape: f32[32,1024], index: 0, kind: input, shape index: {}]   ;;  %s5508_s1 = inlined_call_operand.hbm [shape: bf16[1024,384], index: 1, kind: input, shape index: {}]   ;;  %s5509_s2 = inlined_call_operand.hbm [shape: bf16[3,384,384], index: 2, kind: input, shape index: {}]   ;;  %s5510_s3 = inlined_call_operand.hbm [shape: bf16[384,128], index: 3, kind: input, shape index: {}]   ;;  %s5511_s4 = inlined_call_operand.hbm [shape: f32[16,384], index: 4, kind: input, shape index: {}]   ;;  %s5512_s5 = inlined_call_operand.hbm [shape: f32[32,128], index: 5, kind: output, shape index: {}]  }
   0x1   :  { %11 = vsyncpa [#allocation9], 0 }
   0x2   :  { %12 = vsyncpa [#allocation7], 0  ;;  %s4836_s18 = smov [#allocation8]   ;;  %s4712_s22 = scalar_lea.hbm %s5508_s1, 24576 }
   0x3   :  { %s30_s19 = sshll.u32 %s4836_s18, 4  ;;  %p4713_p0 = scmp.ne.s32.totalorder %s5508_s1, %s4712_s22  ;;  %s31_s19 = int_to_ptr.vmem [resolvable:$true] %s30_s19 }
   0x4   :  { %p4716_p1 = scmp.lt.u32.totalorder %s4712_s22, %s5508_s1 }
   0x6   :  { %p4718_p2 = pnand %p4716_p1, %p4713_p0 }
   0x8   :  { %4721 = shalt.err (!%p4718_p2)
}
   0x9   :  { %s4722_s27 = scalar_lea.vmem %s31_s19, 24576  ;;  %p4727_p4 = scmp.lt.s32.totalorder %s31_s19, %s31_s19 }
   0xa   :  { %p4723_p3 = scmp.ne.s32.totalorder %s31_s19, %s4722_s27  ;;  %p4728_p5 = scmp.lt.s32.totalorder %s4722_s27, %s4722_s27 }
   0xc   :  { %p4729_p6 = por %p4728_p5, %p4727_p4 }
   0xe   :  { %p4730_p7 = pnand %p4729_p6, %p4723_p3 }
  0x10   :  { %4733 = shalt.err (!%p4730_p7)
}
  0x11   :  { %s4837_s28 = smov 192   ;;  %s4838_s29 = smov 12  }
  0x12   :  { %36 = dma.hbm_to_vmem [thread:$0]  %s5508_s1, 24576, %s31_s19, [#allocation9], %s4837_s28, %s4837_s28, %s4838_s29  }
  0x13   :  { %s4839_s7 = smov [#allocation5]   ;;  %s4734_s11 = scalar_lea.hbm %s5507_s0, 4096 }
  0x14   :  { %s18_s8 = sshll.u32 %s4839_s7, 4  ;;  %p4735_p8 = scmp.ne.s32.totalorder %s5507_s0, %s4734_s11  ;;  %s19_s8 = int_to_ptr.vmem [resolvable:$true] %s18_s8 }
  0x15   :  { %p4738_p9 = scmp.lt.u32.totalorder %s4734_s11, %s5507_s0 }
  0x17   :  { %p4740_p10 = pnand %p4738_p9, %p4735_p8 }
  0x19   :  { %4743 = shalt.err (!%p4740_p10)
}
  0x1a   :  { %s4744_s16 = scalar_lea.vmem %s19_s8, 4096  ;;  %p4749_p12 = scmp.lt.s32.totalorder %s19_s8, %s19_s8 }
  0x1b   :  { %p4745_p11 = scmp.ne.s32.totalorder %s19_s8, %s4744_s16  ;;  %p4750_p13 = scmp.lt.s32.totalorder %s4744_s16, %s4744_s16 }
  0x1d   :  { %p4751_p0 = por %p4750_p13, %p4749_p12 }
  0x1f   :  { %p4752_p1 = pnand %p4751_p0, %p4745_p11 }
  0x21   :  { %4755 = shalt.err (!%p4752_p1)
}
  0x22   :  { %s4840_s1 = smov 1024   ;;  %s4841_s17 = smov 64  }
  0x23   :  { %24 = dma.hbm_to_vmem [thread:$0]  %s5507_s0, 4096, %s19_s8, [#allocation6], %s4840_s1, %s4840_s1, %s4841_s17  }
  0x24   :  { %s4842_s20 = smov [#allocation10]   ;;  %s4756_s24 = scalar_lea.hbm %s5511_s4, 768 }
  0x25   :  { %s42_s21 = sshll.u32 %s4842_s20, 4  ;;  %p4757_p2 = scmp.ne.s32.totalorder %s5511_s4, %s4756_s24  ;;  %s43_s21 = int_to_ptr.vmem [resolvable:$true] %s42_s21 }
  0x26   :  { %p4760_p3 = scmp.lt.u32.totalorder %s4756_s24, %s5511_s4 }
  0x28   :  { %p4762_p4 = pnand %p4760_p3, %p4757_p2 }
  0x2a   :  { %4765 = shalt.err (!%p4762_p4)
}
  0x2b   :  { %s4766_s30 = scalar_lea.vmem %s43_s21, 768  ;;  %p4771_p6 = scmp.lt.s32.totalorder %s43_s21, %s43_s21 }
  0x2c   :  { %p4767_p5 = scmp.ne.s32.totalorder %s43_s21, %s4766_s30  ;;  %p4772_p7 = scmp.lt.s32.totalorder %s4766_s30, %s4766_s30 }
  0x2e   :  { %p4773_p8 = por %p4772_p7, %p4771_p6 }
  0x30   :  { %p4774_p9 = pnand %p4773_p8, %p4767_p5 }
  0x32   :  { %4777 = shalt.err (!%p4774_p9)
}
  0x33   :  { %s4843_s0 = smov 384   ;;  %s4844_s6 = smov 24  }
  0x34   :  { %48 = dma.hbm_to_vmem [thread:$0]  %s5511_s4, 768, %s43_s21, [#allocation9], %s4843_s0, %s4843_s0, %s4844_s6  }
  0x35   :  { %4822 = dma.done.wait [#allocation6], 4096  }
  0x36   :  { %4823 = vsyncadd [#allocation6], 4294963200 }
  0x37   :  { %4824 = dma.done.wait [#allocation9], 25344  }
  0x38   :  { %4825 = vsyncadd [#allocation9], 4294941952  ;;  %s63_s9 = sld [smem:[#allocation0]]   ;;  %75 = sst [smem:[#allocation13]] %s4843_s0 }
  0x39   :  { %77 = sst [smem:[#allocation13 + $0x1]] %s4843_s0  ;;  %s4845_s10 = smov [#allocation2]  }
  0x3a   :  { %s4934_s11 = sshll.u32 %s4845_s10, 4  ;;  %81 = sst [smem:[#allocation13 + $0x3]] %s4841_s17  ;;  %s72_s11 = int_to_ptr.vmem [resolvable:$true] %s4934_s11 }
  0x3b   :  { %87 = sst [smem:[#allocation13 + $0x6]] %s4837_s28  ;;  %s4846_s4 = smov 3  }
  0x3c   :  { %89 = sst [smem:[#allocation13 + $0x7]] %s4841_s17  ;;  %s4847_s13 = smov 128  }
  0x3d   :  { %79 = sst [smem:[#allocation13 + $0x2]] %s4846_s4  ;;  %s4848_s15 = smov 2  }
  0x3e   :  { %s3814_s12 = sshll.u32 %s63_s9, 26  ;;  %83 = sst [smem:[#allocation13 + $0x4]] %s4847_s13 }
  0x3f   :  { %s4942_s14 = sadd.s32 134217728, %s3814_s12  ;;  %85 = sst [smem:[#allocation13 + $0x5]] %s4848_s15 }
  0x40   :  { %s4849_s16 = smov 4   ;;  %s4850_s1 = smov [#allocation4]  }
  0x41   :  { %91 = sst [smem:[#allocation13 + $0x8]] %s4849_s16  ;;  %s4851_s18 = smov [#allocation12]  }
  0x42   :  { %93 = dma.general %s5509_s2, 9216, %s72_s11, %s4850_s1, %s4851_s18, [#allocation13], %s4942_s14, 0  }
  0x43   :  { %112 = sst [smem:[#allocation15]] %s4843_s0  ;;  %s4852_s21 = smov [#allocation2 + $0x240]  }
  0x44   :  { %114 = sst [smem:[#allocation15 + $0x1]] %s4843_s0  ;;  %s108_s22 = sshll.u32 %s4852_s21, 4  ;;  %s109_s22 = int_to_ptr.vmem [resolvable:$true] %s108_s22 }
  0x45   :  { %116 = sst [smem:[#allocation15 + $0x2]] %s4846_s4  ;;  %s94_s25 = scalar_lea.hbm %s5509_s2, 9216 }
  0x46   :  { %118 = sst [smem:[#allocation15 + $0x3]] %s4841_s17  ;;  %s4853_s26 = smov [#allocation4 + $0x1]  }
  0x47   :  { %120 = sst [smem:[#allocation15 + $0x4]] %s4847_s13  ;;  %s4854_s27 = smov [#allocation14]  }
  0x48   :  { %122 = sst [smem:[#allocation15 + $0x5]] %s4848_s15  ;;  %s4855_s29 = smov [#allocation3]  }
  0x49   :  { %124 = sst [smem:[#allocation15 + $0x6]] %s4837_s28  ;;  %s139_s30 = sshll.u32 %s4855_s29, 4  ;;  %s140_s30 = int_to_ptr.vmem [resolvable:$true] %s139_s30 }
  0x4a   :  { %126 = sst [smem:[#allocation15 + $0x7]] %s4841_s17  ;;  %s4778_s8 = scalar_lea.hbm %s5510_s3, 3072 }
  0x4b   :  { %128 = sst [smem:[#allocation15 + $0x8]] %s4849_s16  ;;  %p4779_p10 = scmp.ne.s32.totalorder %s5510_s3, %s4778_s8 }
  0x4c   :  { %130 = dma.general %s94_s25, 9216, %s109_s22, %s4853_s26, %s4854_s27, [#allocation15], %s4942_s14, 0  }
  0x4d   :  { %v4432_v0 = vld [vmem:[#allocation8 + $0x4] ss:$12 sps:$4 sm:$0xff]   ;;  %v4434_v1 = vld [vmem:[#allocation8] ss:$12 sps:$4 sm:$0xff]   ;;  %v4435_v2 = vld [vmem:[#allocation8 + $0x1c] ss:$12 sps:$4 sm:$0xff]   ;;  %p4782_p11 = scmp.lt.u32.totalorder %s4778_s8, %s5510_s3 }
  0x4e   :  { %1471 = vmatprep.subr.bf16.mxu0 %v4432_v0  ;;  %v4437_v3 = vld [vmem:[#allocation8 + $0x18] ss:$12 sps:$4 sm:$0xff]   ;;  %v4438_v4 = vld [vmem:[#allocation8 + $0x34] ss:$12 sps:$4 sm:$0xff]   ;;  %v4440_v5 = vld [vmem:[#allocation8 + $0x30] ss:$12 sps:$4 sm:$0xff]  }
  0x4f   :  { %1472 = vmatpush1.bf16.msra.mxu0 %v4434_v1  ;;  %v4441_v6 = vld [vmem:[#allocation8 + $0x4c] ss:$12 sps:$4 sm:$0xff]   ;;  %v4450_v7 = vld [vmem:[#allocation8 + $0xc8] ss:$12 sps:$4 sm:$0xff]   ;;  %v4444_v10 = vld [vmem:[#allocation8 + $0x64] ss:$12 sps:$4 sm:$0xff]   ;;  %p4784_p12 = pnand %p4782_p11, %p4779_p10 }
  0x50   :  { %1473 = vmatprep.subr.bf16.mxu0 %v4435_v2  ;;  %v4451_v8 = vld [vmem:[#allocation8 + $0x8] ss:$12 sps:$4 sm:$0xff]   ;;  %4015 = vmatprep.subr.bf16.mxu1 %v4450_v7  ;;  %v4455_v11 = vld [vmem:[#allocation8 + $0xe0] ss:$12 sps:$4 sm:$0xff]   ;;  %v4460_v15 = vld [vmem:[#allocation8 + $0xf8] ss:$12 sps:$4 sm:$0xff]  }
  0x51   :  { %v4443_v9 = vld [vmem:[#allocation8 + $0x48] ss:$12 sps:$4 sm:$0xff]   ;;  %4016 = vmatpush3.bf16.msra.mxu1 %v4451_v8  ;;  %v4456_v12 = vld [vmem:[#allocation8 + $0x20] ss:$12 sps:$4 sm:$0xff]   ;;  %v4461_v16 = vld [vmem:[#allocation8 + $0x38] ss:$12 sps:$4 sm:$0xff]  }
  0x52   :  { %v4446_v13 = vld [vmem:[#allocation8 + $0x60] ss:$12 sps:$4 sm:$0xff]   ;;  %v4447_v14 = vld [vmem:[#allocation8 + $0x7c] ss:$12 sps:$4 sm:$0xff]   ;;  %4017 = vmatprep.subr.bf16.mxu1 %v4455_v11  ;;  %v4449_v17 = vld [vmem:[#allocation8 + $0x78] ss:$12 sps:$4 sm:$0xff]  }
  0x53   :  { %1474 = vmatpush1.bf16.msra.mxu0 %v4437_v3  ;;  %v4465_v18 = vld [vmem:[#allocation8 + $0x110] ss:$12 sps:$4 sm:$0xff]   ;;  %v4452_v20 = vld [vmem:[#allocation8 + $0x94] ss:$12 sps:$4 sm:$0xff]   ;;  %v4457_v24 = vld [vmem:[#allocation8 + $0xac] ss:$12 sps:$4 sm:$0xff]  }
  0x54   :  { %1475 = vmatprep.subr.bf16.mxu0 %v4438_v4  ;;  %v4466_v19 = vld [vmem:[#allocation8 + $0x50] ss:$12 sps:$4 sm:$0xff]   ;;  %v4470_v22 = vld [vmem:[#allocation8 + $0x128] ss:$12 sps:$4 sm:$0xff]   ;;  %v4475_v25 = vld [vmem:[#allocation8 + $0x140] ss:$12 sps:$4 sm:$0xff]  }
  0x55   :  { %4018 = vmatpush3.bf16.msra.mxu1 %v4456_v12  ;;  %v4454_v21 = vld [vmem:[#allocation8 + $0x90] ss:$12 sps:$4 sm:$0xff]   ;;  %v4471_v23 = vld [vmem:[#allocation8 + $0x68] ss:$12 sps:$4 sm:$0xff]   ;;  %v4476_v28 = vld [vmem:[#allocation8 + $0x80] ss:$12 sps:$4 sm:$0xff]  }
  0x56   :  { %4019 = vmatprep.subr.bf16.mxu1 %v4460_v15  ;;  %v4459_v26 = vld [vmem:[#allocation8 + $0xa8] ss:$12 sps:$4 sm:$0xff]   ;;  %v4462_v27 = vld [vmem:[#allocation8 + $0xc4] ss:$12 sps:$4 sm:$0xff]   ;;  %v4464_v30 = vld [vmem:[#allocation8 + $0xc0] ss:$12 sps:$4 sm:$0xff]  }
  0x57   :  { %1476 = vmatpush1.bf16.msra.mxu0 %v4440_v5  ;;  %v4480_v29 = vld [vmem:[#allocation8 + $0x158] ss:$12 sps:$4 sm:$0xff]   ;;  %v4467_v31 = vld [vmem:[#allocation8 + $0xdc] ss:$12 sps:$4 sm:$0xff]   ;;  %v4472_v35 = vld [vmem:[#allocation8 + $0xf4] ss:$12 sps:$4 sm:$0xff]  }
  0x58   :  { %1477 = vmatprep.subr.bf16.mxu0 %v4441_v6  ;;  %v4481_v32 = vld [vmem:[#allocation8 + $0x98] ss:$12 sps:$4 sm:$0xff]   ;;  %v4485_v33 = vld [vmem:[#allocation8 + $0x170] ss:$12 sps:$4 sm:$0xff]   ;;  %v144_v37 = vld [vmem:[#allocation5 + $0x8] sm:$0xff] }
  0x59   :  { %4020 = vmatpush3.bf16.msra.mxu1 %v4461_v16  ;;  %v4469_v34 = vld [vmem:[#allocation8 + $0xd8] ss:$12 sps:$4 sm:$0xff]   ;;  %v4486_v36 = vld [vmem:[#allocation8 + $0xb0] ss:$12 sps:$4 sm:$0xff]   ;;  %v152_v38 = vld [vmem:[#allocation5 + $0x48] sm:$0xff] }
  0x5a   :  { %4021 = vmatprep.subr.bf16.mxu1 %v4465_v18  ;;  %v176_v39 = vpack.c.bf16 %v152_v38, %v144_v37  ;;  %v4490_v40 = vld [vmem:[#allocation8 + $0x248] ss:$12 sps:$4 sm:$0xff]   ;;  %v143_v41 = vld [vmem:[#allocation5] sm:$0xff]  ;;  %v4474_v43 = vld [vmem:[#allocation8 + $0xf0] ss:$12 sps:$4 sm:$0xff]  }
  0x5b   :  { %1478 = vmatpush1.bf16.msra.mxu0 %v4443_v9  ;;  %v151_v42 = vld [vmem:[#allocation5 + $0x40] sm:$0xff]  ;;  %v4477_v44 = vld [vmem:[#allocation8 + $0x10c] ss:$12 sps:$4 sm:$0xff]   ;;  %v4491_v46 = vld [vmem:[#allocation8 + $0x188] ss:$12 sps:$4 sm:$0xff]  }
  0x5c   :  { %1479 = vmatprep.subr.bf16.mxu0 %v4444_v10  ;;  %1715 = vmatprep.mubr.bf16.mxu1 %v176_v39  ;;  %v4966_v45 = vpack.c.bf16 %v151_v42, %v143_v41  ;;  %v4495_v47 = vld [vmem:[#allocation8 + $0x260] ss:$12 sps:$4 sm:$0xff]   ;;  %v4479_v48 = vld [vmem:[#allocation8 + $0x108] ss:$12 sps:$4 sm:$0xff]   ;;  %v4482_v49 = vld [vmem:[#allocation8 + $0x124] ss:$12 sps:$4 sm:$0xff]  }
  0x5d   :  { %4022 = vmatpush3.bf16.msra.mxu1 %v4466_v19  ;;  %1503 = vmatprep.mubr.bf16.mxu0 %v176_v39  ;;  %v4496_v50 = vld [vmem:[#allocation8 + $0x1a0] ss:$12 sps:$4 sm:$0xff]   ;;  %v4500_v51 = vld [vmem:[#allocation8 + $0x278] ss:$12 sps:$4 sm:$0xff]   ;;  %v4487_v53 = vld [vmem:[#allocation8 + $0x13c] ss:$12 sps:$4 sm:$0xff]  }
  0x5e   :  { %4023 = vmatprep.subr.bf16.mxu1 %v4470_v22  ;;  %v4484_v52 = vld [vmem:[#allocation8 + $0x120] ss:$12 sps:$4 sm:$0xff]   ;;  %v4501_v54 = vld [vmem:[#allocation8 + $0x1b8] ss:$12 sps:$4 sm:$0xff]   ;;  %v4505_v55 = vld [vmem:[#allocation8 + $0x290] ss:$12 sps:$4 sm:$0xff]  }
  0x5f   :  { %1480 = vmatpush1.bf16.msra.mxu0 %v4446_v13  ;;  %v4489_v56 = vld [vmem:[#allocation8 + $0x138] ss:$12 sps:$4 sm:$0xff]   ;;  %v4506_v57 = vld [vmem:[#allocation8 + $0x1d0] ss:$12 sps:$4 sm:$0xff]   ;;  %v4492_v58 = vld [vmem:[#allocation8 + $0x154] ss:$12 sps:$4 sm:$0xff]  }
  0x60   :  { %1481 = vmatprep.subr.bf16.mxu0 %v4447_v14  ;;  %v4510_v59 = vld [vmem:[#allocation8 + $0x2a8] ss:$12 sps:$4 sm:$0xff]   ;;  %v4494_v60 = vld [vmem:[#allocation8 + $0x150] ss:$12 sps:$4 sm:$0xff]   ;;  %v4497_v61 = vld [vmem:[#allocation8 + $0x16c] ss:$12 sps:$4 sm:$0xff]  }
  0x61   :  { %4024 = vmatpush3.bf16.msra.mxu1 %v4471_v23  ;;  %v4511_v62 = vld [vmem:[#allocation8 + $0x1e8] ss:$12 sps:$4 sm:$0xff]   ;;  %v4515_v63 = vld [vmem:[#allocation8 + $0x2c0] ss:$12 sps:$4 sm:$0xff]   ;;  %v4504_v8 = vld [vmem:[#allocation8 + $0x184] ss:$12 sps:$4 sm:$0xff]  }
  0x62   :  { %4025 = vmatprep.subr.bf16.mxu1 %v4475_v25  ;;  %v160_v0 = vld [vmem:[#allocation5 + $0x88] sm:$0xff]  ;;  %v159_v4 = vld [vmem:[#allocation5 + $0x80] sm:$0xff]  ;;  %v4525_v13 = vld [vmem:[#allocation8 + $0x2f0] ss:$12 sps:$4 sm:$0xff]  }
  0x63   :  { %1482 = vmatpush1.bf16.msra.mxu0 %v4449_v17  ;;  %v168_v1 = vld [vmem:[#allocation5 + $0xc8] sm:$0xff]  ;;  %v167_v5 = vld [vmem:[#allocation5 + $0xc0] sm:$0xff]  ;;  %v146_v14 = vld [vmem:[#allocation5 + $0x18] sm:$0xff] }
  0x64   :  { %1483 = vmatprep.subr.bf16.mxu0 %v4452_v20  ;;  %v4499_v2 = vld [vmem:[#allocation8 + $0x168] ss:$12 sps:$4 sm:$0xff]   ;;  %v184_v3 = vpack.c.bf16 %v168_v1, %v160_v0  ;;  %v4516_v6 = vld [vmem:[#allocation8 + $0x200] ss:$12 sps:$4 sm:$0xff]   ;;  %v183_v7 = vpack.c.bf16 %v167_v5, %v159_v4  ;;  %v4520_v9 = vld [vmem:[#allocation8 + $0x2d8] ss:$12 sps:$4 sm:$0xff]  }
  0x65   :  { %4026 = vmatpush3.bf16.msra.mxu1 %v4476_v28  ;;  %v4502_v10 = vld [vmem:[#allocation8 + $0x180] ss:$12 sps:$4 sm:$0xff]   ;;  %v4509_v11 = vld [vmem:[#allocation8 + $0x19c] ss:$12 sps:$4 sm:$0xff]   ;;  %v4521_v12 = vld [vmem:[#allocation8 + $0x218] ss:$12 sps:$4 sm:$0xff]  }
  0x66   :  { %4027 = vmatprep.subr.bf16.mxu1 %v4480_v29  ;;  %v154_v15 = vld [vmem:[#allocation5 + $0x58] sm:$0xff]  ;;  %v145_v19 = vld [vmem:[#allocation5 + $0x10] sm:$0xff]  ;;  %v147_v0 = vld [vmem:[#allocation5 + $0x20] sm:$0xff] }
  0x67   :  { %1484 = vmatpush1.bf16.msra.mxu0 %v4454_v21  ;;  %v4507_v16 = vld [vmem:[#allocation8 + $0x198] ss:$12 sps:$4 sm:$0xff]   ;;  %v4526_v17 = vld [vmem:[#allocation8 + $0x230] ss:$12 sps:$4 sm:$0xff]   ;;  %v178_v18 = vpack.c.bf16 %v154_v15, %v146_v14  ;;  %v4514_v21 = vld [vmem:[#allocation8 + $0x1b4] ss:$12 sps:$4 sm:$0xff]  }
  0x68   :  { %1485 = vmatprep.subr.bf16.mxu0 %v4457_v24  ;;  %v153_v20 = vld [vmem:[#allocation5 + $0x50] sm:$0xff]  ;;  %v4519_v25 = vld [vmem:[#allocation8 + $0x1cc] ss:$12 sps:$4 sm:$0xff]   ;;  %v155_v1 = vld [vmem:[#allocation5 + $0x60] sm:$0xff] }
  0x69   :  { %4028 = vmatpush3.bf16.msra.mxu1 %v4481_v32  ;;  %v4530_v22 = vld [vmem:[#allocation8 + $0x3c8] ss:$12 sps:$4 sm:$0xff]   ;;  %v4512_v23 = vld [vmem:[#allocation8 + $0x1b0] ss:$12 sps:$4 sm:$0xff]   ;;  %v4970_v24 = vpack.c.bf16 %v153_v20, %v145_v19  ;;  %v4522_v32 = vld [vmem:[#allocation8 + $0x1e0] ss:$12 sps:$4 sm:$0xff]   ;;  %v4982_v4 = vpack.c.bf16 %v155_v1, %v147_v0 }
  0x6a   :  { %4029 = vmatprep.subr.bf16.mxu1 %v4485_v33  ;;  %v4517_v28 = vld [vmem:[#allocation8 + $0x1c8] ss:$12 sps:$4 sm:$0xff]   ;;  %v4524_v29 = vld [vmem:[#allocation8 + $0x1e4] ss:$12 sps:$4 sm:$0xff]   ;;  %v162_v41 = vld [vmem:[#allocation5 + $0x98] sm:$0xff] }
  0x6b   :  { %1486 = vmatpush1.bf16.msra.mxu0 %v4459_v26  ;;  %v4531_v26 = vld [vmem:[#allocation8 + $0x308] ss:$12 sps:$4 sm:$0xff]   ;;  %v4546_v38 = vld [vmem:[#allocation8 + $0x350] ss:$12 sps:$4 sm:$0xff]   ;;  %v4581_v14 = vld [vmem:[#allocation8 + $0x4b8] ss:$12 sps:$4 sm:$0xff]  }
  0x6c   :  { %1487 = vmatprep.subr.bf16.mxu0 %v4462_v27  ;;  %v4535_v27 = vld [vmem:[#allocation8 + $0x3e0] ss:$12 sps:$4 sm:$0xff]   ;;  %v4529_v33 = vld [vmem:[#allocation8 + $0x1fc] ss:$12 sps:$4 sm:$0xff]  }
  0x6d   :  { %4030 = vmatpush3.bf16.msra.mxu1 %v4486_v36  ;;  %v4527_v36 = vld [vmem:[#allocation8 + $0x1f8] ss:$12 sps:$4 sm:$0xff]   ;;  %v4534_v37 = vld [vmem:[#allocation8 + $0x214] ss:$12 sps:$4 sm:$0xff]   ;;  %v4585_v15 = vld [vmem:[#allocation8 + $0x590] ss:$12 sps:$4 sm:$0xff]  }
  0x6e   :  { %4043 = vmatprep.subr.bf16.mxu1 %v4490_v40  ;;  %v4550_v39 = vld [vmem:[#allocation8 + $0x428] ss:$12 sps:$4 sm:$0xff]   ;;  %v4532_v40 = vld [vmem:[#allocation8 + $0x210] ss:$12 sps:$4 sm:$0xff]   ;;  %v4616_v1 = vld [vmem:[#allocation8 + $0x3c0] ss:$12 sps:$4 sm:$0xff]  }
  0x6f   :  { %1488 = vmatpush1.bf16.msra.mxu0 %v4464_v30  ;;  %v4536_v30 = vld [vmem:[#allocation8 + $0x320] ss:$12 sps:$4 sm:$0xff]   ;;  %v170_v42 = vld [vmem:[#allocation5 + $0xd8] sm:$0xff]  ;;  %v4571_v5 = vld [vmem:[#allocation8 + $0x488] ss:$12 sps:$4 sm:$0xff]  }
  0x70   :  { %1489 = vmatprep.subr.bf16.mxu0 %v4467_v31  ;;  %1716 = vmatmul.mubr.bf16.vlgmr.msra.gmra.mrb[0].mxu1 %v4966_v45  ;;  %v4540_v31 = vld [vmem:[#allocation8 + $0x3f8] ss:$12 sps:$4 sm:$0xff]   ;;  %v164_v19 = vld [vmem:[#allocation5 + $0xa8] sm:$0xff] }
  0x71   :  { %4044 = vmatpush3.bf16.msra.mxu1 %v4491_v46  ;;  %1723 = vmatprep.mubr.bf16.mxu1 %v184_v3  ;;  %v161_v46 = vld [vmem:[#allocation5 + $0x90] sm:$0xff]  ;;  %v172_v20 = vld [vmem:[#allocation5 + $0xe8] sm:$0xff] }
  0x72   :  { %4045 = vmatprep.subr.bf16.mxu1 %v4495_v47  ;;  %v169_v47 = vld [vmem:[#allocation5 + $0xd0] sm:$0xff] }
  0x73   :  { %1490 = vmatpush1.bf16.msra.mxu0 %v4469_v34  ;;  %v4541_v34 = vld [vmem:[#allocation8 + $0x338] ss:$12 sps:$4 sm:$0xff]   ;;  %v4613_v0 = vld [vmem:[#allocation8 + $0x3a8] ss:$12 sps:$4 sm:$0xff]  }
  0x74   :  { %1491 = vmatprep.subr.bf16.mxu0 %v4472_v35  ;;  %v4545_v35 = vld [vmem:[#allocation8 + $0x410] ss:$12 sps:$4 sm:$0xff]  }
  0x75   :  { %4046 = vmatpush3.bf16.msra.mxu1 %v4496_v50  ;;  %v4537_v50 = vld [vmem:[#allocation8 + $0x228] ss:$12 sps:$4 sm:$0xff]  }
  0x76   :  { %4047 = vmatprep.subr.bf16.mxu1 %v4500_v51  ;;  %v4544_v51 = vld [vmem:[#allocation8 + $0x244] ss:$12 sps:$4 sm:$0xff]  }
  0x77   :  { %1492 = vmatpush1.bf16.msra.mxu0 %v4474_v43  ;;  %v4539_v43 = vld [vmem:[#allocation8 + $0x22c] ss:$12 sps:$4 sm:$0xff]  }
  0x78   :  { %1493 = vmatprep.subr.bf16.mxu0 %v4477_v44  ;;  %1724 = vmatmul.mubr.bf16.gmra.mrb[4].mxu1 %v183_v7  ;;  %v4551_v44 = vld [vmem:[#allocation8 + $0x368] ss:$12 sps:$4 sm:$0xff]  }
  0x79   :  { %4048 = vmatpush3.bf16.msra.mxu1 %v4501_v54  ;;  %1764 = vmatprep.mubr.bf16.mxu1 %v178_v18  ;;  %v148_v54 = vld [vmem:[#allocation5 + $0x28] sm:$0xff] }
  0x7a   :  { %4049 = vmatprep.subr.bf16.mxu1 %v4505_v55  ;;  %v156_v55 = vld [vmem:[#allocation5 + $0x68] sm:$0xff] }
  0x7b   :  { %1494 = vmatpush1.bf16.msra.mxu0 %v4479_v48  ;;  %v4555_v48 = vld [vmem:[#allocation8 + $0x440] ss:$12 sps:$4 sm:$0xff]  }
  0x7c   :  { %1495 = vmatprep.subr.bf16.mxu0 %v4482_v49  ;;  %v4975_v49 = vpack.c.bf16 %v169_v47, %v161_v46  ;;  %v149_v46 = vld [vmem:[#allocation5 + $0x30] sm:$0xff] }
  0x7d   :  { %4050 = vmatpush3.bf16.msra.mxu1 %v4506_v57  ;;  %v4979_v57 = vpack.c.bf16 %v156_v55, %v148_v54  ;;  %v157_v47 = vld [vmem:[#allocation5 + $0x70] sm:$0xff] }
  0x7e   :  { %4051 = vmatprep.subr.bf16.mxu1 %v4510_v59  ;;  %v4561_v59 = vld [vmem:[#allocation8 + $0x398] ss:$12 sps:$4 sm:$0xff]   ;;  %v4597_v54 = vld [vmem:[#allocation8 + $0x348] ss:$12 sps:$4 sm:$0xff]  }
  0x7f   :  { %1496 = vmatpush1.bf16.msra.mxu0 %v4484_v52  ;;  %v4556_v52 = vld [vmem:[#allocation8 + $0x380] ss:$12 sps:$4 sm:$0xff]   ;;  %v165_v55 = vld [vmem:[#allocation5 + $0xb0] sm:$0xff] }
  0x80   :  { %1497 = vmatprep.subr.bf16.mxu0 %v4487_v53  ;;  %v4560_v53 = vld [vmem:[#allocation8 + $0x458] ss:$12 sps:$4 sm:$0xff]  }
  0x81   :  { %4052 = vmatpush3.bf16.msra.mxu1 %v4511_v62  ;;  %v4566_v62 = vld [vmem:[#allocation8 + $0x3b0] ss:$12 sps:$4 sm:$0xff]  }
  0x82   :  { %4053 = vmatprep.subr.bf16.mxu1 %v4515_v63  ;;  %v4554_v63 = vld [vmem:[#allocation8 + $0x274] ss:$12 sps:$4 sm:$0xff]  }
  0x83   :  { %1498 = vmatpush1.bf16.msra.mxu0 %v4489_v56  ;;  %v4542_v56 = vld [vmem:[#allocation8 + $0x240] ss:$12 sps:$4 sm:$0xff]  }
  0x84   :  { %1499 = vmatprep.subr.bf16.mxu0 %v4492_v58  ;;  %v4549_v58 = vld [vmem:[#allocation8 + $0x25c] ss:$12 sps:$4 sm:$0xff]  }
  0x85   :  { %4054 = vmatpush3.bf16.msra.mxu1 %v4516_v6  ;;  %v4559_v6 = vld [vmem:[#allocation8 + $0x28c] ss:$12 sps:$4 sm:$0xff]  }
  0x86   :  { %4055 = vmatprep.subr.bf16.mxu1 %v4520_v9  ;;  %v4564_v9 = vld [vmem:[#allocation8 + $0x2a4] ss:$12 sps:$4 sm:$0xff]  }
  0x87   :  { %1500 = vmatpush1.bf16.msra.mxu0 %v4494_v60  ;;  %v4565_v60 = vld [vmem:[#allocation8 + $0x470] ss:$12 sps:$4 sm:$0xff]  }
  0x88   :  { %1501 = vmatprep.subr.bf16.mxu0 %v4497_v61  ;;  %v4547_v61 = vld [vmem:[#allocation8 + $0x258] ss:$12 sps:$4 sm:$0xff]  }
  0x89   :  { %4056 = vmatpush3.bf16.msra.mxu1 %v4521_v12  ;;  %v4562_v12 = vld [vmem:[#allocation8 + $0x2a0] ss:$12 sps:$4 sm:$0xff]  }
  0x8a   :  { %4057 = vmatprep.subr.bf16.mxu1 %v4525_v13  ;;  %v4569_v13 = vld [vmem:[#allocation8 + $0x2bc] ss:$12 sps:$4 sm:$0xff]  }
  0x8b   :  { %1502 = vmatpush1.bf16.msra.mxu0 %v4499_v2  ;;  %v4570_v2 = vld [vmem:[#allocation8 + $0x548] ss:$12 sps:$4 sm:$0xff]  }
  0x8c   :  { %1524 = vmatprep.subr.bf16.mxu0 %v4504_v8  ;;  %v4557_v8 = vld [vmem:[#allocation8 + $0x288] ss:$12 sps:$4 sm:$0xff]  }
  0x8d   :  { %4058 = vmatpush3.bf16.msra.mxu1 %v4526_v17  ;;  %v4574_v17 = vld [vmem:[#allocation8 + $0x2d4] ss:$12 sps:$4 sm:$0xff]  }
  0x8e   :  { %1504 = vmatmul.mubr.bf16.vlgmr.msra.gmra.mrb[0].mxu0 %v4966_v45  ;;  %4071 = vmatprep.subr.bf16.mxu1 %v4530_v22  ;;  %v4973_v45 = vpack.c.bf16 %v170_v42, %v162_v41  ;;  %v171_v22 = vld [vmem:[#allocation5 + $0xe0] sm:$0xff]  ;;  %v4605_v41 = vld [vmem:[#allocation8 + $0x5f0] ss:$12 sps:$4 sm:$0xff]  }
  0x8f   :  { %1525 = vmatpush1.bf16.msra.mxu0 %v4502_v10  ;;  %1513 = vmatprep.mubr.bf16.mxu0 %v184_v3  ;;  %v4552_v3 = vld [vmem:[#allocation8 + $0x270] ss:$12 sps:$4 sm:$0xff]   ;;  %v4576_v10 = vld [vmem:[#allocation8 + $0x4a0] ss:$12 sps:$4 sm:$0xff]   ;;  %v4587_v42 = vld [vmem:[#allocation8 + $0x318] ss:$12 sps:$4 sm:$0xff]  }
  0x90   :  { %1526 = vmatprep.subr.bf16.mxu0 %v4509_v11  ;;  %1765 = vmatmul.mubr.bf16.vlgmr.msra.gmra.mrb[8].mxu1 %v4970_v24  ;;  %v4580_v11 = vld [vmem:[#allocation8 + $0x578] ss:$12 sps:$4 sm:$0xff]  }
  0x91   :  { %4072 = vmatpush3.bf16.msra.mxu1 %v4531_v26  ;;  %1772 = vmatprep.mubr.bf16.mxu1 %v4973_v45  ;;  %v4572_v26 = vld [vmem:[#allocation8 + $0x2d0] ss:$12 sps:$4 sm:$0xff]  }
  0x92   :  { %4073 = vmatprep.subr.bf16.mxu1 %v4535_v27 }
  0x93   :  { %1527 = vmatpush1.bf16.msra.mxu0 %v4507_v16  ;;  %v4567_v16 = vld [vmem:[#allocation8 + $0x2b8] ss:$12 sps:$4 sm:$0xff]  }
  0x94   :  { %1528 = vmatprep.subr.bf16.mxu0 %v4514_v21  ;;  %v163_v21 = vld [vmem:[#allocation5 + $0xa0] sm:$0xff] }
  0x95   :  { %4074 = vmatpush3.bf16.msra.mxu1 %v4536_v30  ;;  %v4987_v27 = vpack.c.bf16 %v171_v22, %v163_v21  ;;  %v4595_v30 = vld [vmem:[#allocation8 + $0x5c0] ss:$12 sps:$4 sm:$0xff]   ;;  %v4646_v22 = vld [vmem:[#allocation8 + $0x4b0] ss:$12 sps:$4 sm:$0xff]  }
  0x96   :  { %1514 = vmatmul.mubr.bf16.gmra.mrb[4].mxu0 %v183_v7  ;;  %4075 = vmatprep.subr.bf16.mxu1 %v4540_v31  ;;  %v4575_v7 = vld [vmem:[#allocation8 + $0x560] ss:$12 sps:$4 sm:$0xff]   ;;  %v4577_v31 = vld [vmem:[#allocation8 + $0x2e8] ss:$12 sps:$4 sm:$0xff]  }
  0x97   :  { %1529 = vmatpush1.bf16.msra.mxu0 %v4512_v23  ;;  %1556 = vmatprep.mubr.bf16.mxu0 %v178_v18  ;;  %v4586_v18 = vld [vmem:[#allocation8 + $0x4d0] ss:$12 sps:$4 sm:$0xff]   ;;  %v4590_v23 = vld [vmem:[#allocation8 + $0x5a8] ss:$12 sps:$4 sm:$0xff]  }
  0x98   :  { %1530 = vmatprep.subr.bf16.mxu0 %v4519_v25  ;;  %1773 = vmatmul.mubr.bf16.gmra.mrb[12].mxu1 %v4975_v49  ;;  %v4985_v25 = vpack.c.bf16 %v172_v20, %v164_v19  ;;  %v4645_v19 = vld [vmem:[#allocation8 + $0x49c] ss:$12 sps:$4 sm:$0xff]   ;;  %v4643_v20 = vld [vmem:[#allocation8 + $0x498] ss:$12 sps:$4 sm:$0xff]   ;;  %v4648_v21 = vld [vmem:[#allocation8 + $0x4b4] ss:$12 sps:$4 sm:$0xff]  }
  0x99   :  { %4076 = vmatpush3.bf16.msra.mxu1 %v4541_v34  ;;  %1813 = vmatprep.mubr.bf16.mxu1 %v4979_v57  ;;  %v4596_v34 = vld [vmem:[#allocation8 + $0x500] ss:$12 sps:$4 sm:$0xff]  }
  0x9a   :  { %4077 = vmatprep.subr.bf16.mxu1 %v4545_v35  ;;  %v158_v35 = vld [vmem:[#allocation5 + $0x78] sm:$0xff] }
  0x9b   :  { %1531 = vmatpush1.bf16.msra.mxu0 %v4517_v28  ;;  %v4579_v28 = vld [vmem:[#allocation8 + $0x2ec] ss:$12 sps:$4 sm:$0xff]  }
  0x9c   :  { %1532 = vmatprep.subr.bf16.mxu0 %v4524_v29  ;;  %v4591_v29 = vld [vmem:[#allocation8 + $0x4e8] ss:$12 sps:$4 sm:$0xff]  }
  0x9d   :  { %4078 = vmatpush3.bf16.msra.mxu1 %v4546_v38  ;;  %v4582_v38 = vld [vmem:[#allocation8 + $0x300] ss:$12 sps:$4 sm:$0xff]  }
  0x9e   :  { %4079 = vmatprep.subr.bf16.mxu1 %v4550_v39  ;;  %v4589_v39 = vld [vmem:[#allocation8 + $0x31c] ss:$12 sps:$4 sm:$0xff]  }
  0x9f   :  { %1533 = vmatpush1.bf16.msra.mxu0 %v4522_v32  ;;  %v150_v32 = vld [vmem:[#allocation5 + $0x38] sm:$0xff] }
  0xa0   :  { %1534 = vmatprep.subr.bf16.mxu0 %v4529_v33  ;;  %v4584_v33 = vld [vmem:[#allocation8 + $0x304] ss:$12 sps:$4 sm:$0xff]  }
  0xa1   :  { %4080 = vmatpush3.bf16.msra.mxu1 %v4551_v44  ;;  %v4606_v44 = vld [vmem:[#allocation8 + $0x530] ss:$12 sps:$4 sm:$0xff]  }
  0xa2   :  { %4081 = vmatprep.subr.bf16.mxu1 %v4555_v48  ;;  %v166_v48 = vld [vmem:[#allocation5 + $0xb8] sm:$0xff] }
  0xa3   :  { %1535 = vmatpush1.bf16.msra.mxu0 %v4527_v36  ;;  %v4600_v36 = vld [vmem:[#allocation8 + $0x5d8] ss:$12 sps:$4 sm:$0xff]  }
  0xa4   :  { %1536 = vmatprep.subr.bf16.mxu0 %v4534_v37  ;;  %v4991_v37 = vpack.c.bf16 %v158_v35, %v150_v32  ;;  %v4663_v32 = vld [vmem:[#allocation8 + $0x52c] ss:$12 sps:$4 sm:$0xff]   ;;  %v4669_v35 = vld [vmem:[#allocation8 + $0x55c] ss:$12 sps:$4 sm:$0xff]  }
  0xa5   :  { %4082 = vmatpush3.bf16.msra.mxu1 %v4556_v52  ;;  %v4592_v52 = vld [vmem:[#allocation8 + $0x330] ss:$12 sps:$4 sm:$0xff]  }
  0xa6   :  { %4083 = vmatprep.subr.bf16.mxu1 %v4560_v53 }
  0xa7   :  { %1537 = vmatpush1.bf16.msra.mxu0 %v4532_v40  ;;  %v4601_v40 = vld [vmem:[#allocation8 + $0x518] ss:$12 sps:$4 sm:$0xff]  }
  0xa8   :  { %1538 = vmatprep.subr.bf16.mxu0 %v4539_v43  ;;  %v4594_v43 = vld [vmem:[#allocation8 + $0x334] ss:$12 sps:$4 sm:$0xff]  }
  0xa9   :  { %4084 = vmatpush3.bf16.msra.mxu1 %v4561_v59  ;;  %v4602_v59 = vld [vmem:[#allocation8 + $0x360] ss:$12 sps:$4 sm:$0xff]  }
  0xaa   :  { %4085 = vmatprep.subr.bf16.mxu1 %v4565_v60  ;;  %v4609_v60 = vld [vmem:[#allocation8 + $0x37c] ss:$12 sps:$4 sm:$0xff]  }
  0xab   :  { %1539 = vmatpush1.bf16.msra.mxu0 %v4537_v50  ;;  %v174_v50 = vld [vmem:[#allocation5 + $0xf8] sm:$0xff] }
  0xac   :  { %1540 = vmatprep.subr.bf16.mxu0 %v4544_v51  ;;  %v4996_v51 = vpack.c.bf16 %v157_v47, %v149_v46  ;;  %v4998_v53 = vpack.c.bf16 %v174_v50, %v166_v48  ;;  %v4684_v46 = vld [vmem:[#allocation8 + $0x5d4] ss:$12 sps:$4 sm:$0xff]   ;;  %v4682_v47 = vld [vmem:[#allocation8 + $0x5d0] ss:$12 sps:$4 sm:$0xff]   ;;  %v4687_v48 = vld [vmem:[#allocation8 + $0x5ec] ss:$12 sps:$4 sm:$0xff]  }
  0xad   :  { %4086 = vmatpush3.bf16.msra.mxu1 %v4566_v62  ;;  %v4610_v62 = vld [vmem:[#allocation8 + $0x390] ss:$12 sps:$4 sm:$0xff]   ;;  %v4685_v50 = vld [vmem:[#allocation8 + $0x5e8] ss:$12 sps:$4 sm:$0xff]  }
  0xae   :  { %4099 = vmatprep.subr.bf16.mxu1 %v4570_v2  ;;  %v4621_v2 = vld [vmem:[#allocation8 + $0x3dc] ss:$12 sps:$4 sm:$0xff]  }
  0xaf   :  { %1541 = vmatpush1.bf16.msra.mxu0 %v4542_v56  ;;  %v173_v56 = vld [vmem:[#allocation5 + $0xf0] sm:$0xff] }
  0xb0   :  { %1542 = vmatprep.subr.bf16.mxu0 %v4549_v58  ;;  %1814 = vmatmul.mubr.bf16.vlgmr.msra.gmra.mrb[16].mxu1 %v4982_v4  ;;  %v5004_v58 = vpack.c.bf16 %v173_v56, %v165_v55 }
  0xb1   :  { %4100 = vmatpush3.bf16.msra.mxu1 %v4571_v5  ;;  %1821 = vmatprep.mubr.bf16.mxu1 %v4985_v25  ;;  %v4624_v5 = vld [vmem:[#allocation8 + $0x3f4] ss:$12 sps:$4 sm:$0xff]  }
  0xb2   :  { %4101 = vmatprep.subr.bf16.mxu1 %v4575_v7  ;;  %v4627_v7 = vld [vmem:[#allocation8 + $0x40c] ss:$12 sps:$4 sm:$0xff]  }
  0xb3   :  { %1543 = vmatpush1.bf16.msra.mxu0 %v4547_v61  ;;  %v4607_v61 = vld [vmem:[#allocation8 + $0x378] ss:$12 sps:$4 sm:$0xff]  }
  0xb4   :  { %1544 = vmatprep.subr.bf16.mxu0 %v4554_v63  ;;  %v4615_v63 = vld [vmem:[#allocation8 + $0x3ac] ss:$12 sps:$4 sm:$0xff]  }
  0xb5   :  { %4102 = vmatpush3.bf16.msra.mxu1 %v4576_v10  ;;  %v4628_v10 = vld [vmem:[#allocation8 + $0x420] ss:$12 sps:$4 sm:$0xff]  }
  0xb6   :  { %4103 = vmatprep.subr.bf16.mxu1 %v4580_v11  ;;  %v4633_v11 = vld [vmem:[#allocation8 + $0x43c] ss:$12 sps:$4 sm:$0xff]  }
  0xb7   :  { %1545 = vmatpush1.bf16.msra.mxu0 %v4552_v3  ;;  %v4619_v3 = vld [vmem:[#allocation8 + $0x3d8] ss:$12 sps:$4 sm:$0xff]  }
  0xb8   :  { %1546 = vmatprep.subr.bf16.mxu0 %v4559_v6  ;;  %1822 = vmatmul.mubr.bf16.gmra.mrb[20].mxu1 %v4987_v27  ;;  %v4622_v6 = vld [vmem:[#allocation8 + $0x3f0] ss:$12 sps:$4 sm:$0xff]  }
  0xb9   :  { %4104 = vmatpush3.bf16.msra.mxu1 %v4581_v14  ;;  %1862 = vmatprep.mubr.bf16.mxu1 %v4991_v37  ;;  %v4634_v14 = vld [vmem:[#allocation8 + $0x450] ss:$12 sps:$4 sm:$0xff]  }
  0xba   :  { %4105 = vmatprep.subr.bf16.mxu1 %v4585_v15  ;;  %v4639_v15 = vld [vmem:[#allocation8 + $0x46c] ss:$12 sps:$4 sm:$0xff]  }
  0xbb   :  { %1547 = vmatpush1.bf16.msra.mxu0 %v4557_v8  ;;  %v4625_v8 = vld [vmem:[#allocation8 + $0x408] ss:$12 sps:$4 sm:$0xff]  }
  0xbc   :  { %1548 = vmatprep.subr.bf16.mxu0 %v4564_v9  ;;  %v4630_v9 = vld [vmem:[#allocation8 + $0x424] ss:$12 sps:$4 sm:$0xff]  }
  0xbd   :  { %4106 = vmatpush3.bf16.msra.mxu1 %v4586_v18  ;;  %v4640_v18 = vld [vmem:[#allocation8 + $0x480] ss:$12 sps:$4 sm:$0xff]  }
  0xbe   :  { %4107 = vmatprep.subr.bf16.mxu1 %v4590_v23  ;;  %v4651_v23 = vld [vmem:[#allocation8 + $0x4cc] ss:$12 sps:$4 sm:$0xff]  }
  0xbf   :  { %1549 = vmatpush1.bf16.msra.mxu0 %v4562_v12  ;;  %v4631_v12 = vld [vmem:[#allocation8 + $0x438] ss:$12 sps:$4 sm:$0xff]  }
  0xc0   :  { %1550 = vmatprep.subr.bf16.mxu0 %v4569_v13  ;;  %v4636_v13 = vld [vmem:[#allocation8 + $0x454] ss:$12 sps:$4 sm:$0xff]  }
  0xc1   :  { %4108 = vmatpush3.bf16.msra.mxu1 %v4591_v29  ;;  %v4657_v29 = vld [vmem:[#allocation8 + $0x4fc] ss:$12 sps:$4 sm:$0xff]  }
  0xc2   :  { %4109 = vmatprep.subr.bf16.mxu1 %v4595_v30  ;;  %v4660_v30 = vld [vmem:[#allocation8 + $0x514] ss:$12 sps:$4 sm:$0xff]  }
  0xc3   :  { %1551 = vmatpush1.bf16.msra.mxu0 %v4567_v16  ;;  %v4637_v16 = vld [vmem:[#allocation8 + $0x468] ss:$12 sps:$4 sm:$0xff]  }
  0xc4   :  { %1552 = vmatprep.subr.bf16.mxu0 %v4574_v17  ;;  %v4642_v17 = vld [vmem:[#allocation8 + $0x484] ss:$12 sps:$4 sm:$0xff]  }
  0xc5   :  { %4110 = vmatpush3.bf16.msra.mxu1 %v4596_v34  ;;  %v4664_v34 = vld [vmem:[#allocation8 + $0x540] ss:$12 sps:$4 sm:$0xff]  }
  0xc6   :  { %4111 = vmatprep.subr.bf16.mxu1 %v4600_v36  ;;  %v4667_v36 = vld [vmem:[#allocation8 + $0x558] ss:$12 sps:$4 sm:$0xff]  }
  0xc7   :  { %1553 = vmatpush1.bf16.msra.mxu0 %v4572_v26  ;;  %v4649_v26 = vld [vmem:[#allocation8 + $0x4c8] ss:$12 sps:$4 sm:$0xff]  }
  0xc8   :  { %1554 = vmatprep.subr.bf16.mxu0 %v4579_v28  ;;  %v4654_v28 = vld [vmem:[#allocation8 + $0x4e4] ss:$12 sps:$4 sm:$0xff]  }
  0xc9   :  { %4112 = vmatpush3.bf16.msra.mxu1 %v4601_v40  ;;  %v4673_v40 = vld [vmem:[#allocation8 + $0x588] ss:$12 sps:$4 sm:$0xff]  }
  0xca   :  { %4113 = vmatprep.subr.bf16.mxu1 %v4605_v41  ;;  %v4678_v41 = vld [vmem:[#allocation8 + $0x5a4] ss:$12 sps:$4 sm:$0xff]  }
  0xcb   :  { %1555 = vmatpush1.bf16.msra.mxu0 %v4577_v31  ;;  %v4658_v31 = vld [vmem:[#allocation8 + $0x510] ss:$12 sps:$4 sm:$0xff]  }
  0xcc   :  { %1577 = vmatprep.subr.bf16.mxu0 %v4584_v33  ;;  %v4666_v33 = vld [vmem:[#allocation8 + $0x544] ss:$12 sps:$4 sm:$0xff]  }
  0xcd   :  { %4114 = vmatpush3.bf16.msra.mxu1 %v4606_v44  ;;  %v4679_v44 = vld [vmem:[#allocation8 + $0x5b8] ss:$12 sps:$4 sm:$0xff]  }
  0xce   :  { %1557 = vmatmul.mubr.bf16.vlgmr.msra.gmra.mrb[0].mxu0 %v4970_v24  ;;  %v4599_v24 = vld [vmem:[#allocation8 + $0x34c] ss:$12 sps:$4 sm:$0xff]  }
  0xcf   :  { %1578 = vmatpush1.bf16.msra.mxu0 %v4582_v38  ;;  %1566 = vmatprep.mubr.bf16.mxu0 %v4973_v45  ;;  %v4604_v45 = vld [vmem:[#allocation8 + $0x364] ss:$12 sps:$4 sm:$0xff]  }
  0xd0   :  { %1579 = vmatprep.subr.bf16.mxu0 %v4589_v39  ;;  %1863 = vmatmul.mubr.bf16.vlgmr.msra.gmra.mrb[24].mxu1 %v4996_v51  ;;  %v4670_v38 = vld [vmem:[#allocation8 + $0x570] ss:$12 sps:$4 sm:$0xff]   ;;  %v4675_v39 = vld [vmem:[#allocation8 + $0x58c] ss:$12 sps:$4 sm:$0xff]  }
  0xd1   :  { %1870 = vmatprep.mubr.bf16.mxu1 %v4998_v53 }
  0xd3   :  { %1580 = vmatpush1.bf16.msra.mxu0 %v4587_v42  ;;  %v4676_v42 = vld [vmem:[#allocation8 + $0x5a0] ss:$12 sps:$4 sm:$0xff]  }
  0xd4   :  { %1581 = vmatprep.subr.bf16.mxu0 %v4594_v43  ;;  %v4681_v43 = vld [vmem:[#allocation8 + $0x5bc] ss:$12 sps:$4 sm:$0xff]  }
  0xd6   :  { %1567 = vmatmul.mubr.bf16.gmra.mrb[4].mxu0 %v4975_v49  ;;  %v4612_v49 = vld [vmem:[#allocation8 + $0x394] ss:$12 sps:$4 sm:$0xff]  }
  0xd7   :  { %1582 = vmatpush1.bf16.msra.mxu0 %v4592_v52  ;;  %1609 = vmatprep.mubr.bf16.mxu0 %v4979_v57  ;;  %v4618_v57 = vld [vmem:[#allocation8 + $0x3c4] ss:$12 sps:$4 sm:$0xff]  }
  0xd8   :  { %1583 = vmatprep.subr.bf16.mxu0 %v4599_v24  ;;  %1871 = vmatmul.mubr.bf16.gmra.mrb[28].mxu1 %v5004_v58 }
  0xdb   :  { %1584 = vmatpush1.bf16.msra.mxu0 %v4597_v54 }
  0xdc   :  { %1585 = vmatprep.subr.bf16.mxu0 %v4604_v45 }
  0xdf   :  { %1586 = vmatpush1.bf16.msra.mxu0 %v4602_v59 }
  0xe0   :  { %1587 = vmatprep.subr.bf16.mxu0 %v4609_v60 }
  0xe3   :  { %1588 = vmatpush1.bf16.msra.mxu0 %v4607_v61 }
  0xe4   :  { %1589 = vmatprep.subr.bf16.mxu0 %v4612_v49 }
  0xe7   :  { %1590 = vmatpush1.bf16.msra.mxu0 %v4610_v62 }
  0xe8   :  { %1591 = vmatprep.subr.bf16.mxu0 %v4615_v63 }
  0xeb   :  { %1592 = vmatpush1.bf16.msra.mxu0 %v4613_v0 }
  0xec   :  { %1593 = vmatprep.subr.bf16.mxu0 %v4618_v57 }
  0xef   :  { %1594 = vmatpush1.bf16.msra.mxu0 %v4616_v1 }
  0xf0   :  { %1595 = vmatprep.subr.bf16.mxu0 %v4621_v2 }
  0xf3   :  { %1596 = vmatpush1.bf16.msra.mxu0 %v4619_v3 }
  0xf4   :  { %1597 = vmatprep.subr.bf16.mxu0 %v4624_v5 }
  0xf7   :  { %1598 = vmatpush1.bf16.msra.mxu0 %v4622_v6 }
  0xf8   :  { %1599 = vmatprep.subr.bf16.mxu0 %v4627_v7 }
  0xfb   :  { %1600 = vmatpush1.bf16.msra.mxu0 %v4625_v8 }
  0xfc   :  { %1601 = vmatprep.subr.bf16.mxu0 %v4630_v9 }
  0xff   :  { %1602 = vmatpush1.bf16.msra.mxu0 %v4628_v10 }
 0x100   :  { %1603 = vmatprep.subr.bf16.mxu0 %v4633_v11 }
 0x103   :  { %1604 = vmatpush1.bf16.msra.mxu0 %v4631_v12 }
 0x104   :  { %1605 = vmatprep.subr.bf16.mxu0 %v4636_v13 }
 0x107   :  { %1606 = vmatpush1.bf16.msra.mxu0 %v4634_v14 }
 0x108   :  { %1607 = vmatprep.subr.bf16.mxu0 %v4639_v15 }
 0x10b   :  { %1608 = vmatpush1.bf16.msra.mxu0 %v4637_v16 }
 0x10c   :  { %1630 = vmatprep.subr.bf16.mxu0 %v4642_v17 }
 0x10e   :  { %1610 = vmatmul.mubr.bf16.vlgmr.msra.gmra.mrb[0].mxu0 %v4982_v4  ;;  %v4652_v4 = vld [vmem:[#allocation8 + $0x4e0] ss:$12 sps:$4 sm:$0xff]  }
 0x10f   :  { %1631 = vmatpush1.bf16.msra.mxu0 %v4640_v18  ;;  %1619 = vmatprep.mubr.bf16.mxu0 %v4985_v25  ;;  %v4655_v25 = vld [vmem:[#allocation8 + $0x4f8] ss:$12 sps:$4 sm:$0xff]  }
 0x110   :  { %1632 = vmatprep.subr.bf16.mxu0 %v4645_v19 }
 0x113   :  { %1633 = vmatpush1.bf16.msra.mxu0 %v4643_v20 }
 0x114   :  { %1634 = vmatprep.subr.bf16.mxu0 %v4648_v21 }
 0x116   :  { %1620 = vmatmul.mubr.bf16.gmra.mrb[4].mxu0 %v4987_v27  ;;  %v4661_v27 = vld [vmem:[#allocation8 + $0x528] ss:$12 sps:$4 sm:$0xff]  }
 0x117   :  { %1635 = vmatpush1.bf16.msra.mxu0 %v4646_v22  ;;  %1662 = vmatprep.mubr.bf16.mxu0 %v4991_v37  ;;  %v4672_v37 = vld [vmem:[#allocation8 + $0x574] ss:$12 sps:$4 sm:$0xff]  }
 0x118   :  { %1636 = vmatprep.subr.bf16.mxu0 %v4651_v23 }
 0x11b   :  { %1637 = vmatpush1.bf16.msra.mxu0 %v4649_v26 }
 0x11c   :  { %1638 = vmatprep.subr.bf16.mxu0 %v4654_v28 }
 0x11f   :  { %1639 = vmatpush1.bf16.msra.mxu0 %v4652_v4 }
 0x120   :  { %1640 = vmatprep.subr.bf16.mxu0 %v4657_v29 }
 0x123   :  { %1641 = vmatpush1.bf16.msra.mxu0 %v4655_v25 }
 0x124   :  { %1642 = vmatprep.subr.bf16.mxu0 %v4660_v30 }
 0x127   :  { %1643 = vmatpush1.bf16.msra.mxu0 %v4658_v31 }
 0x128   :  { %1644 = vmatprep.subr.bf16.mxu0 %v4663_v32 }
 0x12b   :  { %1645 = vmatpush1.bf16.msra.mxu0 %v4661_v27 }
 0x12c   :  { %1646 = vmatprep.subr.bf16.mxu0 %v4666_v33 }
 0x12f   :  { %1647 = vmatpush1.bf16.msra.mxu0 %v4664_v34 }
 0x130   :  { %1648 = vmatprep.subr.bf16.mxu0 %v4669_v35 }
 0x133   :  { %1649 = vmatpush1.bf16.msra.mxu0 %v4667_v36 }
 0x134   :  { %1650 = vmatprep.subr.bf16.mxu0 %v4672_v37 }
 0x137   :  { %1651 = vmatpush1.bf16.msra.mxu0 %v4670_v38 }
 0x138   :  { %1652 = vmatprep.subr.bf16.mxu0 %v4675_v39 }
 0x13b   :  { %1653 = vmatpush1.bf16.msra.mxu0 %v4673_v40 }
 0x13c   :  { %1654 = vmatprep.subr.bf16.mxu0 %v4678_v41 }
 0x13f   :  { %1655 = vmatpush1.bf16.msra.mxu0 %v4676_v42 }
 0x140   :  { %1656 = vmatprep.subr.bf16.mxu0 %v4681_v43 }
 0x143   :  { %1657 = vmatpush1.bf16.msra.mxu0 %v4679_v44  ;;  %v4031_v52 = vpop.f32.mrb[0].mxu1 }
 0x144   :  { %1658 = vmatprep.subr.bf16.mxu0 %v4684_v46  ;;  %v4032_v24 = vpop.f32.mrb[1].mxu1 }
 0x145   :  { %v4033_v54 = vadd.f32 %v4032_v24, %v4031_v52  ;;  %v4034_v55 = vpop.f32.mrb[2].mxu1 }
 0x146   :  { %v4035_v56 = vpop.f32.mrb[3].mxu1 }
 0x147   :  { %1659 = vmatpush1.bf16.msra.mxu0 %v4682_v47  ;;  %v4036_v45 = vadd.f32 %v4035_v56, %v4034_v55 }
 0x148   :  { %1660 = vmatprep.subr.bf16.mxu0 %v4687_v48 }
 0x14b   :  { %1661 = vmatpush1.bf16.msra.mxu0 %v4685_v50  ;;  %v4037_v59 = vpop.f32.mrb[4].mxu1 }
 0x14c   :  { %v4038_v60 = vpop.f32.mrb[5].mxu1 }
 0x14d   :  { %v4039_v61 = vadd.f32 %v4038_v60, %v4037_v59  ;;  %v4040_v49 = vpop.f32.mrb[6].mxu1 }
 0x14e   :  { %1663 = vmatmul.mubr.bf16.vlgmr.msra.gmra.mrb[0].mxu0 %v4996_v51  ;;  %v4041_v62 = vpop.f32.mrb[7].mxu1 }
 0x14f   :  { %1672 = vmatprep.mubr.bf16.mxu0 %v4998_v53  ;;  %v4042_v63 = vadd.f32 %v4041_v62, %v4040_v49 }
 0x156   :  { %1673 = vmatmul.mubr.bf16.gmra.mrb[4].mxu0 %v5004_v58 }
 0x163   :  { %v4059_v0 = vpop.f32.mrb[8].mxu1 }
 0x164   :  { %v4060_v57 = vpop.f32.mrb[9].mxu1 }
 0x165   :  { %v4061_v1 = vadd.f32 %v4060_v57, %v4059_v0  ;;  %v4062_v2 = vpop.f32.mrb[10].mxu1 }
 0x166   :  { %v4063_v3 = vpop.f32.mrb[11].mxu1 }
 0x167   :  { %v1767_v5 = vadd.f32 %v4061_v1, %v4033_v54  ;;  %v4064_v6 = vadd.f32 %v4063_v3, %v4062_v2 }
 0x169   :  { %v1770_v7 = vadd.f32 %v4064_v6, %v4036_v45 }
 0x16b   :  { %v4065_v8 = vpop.f32.mrb[12].mxu1 }
 0x16c   :  { %v4066_v51 = vpop.f32.mrb[13].mxu1 }
 0x16d   :  { %v4067_v9 = vadd.f32 %v4066_v51, %v4065_v8  ;;  %v4068_v53 = vpop.f32.mrb[14].mxu1 }
 0x16e   :  { %v4069_v10 = vpop.f32.mrb[15].mxu1 }
 0x16f   :  { %v1775_v58 = vadd.f32 %v4067_v9, %v4039_v61  ;;  %v4070_v11 = vadd.f32 %v4069_v10, %v4068_v53 }
 0x171   :  { %v1778_v12 = vadd.f32 %v4070_v11, %v4042_v63 }
 0x183   :  { %v4087_v13 = vpop.f32.mrb[16].mxu1 }
 0x184   :  { %v4088_v14 = vpop.f32.mrb[17].mxu1 }
 0x185   :  { %v4089_v15 = vadd.f32 %v4088_v14, %v4087_v13  ;;  %v4090_v16 = vpop.f32.mrb[18].mxu1 }
 0x186   :  { %v4091_v17 = vpop.f32.mrb[19].mxu1 }
 0x187   :  { %v1816_v18 = vadd.f32 %v4089_v15, %v1767_v5  ;;  %v4092_v19 = vadd.f32 %v4091_v17, %v4090_v16 }
 0x189   :  { %v1819_v20 = vadd.f32 %v4092_v19, %v1770_v7 }
 0x18b   :  { %v4093_v21 = vpop.f32.mrb[20].mxu1 }
 0x18c   :  { %v4094_v22 = vpop.f32.mrb[21].mxu1 }
 0x18d   :  { %v4095_v23 = vadd.f32 %v4094_v22, %v4093_v21  ;;  %v4096_v26 = vpop.f32.mrb[22].mxu1 }
 0x18e   :  { %v4097_v28 = vpop.f32.mrb[23].mxu1 }
 0x18f   :  { %v1824_v4 = vadd.f32 %v4095_v23, %v1775_v58  ;;  %v4098_v29 = vadd.f32 %v4097_v28, %v4096_v26 }
 0x191   :  { %v1827_v25 = vadd.f32 %v4098_v29, %v1778_v12 }
 0x1a3   :  { %v4115_v30 = vpop.f32.mrb[24].mxu1 }
 0x1a4   :  { %v4116_v31 = vpop.f32.mrb[25].mxu1 }
 0x1a5   :  { %v4117_v32 = vadd.f32 %v4116_v31, %v4115_v30  ;;  %v4118_v27 = vpop.f32.mrb[26].mxu1 }
 0x1a6   :  { %v4119_v33 = vpop.f32.mrb[27].mxu1 }
 0x1a7   :  { %v5014_v34 = vadd.f32 %v4117_v32, %v1816_v18  ;;  %v4120_v35 = vadd.f32 %v4119_v33, %v4118_v27 }
 0x1a9   :  { %v1912_v36 = vmul.f32 %v5014_v34, %v5014_v34  ;;  %v5018_v37 = vadd.f32 %v4120_v35, %v1819_v20 }
 0x1ab   :  { %v1897_v38 = vadd.f32 %v5018_v37, %v5014_v34  ;;  %v1915_v39 = vmul.f32 %v5018_v37, %v5018_v37  ;;  %v4121_v40 = vpop.f32.mrb[28].mxu1 }
 0x1ac   :  { %v4122_v41 = vpop.f32.mrb[29].mxu1 }
 0x1ad   :  { %v1940_v42 = vadd.f32 %v1915_v39, %v1912_v36  ;;  %v4123_v43 = vadd.f32 %v4122_v41, %v4121_v40  ;;  %v4124_v44 = vpop.f32.mrb[30].mxu1 }
 0x1ae   :  { %v4125_v46 = vpop.f32.mrb[31].mxu1 }
 0x1af   :  { %v5024_v47 = vadd.f32 %v4123_v43, %v1824_v4  ;;  %v4126_v48 = vadd.f32 %v4125_v46, %v4124_v44 }
 0x1b1   :  { %v1898_v50 = vadd.f32 %v1897_v38, %v5024_v47  ;;  %v1918_v52 = vmul.f32 %v5024_v47, %v5024_v47  ;;  %v5029_v24 = vadd.f32 %v4126_v48, %v1827_v25 }
 0x1b3   :  { %v1941_v54 = vadd.f32 %v1940_v42, %v1918_v52  ;;  %v1899_v55 = vadd.f32 %v1898_v50, %v5029_v24  ;;  %v1921_v56 = vmul.f32 %v5029_v24, %v5029_v24 }
 0x1b5   :  { %v1900_v45 = vrot.slane %v1899_v55, 4  ;;  %v1942_v59 = vadd.f32 %v1941_v54, %v1921_v56 }
 0x1b7   :  { %v1901_v60 = vadd.f32 %v1900_v45, %v1899_v55  ;;  %v1943_v61 = vrot.slane %v1942_v59, 4 }
 0x1b9   :  { %v1902_v49 = vrot.slane %v1901_v60, 2  ;;  %v1944_v62 = vadd.f32 %v1943_v61, %v1942_v59 }
 0x1bb   :  { %v1903_v63 = vadd.f32 %v1902_v49, %v1901_v60  ;;  %v1945_v0 = vrot.slane %v1944_v62, 2 }
 0x1bd   :  { %v1904_v57 = vrot.slane %v1903_v63, 1  ;;  %v1946_v1 = vadd.f32 %v1945_v0, %v1944_v62 }
 0x1bf   :  { %v1905_v2 = vadd.f32 %v1904_v57, %v1903_v63  ;;  %v1947_v3 = vrot.slane %v1946_v1, 1 }
 0x1c1   :  { %v5034_v5 = vmul.f32 0.03125, %v1905_v2  ;;  %v1948_v6 = vadd.f32 %v1947_v3, %v1946_v1 }
 0x1c3   :  { %v5036_v7 = vmul.f32 0.03125, %v1948_v6  ;;  %v5040_v8 = vmul.f32 %v5034_v5, %v5034_v5 }
 0x1c5   :  { %v1957_v51 = vsub.f32 %v5036_v7, %v5040_v8 }
 0x1c6   :  { %4787 = shalt.err (!%p4784_p12)  }
 0x1c7   :  { %s4788_s19 = scalar_lea.vmem %s140_s30, 3072  ;;  %p4793_p0 = scmp.lt.s32.totalorder %s140_s30, %s140_s30 }
 0x1c8   :  { %p4789_p13 = scmp.ne.s32.totalorder %s140_s30, %s4788_s19  ;;  %p4794_p1 = scmp.lt.s32.totalorder %s4788_s19, %s4788_s19 }
 0x1ca   :  { %p4795_p2 = por %p4794_p1, %p4793_p0 }
 0x1cc   :  { %p4796_p3 = pnand %p4795_p2, %p4789_p13 }
 0x1ce   :  { %4799 = shalt.err (!%p4796_p3)  }
 0x1cf   :  { %142 = dma.hbm_to_vmem [thread:$0]  %s5510_s3, 3072, %s140_s30, [#allocation4 + $0x2]  ;;  %v1960_v1 = vmax.f32 %v1957_v51, 0.0  ;;  %v1977_v7 = vlaneseq }
 0x1d1   :  { %v1978_v51 = vshrl.u32 %v1977_v7, 7 }
 0x221   :  { %v5056_v9 = vpop.f32.mrb[0].mxu0 }
 0x222   :  { %v5058_v53 = vpop.f32.mrb[1].mxu0  ;;  %v1910_v58 = vmul.f32 %v5056_v9, %v5056_v9 }
 0x223   :  { %v5060_v10 = vpop.f32.mrb[2].mxu0  ;;  %v1911_v14 = vmul.f32 %v5058_v53, %v5058_v53 }
 0x224   :  { %v1879_v11 = vadd.f32 %v5060_v10, %v5056_v9  ;;  %v1913_v12 = vmul.f32 %v5060_v10, %v5060_v10  ;;  %v5068_v13 = vpop.f32.mrb[3].mxu0 }
 0x225   :  { %v1888_v15 = vadd.f32 %v5068_v13, %v5058_v53  ;;  %v1914_v16 = vmul.f32 %v5068_v13, %v5068_v13 }
 0x226   :  { %v1922_v17 = vadd.f32 %v1913_v12, %v1910_v58 }
 0x227   :  { %v1931_v18 = vadd.f32 %v1914_v16, %v1911_v14 }
 0x229   :  { %v5076_v19 = vpop.f32.mrb[4].mxu0 }
 0x22a   :  { %v1880_v20 = vadd.f32 %v1879_v11, %v5076_v19  ;;  %v1916_v21 = vmul.f32 %v5076_v19, %v5076_v19  ;;  %v5081_v22 = vpop.f32.mrb[5].mxu0 }
 0x22b   :  { %v1889_v23 = vadd.f32 %v1888_v15, %v5081_v22  ;;  %v1917_v26 = vmul.f32 %v5081_v22, %v5081_v22  ;;  %v5086_v28 = vpop.f32.mrb[6].mxu0  ;;  %v1966_v15 = vadd.f32 1e-05, %v1960_v1 }
 0x22c   :  { %v1923_v4 = vadd.f32 %v1922_v17, %v1916_v21  ;;  %v1881_v29 = vadd.f32 %v1880_v20, %v5086_v28  ;;  %v1919_v25 = vmul.f32 %v5086_v28, %v5086_v28  ;;  %v5091_v30 = vpop.f32.mrb[7].mxu0 }
 0x22d   :  { %v1932_v31 = vadd.f32 %v1931_v18, %v1917_v26  ;;  %v1890_v32 = vadd.f32 %v1889_v23, %v5091_v30  ;;  %v1920_v27 = vmul.f32 %v5091_v30, %v5091_v30  ;;  %4688 = vrsqrt.f32 %v1966_v15 }
 0x22e   :  { %v1882_v33 = vrot.slane %v1881_v29, 4  ;;  %v1924_v35 = vadd.f32 %v1923_v4, %v1919_v25  ;;  %v4856_v23 = vmov 1966171168  }
 0x22f   :  { %v1891_v36 = vrot.slane %v1890_v32, 4  ;;  %v1933_v38 = vadd.f32 %v1932_v31, %v1920_v27  ;;  %v1975_v26 = vunpack.c.l.s4 %v4856_v23 }
 0x230   :  { %v1883_v39 = vadd.f32 %v1882_v33, %v1881_v29  ;;  %v1925_v40 = vrot.slane %v1924_v35, 4 }
 0x231   :  { %v1892_v41 = vadd.f32 %v1891_v36, %v1890_v32  ;;  %v1934_v42 = vrot.slane %v1933_v38, 4  ;;  %v1976_v8 = vunpack.c.0.s8 %v1975_v26  ;;  %v1961_v36 = vld [vmem:[#allocation10] ss:$8 sm:$0x7] }
 0x232   :  { %v1884_v43 = vrot.slane %v1883_v39, 2  ;;  %v1926_v44 = vadd.f32 %v1925_v40, %v1924_v35  ;;  %v5106_v40 = vsub.s32 1, %v1978_v51 }
 0x233   :  { %v1893_v46 = vrot.slane %v1892_v41, 2  ;;  %v1935_v48 = vadd.f32 %v1934_v42, %v1933_v38  ;;  %v5099_v25 = vsub.s32 %v1976_v8, %v1978_v51 }
 0x234   :  { %v1885_v50 = vadd.f32 %v1884_v43, %v1883_v39  ;;  %v1927_v52 = vrot.slane %v1926_v44, 2  ;;  %v5104_v39 = vsub.s32 0, %v1978_v51 }
 0x235   :  { %v1894_v54 = vadd.f32 %v1893_v46, %v1892_v41  ;;  %v1936_v55 = vrot.slane %v1935_v48, 2  ;;  %v5108_v41 = vsub.s32 2, %v1978_v51 }
 0x236   :  { %v1886_v56 = vrot.slane %v1885_v50, 1  ;;  %v1928_v45 = vadd.f32 %v1927_v52, %v1926_v44 }
 0x237   :  { %v1895_v59 = vrot.slane %v1894_v54, 1  ;;  %v1937_v60 = vadd.f32 %v1936_v55, %v1935_v48  ;;  %v4689_v4 = vpop.eup %4688 }
 0x238   :  { %v1887_v61 = vadd.f32 %v1886_v56, %v1885_v50  ;;  %v1929_v49 = vrot.slane %v1928_v45, 1  ;;  %v1987_v33 = vrot.slane %v4689_v4, %v5099_v25 }
 0x239   :  { %v1896_v62 = vadd.f32 %v1895_v59, %v1894_v54  ;;  %v1938_v63 = vrot.slane %v1937_v60, 1 }
 0x23a   :  { %v1907_v0 = vmul.f32 0.03125, %v1887_v61  ;;  %v1930_v57 = vadd.f32 %v1929_v49, %v1928_v45 }
 0x23b   :  { %v1908_v2 = vmul.f32 0.03125, %v1896_v62  ;;  %v1939_v3 = vadd.f32 %v1938_v63, %v1937_v60 }
 0x23c   :  { %v1949_v6 = vmul.f32 0.03125, %v1930_v57  ;;  %v1952_v58 = vmul.f32 %v1907_v0, %v1907_v0 }
 0x23d   :  { %v1950_v11 = vmul.f32 0.03125, %v1939_v3  ;;  %v1953_v12 = vmul.f32 %v1908_v2, %v1908_v2 }
 0x23e   :  { %v1955_v14 = vsub.f32 %v1949_v6, %v1952_v58 }
 0x23f   :  { %v1956_v16 = vsub.f32 %v1950_v11, %v1953_v12 }
 0x240   :  { %v1958_v17 = vmax.f32 %v1955_v14, 0.0 }
 0x241   :  { %v1959_v18 = vmax.f32 %v1956_v16, 0.0 }
 0x242   :  { %v1964_v20 = vadd.f32 1e-05, %v1958_v17 }
 0x243   :  { %v1965_v21 = vadd.f32 1e-05, %v1959_v18 }
 0x244   :  { %4690 = vrsqrt.f32 %v1964_v20 }
 0x245   :  { %4692 = vrsqrt.f32 %v1965_v21 }
 0x24e   :  { %v4691_v29 = vpop.eup %4690 }
 0x24f   :  { %v4693_v31 = vpop.eup %4692 }
 0x250   :  { %v1973_v32 = vcombine.low %v4691_v29, %v4693_v31 }
 0x252   :  { %v1980_v27 = vrot.slane %v1973_v32, %v5099_v25 }
 0x254   :  { %v1988_v35 = vcombine.low %v1980_v27, %v1987_v33 }
 0x256   :  { %v1995_v38 = vrot.slane %v1988_v35, %v5099_v25 }
 0x258   :  { %v1997_v42 = vmul.f32 %v1995_v38, %v1961_v36 }
 0x25a   :  { %v2002_v43 = vrot.slane %v1997_v42, %v5104_v39  ;;  %v2006_v44 = vrot.slane %v1997_v42, %v5106_v40  ;;  %v2010_v46 = vrot.slane %v1997_v42, %v5108_v41 }
 0x25c   :  { %v2014_v48 = vmul.f32 %v2002_v43, %v1907_v0  ;;  %v2015_v50 = vmul.f32 %v2006_v44, %v1908_v2  ;;  %v2016_v52 = vmul.f32 %v2010_v46, %v5034_v5  ;;  %v2045_v54 = vmul.f32 %v2002_v43, %v5056_v9  ;;  %v1963_v0 = vld [vmem:[#allocation10 + $0x4] ss:$8 sm:$0x7] }
 0x25d   :  { %v2046_v55 = vmul.f32 %v2006_v44, %v5058_v53  ;;  %v2047_v56 = vmul.f32 %v2010_v46, %v5014_v34  ;;  %v2048_v45 = vmul.f32 %v2002_v43, %v5060_v10  ;;  %v2049_v59 = vmul.f32 %v2006_v44, %v5068_v13 }
 0x25e   :  { %v2020_v60 = vcombine.low %v2014_v48, %v2015_v50  ;;  %v2050_v61 = vmul.f32 %v2010_v46, %v5018_v37  ;;  %v2051_v49 = vmul.f32 %v2002_v43, %v5076_v19  ;;  %v2052_v62 = vmul.f32 %v2006_v44, %v5081_v22 }
 0x25f   :  { %v2053_v63 = vmul.f32 %v2010_v46, %v5024_v47  ;;  %v2054_v5 = vmul.f32 %v2002_v43, %v5086_v28  ;;  %v2055_v9 = vmul.f32 %v2006_v44, %v5091_v30  ;;  %v2034_v34 = vrot.slane %v2016_v52, %v5099_v25 }
 0x260   :  { %v2027_v53 = vrot.slane %v2020_v60, %v5099_v25  ;;  %v2056_v10 = vmul.f32 %v2010_v46, %v5029_v24 }
 0x262   :  { %v2035_v13 = vcombine.low %v2027_v53, %v2034_v34 }
 0x264   :  { %v2042_v37 = vrot.slane %v2035_v13, %v5099_v25 }
 0x266   :  { %v2044_v57 = vsub.f32 %v1963_v0, %v2042_v37 }
 0x268   :  { %v2061_v19 = vrot.slane %v2044_v57, %v5104_v39  ;;  %v2065_v22 = vrot.slane %v2044_v57, %v5106_v40  ;;  %v2069_v47 = vrot.slane %v2044_v57, %v5108_v41 }
 0x26a   :  { %v2073_v28 = vadd.f32 %v2061_v19, %v2045_v54  ;;  %v2074_v1 = vadd.f32 %v2065_v22, %v2046_v55  ;;  %v2075_v30 = vadd.f32 %v2069_v47, %v2047_v56  ;;  %v2076_v2 = vadd.f32 %v2061_v19, %v2048_v45 }
 0x26b   :  { %v2077_v3 = vadd.f32 %v2065_v22, %v2049_v59  ;;  %v2078_v6 = vadd.f32 %v2069_v47, %v2050_v61  ;;  %v2079_v58 = vadd.f32 %v2061_v19, %v2051_v49  ;;  %v2080_v11 = vadd.f32 %v2065_v22, %v2052_v62 }
 0x26c   :  { %v2081_v24 = vadd.f32 %v2069_v47, %v2053_v63  ;;  %v2082_v12 = vadd.f32 %v2061_v19, %v2054_v5  ;;  %v2083_v14 = vadd.f32 %v2065_v22, %v2055_v9  ;;  %v2084_v15 = vadd.f32 %v2069_v47, %v2056_v10 }
 0x26d   :  { %v2085_v16 = vmax.f32 %v2073_v28, 0.0  ;;  %v2086_v17 = vmax.f32 %v2074_v1, 0.0  ;;  %v2087_v18 = vmax.f32 %v2075_v30, 0.0  ;;  %v2088_v20 = vmax.f32 %v2076_v2, 0.0 }
 0x26e   :  { %v2089_v21 = vmax.f32 %v2077_v3, 0.0  ;;  %v2090_v23 = vmax.f32 %v2078_v6, 0.0  ;;  %v2091_v26 = vmax.f32 %v2079_v58, 0.0  ;;  %v2092_v7 = vmax.f32 %v2080_v11, 0.0 }
 0x26f   :  { %v2093_v8 = vmax.f32 %v2081_v24, 0.0  ;;  %v2094_v51 = vmax.f32 %v2082_v12, 0.0  ;;  %v2095_v4 = vmax.f32 %v2083_v14, 0.0  ;;  %v2096_v29 = vmax.f32 %v2084_v15, 0.0 }
 0x270   :  { %v5132_v31 = vpack.c.bf16 %v2088_v20, %v2085_v16  ;;  %v5134_v32 = vpack.c.bf16 %v2089_v21, %v2086_v17  ;;  %v5136_v27 = vpack.c.bf16 %v2090_v23, %v2087_v18 }
 0x271   :  { %v5138_v33 = vpack.c.bf16 %v2094_v51, %v2091_v26  ;;  %v5140_v35 = vpack.c.bf16 %v2095_v4, %v2092_v7  ;;  %v5142_v36 = vpack.c.bf16 %v2096_v29, %v2093_v8 }
 0x272   :  { %4826 = dma.done.wait [#allocation4], 9216 }
 0x273   :  { %4827 = vsyncadd [#allocation4], 4294958080  ;;  %2211 = vmatprep.mubr.bf16.mxu1 %v5134_v32  ;;  %4295 = vmatprep.mubr.bf16.mxu0 %v5136_v27  ;;  %2623 = sst [smem:[#allocation21]] %s4843_s0  ;;  %v2108_v38 = vld [vmem:[#allocation2 + $0x8] sm:$0xff]  ;;  %v2107_v42 = vld [vmem:[#allocation2] sm:$0xff]  ;;  %v4857_v23 = vmov 0  }
 0x274   :  { %2625 = sst [smem:[#allocation21 + $0x1]] %s4843_s0  ;;  %v2111_v43 = vld [vmem:[#allocation2 + $0x20] sm:$0xff]  ;;  %2179 = vmatprep.subr.bf16.mxu1 %v2108_v38  ;;  %v2110_v44 = vld [vmem:[#allocation2 + $0x18] sm:$0xff]  ;;  %v2113_v48 = vld [vmem:[#allocation2 + $0x30] sm:$0xff]  ;;  %s4858_s0 = smov [#allocation20]  }
 0x275   :  { %2627 = sst [smem:[#allocation21 + $0x2]] %s4846_s4  ;;  %2180 = vmatpush1.bf16.msra.mxu1 %v2107_v42  ;;  %v2114_v46 = vld [vmem:[#allocation2 + $0x38] sm:$0xff]  ;;  %v2117_v50 = vld [vmem:[#allocation2 + $0x50] sm:$0xff]  ;;  %v2116_v52 = vld [vmem:[#allocation2 + $0x48] sm:$0xff] }
 0x276   :  { %2629 = sst [smem:[#allocation21 + $0x3]] %s4841_s17  ;;  %2181 = vmatprep.subr.bf16.mxu1 %v2111_v43  ;;  %v2120_v54 = vld [vmem:[#allocation2 + $0x68] sm:$0xff]  ;;  %v2119_v55 = vld [vmem:[#allocation2 + $0x60] sm:$0xff]  ;;  %v2157_v45 = vld [vmem:[#allocation2 + $0x190] sm:$0xff] }
 0x277   :  { %2631 = sst [smem:[#allocation21 + $0x4]] %s4847_s13  ;;  %v2123_v56 = vld [vmem:[#allocation2 + $0x80] sm:$0xff]  ;;  %4279 = vmatprep.subr.bf16.mxu0 %v2157_v45  ;;  %v2160_v59 = vld [vmem:[#allocation2 + $0x1a8] sm:$0xff]  ;;  %v2122_v60 = vld [vmem:[#allocation2 + $0x78] sm:$0xff] }
 0x278   :  { %2633 = sst [smem:[#allocation21 + $0x5]] %s4848_s15  ;;  %4280 = vmatpush3.bf16.msra.mxu0 %v2157_v45  ;;  %v2126_v61 = vld [vmem:[#allocation2 + $0x98] sm:$0xff]  ;;  %v2163_v49 = vld [vmem:[#allocation2 + $0x1c0] sm:$0xff]  ;;  %v2125_v62 = vld [vmem:[#allocation2 + $0x90] sm:$0xff] }
 0x279   :  { %2635 = sst [smem:[#allocation21 + $0x6]] %s4837_s28  ;;  %2182 = vmatpush1.bf16.msra.mxu1 %v2110_v44  ;;  %4281 = vmatprep.subr.bf16.mxu0 %v2160_v59  ;;  %v2129_v63 = vld [vmem:[#allocation2 + $0xb0] sm:$0xff]  ;;  %v2166_v5 = vld [vmem:[#allocation2 + $0x1d8] sm:$0xff]  ;;  %v2128_v9 = vld [vmem:[#allocation2 + $0xa8] sm:$0xff] }
 0x27a   :  { %2637 = sst [smem:[#allocation21 + $0x7]] %s4841_s17  ;;  %2183 = vmatprep.subr.bf16.mxu1 %v2114_v46  ;;  %v2132_v53 = vld [vmem:[#allocation2 + $0xc8] sm:$0xff]  ;;  %v2169_v34 = vld [vmem:[#allocation2 + $0x1f0] sm:$0xff]  ;;  %v2131_v10 = vld [vmem:[#allocation2 + $0xc0] sm:$0xff]  ;;  %s2607_s17 = scalar_lea.hbm %s5509_s2, 18432 }
 0x27b   :  { %2639 = sst [smem:[#allocation21 + $0x8]] %s4849_s16  ;;  %v2135_v13 = vld [vmem:[#allocation2 + $0xe0] sm:$0xff]  ;;  %v2172_v0 = vld [vmem:[#allocation2 + $0x208] sm:$0xff]  ;;  %v2134_v37 = vld [vmem:[#allocation2 + $0xd8] sm:$0xff] }
 0x27c   :  { %4282 = vmatpush3.bf16.msra.mxu0 %v2160_v59  ;;  %v2138_v57 = vld [vmem:[#allocation2 + $0xf8] sm:$0xff]  ;;  %v2175_v19 = vld [vmem:[#allocation2 + $0x220] sm:$0xff]  ;;  %v2137_v22 = vld [vmem:[#allocation2 + $0xf0] sm:$0xff] }
 0x27d   :  { %2184 = vmatpush1.bf16.msra.mxu1 %v2113_v48  ;;  %4283 = vmatprep.subr.bf16.mxu0 %v2163_v49  ;;  %v2141_v47 = vld [vmem:[#allocation2 + $0x110] sm:$0xff]  ;;  %v2178_v28 = vld [vmem:[#allocation2 + $0x238] sm:$0xff]  ;;  %v2140_v1 = vld [vmem:[#allocation2 + $0x108] sm:$0xff] }
 0x27e   :  { %2185 = vmatprep.subr.bf16.mxu1 %v2117_v50  ;;  %v2144_v30 = vld [vmem:[#allocation2 + $0x128] sm:$0xff]  ;;  %v2143_v2 = vld [vmem:[#allocation2 + $0x120] sm:$0xff]  ;;  %v2146_v6 = vld [vmem:[#allocation2 + $0x138] sm:$0xff] }
 0x27f   :  { %v2147_v3 = vld [vmem:[#allocation2 + $0x140] sm:$0xff]  ;;  %v2150_v58 = vld [vmem:[#allocation2 + $0x158] sm:$0xff]  ;;  %v2149_v11 = vld [vmem:[#allocation2 + $0x150] sm:$0xff] }
 0x280   :  { %4284 = vmatpush3.bf16.msra.mxu0 %v2163_v49  ;;  %v2153_v24 = vld [vmem:[#allocation2 + $0x170] sm:$0xff]  ;;  %v2152_v12 = vld [vmem:[#allocation2 + $0x168] sm:$0xff]  ;;  %v2155_v15 = vld [vmem:[#allocation2 + $0x180] sm:$0xff] }
 0x281   :  { %2186 = vmatpush1.bf16.msra.mxu1 %v2116_v52  ;;  %4285 = vmatprep.subr.bf16.mxu0 %v2166_v5  ;;  %v2156_v14 = vld [vmem:[#allocation2 + $0x188] sm:$0xff]  ;;  %v2159_v16 = vld [vmem:[#allocation2 + $0x1a0] sm:$0xff]  ;;  %v2158_v17 = vld [vmem:[#allocation2 + $0x198] sm:$0xff] }
 0x282   :  { %2187 = vmatprep.subr.bf16.mxu1 %v2120_v54  ;;  %v2162_v18 = vld [vmem:[#allocation2 + $0x1b8] sm:$0xff]  ;;  %v2161_v20 = vld [vmem:[#allocation2 + $0x1b0] sm:$0xff]  ;;  %v2164_v26 = vld [vmem:[#allocation2 + $0x1c8] sm:$0xff] }
 0x283   :  { %v2165_v21 = vld [vmem:[#allocation2 + $0x1d0] sm:$0xff]  ;;  %v2168_v7 = vld [vmem:[#allocation2 + $0x1e8] sm:$0xff]  ;;  %v2167_v8 = vld [vmem:[#allocation2 + $0x1e0] sm:$0xff] }
 0x284   :  { %4286 = vmatpush3.bf16.msra.mxu0 %v2166_v5  ;;  %v2171_v51 = vld [vmem:[#allocation2 + $0x200] sm:$0xff]  ;;  %v2170_v4 = vld [vmem:[#allocation2 + $0x1f8] sm:$0xff]  ;;  %v2173_v38 = vld [vmem:[#allocation2 + $0x210] sm:$0xff] }
 0x285   :  { %2188 = vmatpush1.bf16.msra.mxu1 %v2119_v55  ;;  %4287 = vmatprep.subr.bf16.mxu0 %v2169_v34  ;;  %v2174_v29 = vld [vmem:[#allocation2 + $0x218] sm:$0xff]  ;;  %v2177_v42 = vld [vmem:[#allocation2 + $0x230] sm:$0xff]  ;;  %v2176_v43 = vld [vmem:[#allocation2 + $0x228] sm:$0xff] }
 0x286   :  { %2189 = vmatprep.subr.bf16.mxu1 %v2123_v56  ;;  %v2133_v44 = vld [vmem:[#allocation2 + $0xd0] sm:$0xff]  ;;  %v2136_v48 = vld [vmem:[#allocation2 + $0xe8] sm:$0xff]  ;;  %v2139_v52 = vld [vmem:[#allocation2 + $0x100] sm:$0xff] }
 0x287   :  { %v2109_v46 = vld [vmem:[#allocation2 + $0x10] sm:$0xff]  ;;  %v2112_v50 = vld [vmem:[#allocation2 + $0x28] sm:$0xff]  ;;  %v2115_v54 = vld [vmem:[#allocation2 + $0x40] sm:$0xff] }
 0x288   :  { %4288 = vmatpush3.bf16.msra.mxu0 %v2169_v34  ;;  %v2142_v55 = vld [vmem:[#allocation2 + $0x118] sm:$0xff]  ;;  %v2145_v45 = vld [vmem:[#allocation2 + $0x130] sm:$0xff]  ;;  %v2148_v59 = vld [vmem:[#allocation2 + $0x148] sm:$0xff] }
 0x289   :  { %2190 = vmatpush1.bf16.msra.mxu1 %v2122_v60  ;;  %4289 = vmatprep.subr.bf16.mxu0 %v2172_v0  ;;  %v2118_v56 = vld [vmem:[#allocation2 + $0x58] sm:$0xff]  ;;  %v2124_v60 = vld [vmem:[#allocation2 + $0x88] sm:$0xff]  ;;  %v2127_v49 = vld [vmem:[#allocation2 + $0xa0] sm:$0xff] }
 0x28a   :  { %2191 = vmatprep.subr.bf16.mxu1 %v2126_v61  ;;  %v2151_v61 = vld [vmem:[#allocation2 + $0x160] sm:$0xff] }
 0x28b   :  { %v5177_v34 = vld [vmem:[#allocation10 + $0x5] ss:$8 sm:$0x7] }
 0x28c   :  { %4290 = vmatpush3.bf16.msra.mxu0 %v2172_v0 }
 0x28d   :  { %2192 = vmatpush1.bf16.msra.mxu1 %v2125_v62  ;;  %4291 = vmatprep.subr.bf16.mxu0 %v2175_v19  ;;  %v2154_v62 = vld [vmem:[#allocation2 + $0x178] sm:$0xff] }
 0x28e   :  { %2193 = vmatprep.subr.bf16.mxu1 %v2129_v63 }
 0x290   :  { %4292 = vmatpush3.bf16.msra.mxu0 %v2175_v19 }
 0x291   :  { %2194 = vmatpush1.bf16.msra.mxu1 %v2128_v9  ;;  %4293 = vmatprep.subr.bf16.mxu0 %v2178_v28 }
 0x292   :  { %2195 = vmatprep.subr.bf16.mxu1 %v2132_v53  ;;  %v5175_v53 = vld [vmem:[#allocation10 + $0x1] ss:$8 sm:$0x7] }
 0x294   :  { %4294 = vmatpush3.bf16.msra.mxu0 %v2178_v28 }
 0x295   :  { %2196 = vmatpush1.bf16.msra.mxu1 %v2131_v10 }
 0x296   :  { %2197 = vmatprep.subr.bf16.mxu1 %v2135_v13 }
 0x297   :  { %4296 = vmatmul.mubr.bf16.vlgmr.msra.gmra.mrb[8].mxu0 %v5142_v36 }
 0x299   :  { %2198 = vmatpush1.bf16.msra.mxu1 %v2134_v37 }
 0x29a   :  { %2199 = vmatprep.subr.bf16.mxu1 %v2138_v57 }
 0x29d   :  { %2200 = vmatpush1.bf16.msra.mxu1 %v2137_v22 }
 0x29e   :  { %2201 = vmatprep.subr.bf16.mxu1 %v2141_v47 }
 0x2a1   :  { %2202 = vmatpush1.bf16.msra.mxu1 %v2140_v1 }
 0x2a2   :  { %2203 = vmatprep.subr.bf16.mxu1 %v2144_v30 }
 0x2a5   :  { %2204 = vmatpush1.bf16.msra.mxu1 %v2143_v2 }
 0x2a6   :  { %2205 = vmatprep.subr.bf16.mxu1 %v2147_v3 }
 0x2a9   :  { %2206 = vmatpush1.bf16.msra.mxu1 %v2146_v6 }
 0x2aa   :  { %2207 = vmatprep.subr.bf16.mxu1 %v2150_v58 }
 0x2ad   :  { %2208 = vmatpush1.bf16.msra.mxu1 %v2149_v11 }
 0x2ae   :  { %2209 = vmatprep.subr.bf16.mxu1 %v2153_v24 }
 0x2b1   :  { %2210 = vmatpush1.bf16.msra.mxu1 %v2152_v12 }
 0x2b2   :  { %2232 = vmatprep.subr.bf16.mxu1 %v2156_v14 }
 0x2b4   :  { %2212 = vmatmul.mubr.bf16.vlgmr.msra.gmra.mrb[32].mxu1 %v5132_v31 }
 0x2b5   :  { %2233 = vmatpush1.bf16.msra.mxu1 %v2155_v15  ;;  %2221 = vmatprep.mubr.bf16.mxu1 %v5140_v35 }
 0x2b6   :  { %2234 = vmatprep.subr.bf16.mxu1 %v2159_v16 }
 0x2b9   :  { %2235 = vmatpush1.bf16.msra.mxu1 %v2158_v17 }
 0x2ba   :  { %2236 = vmatprep.subr.bf16.mxu1 %v2162_v18 }
 0x2bc   :  { %2222 = vmatmul.mubr.bf16.gmra.mrb[36].mxu1 %v5138_v33 }
 0x2bd   :  { %2237 = vmatpush1.bf16.msra.mxu1 %v2161_v20  ;;  %2264 = vmatprep.mubr.bf16.mxu1 %v4857_v23 }
 0x2be   :  { %2238 = vmatprep.subr.bf16.mxu1 %v2165_v21 }
 0x2c1   :  { %2239 = vmatpush1.bf16.msra.mxu1 %v2164_v26 }
 0x2c2   :  { %2240 = vmatprep.subr.bf16.mxu1 %v2168_v7 }
 0x2c5   :  { %2241 = vmatpush1.bf16.msra.mxu1 %v2167_v8 }
 0x2c6   :  { %2242 = vmatprep.subr.bf16.mxu1 %v2171_v51 }
 0x2c9   :  { %2243 = vmatpush1.bf16.msra.mxu1 %v2170_v4 }
 0x2ca   :  { %2244 = vmatprep.subr.bf16.mxu1 %v2174_v29 }
 0x2cd   :  { %2245 = vmatpush1.bf16.msra.mxu1 %v2173_v38 }
 0x2ce   :  { %2246 = vmatprep.subr.bf16.mxu1 %v2177_v42 }
 0x2d1   :  { %2247 = vmatpush1.bf16.msra.mxu1 %v2176_v43 }
 0x2d2   :  { %4127 = vmatprep.subr.bf16.mxu1 %v2133_v44 }
 0x2d4   :  { %2265 = vmatmul.mubr.bf16.vlgmr.msra.gmra.mrb[32].mxu1 %v5136_v27  ;;  %v2121_v27 = vld [vmem:[#allocation2 + $0x70] sm:$0xff] }
 0x2d5   :  { %4128 = vmatpush3.bf16.msra.mxu1 %v2109_v46  ;;  %2274 = vmatprep.mubr.bf16.mxu1 %v4857_v23 }
 0x2d6   :  { %4129 = vmatprep.subr.bf16.mxu1 %v2136_v48 }
 0x2d9   :  { %4130 = vmatpush3.bf16.msra.mxu1 %v2112_v50 }
 0x2da   :  { %4131 = vmatprep.subr.bf16.mxu1 %v2139_v52 }
 0x2dc   :  { %2275 = vmatmul.mubr.bf16.gmra.mrb[36].mxu1 %v5142_v36 }
 0x2dd   :  { %4132 = vmatpush3.bf16.msra.mxu1 %v2115_v54  ;;  %2317 = vmatprep.mubr.bf16.mxu1 %v5134_v32  ;;  %v2130_v32 = vld [vmem:[#allocation2 + $0xb8] sm:$0xff] }
 0x2de   :  { %4133 = vmatprep.subr.bf16.mxu1 %v2142_v55  ;;  %2641 = dma.general %s2607_s17, 9216, %s72_s11, %s4850_s1, %s4858_s0, [#allocation21], %s4942_s14, 0  }
 0x2e1   :  { %4134 = vmatpush3.bf16.msra.mxu1 %v2118_v56 }
 0x2e2   :  { %4135 = vmatprep.subr.bf16.mxu1 %v2145_v45 }
 0x2e5   :  { %4136 = vmatpush3.bf16.msra.mxu1 %v2121_v27 }
 0x2e6   :  { %4137 = vmatprep.subr.bf16.mxu1 %v2148_v59 }
 0x2e9   :  { %4138 = vmatpush3.bf16.msra.mxu1 %v2124_v60 }
 0x2ea   :  { %4139 = vmatprep.subr.bf16.mxu1 %v2151_v61 }
 0x2ed   :  { %4140 = vmatpush3.bf16.msra.mxu1 %v2127_v49 }
 0x2ee   :  { %4141 = vmatprep.subr.bf16.mxu1 %v2154_v62 }
 0x2f1   :  { %4142 = vmatpush3.bf16.msra.mxu1 %v2130_v32 }
 0x2f4   :  { %2318 = vmatmul.mubr.bf16.vlgmr.msra.gmra.mrb[40].mxu1 %v5132_v31 }
 0x2f5   :  { %2325 = vmatprep.mubr.bf16.mxu1 %v5140_v35 }
 0x2fc   :  { %2326 = vmatmul.mubr.bf16.gmra.mrb[44].mxu1 %v5138_v33 }
 0x36a   :  { %v5167_v36 = vpop.f32.mrb[8].mxu0 }
 0x36b   :  { %v5169_v63 = vpop.f32.mrb[9].mxu0 }
 0x36c   :  { %v5171_v5 = vpop.f32.mrb[10].mxu0 }
 0x36d   :  { %v5173_v9 = vpop.f32.mrb[11].mxu0 }
 0x3a7   :  { %v5186_v31 = vpop.f32.mrb[32].mxu1 }
 0x3a8   :  { %v5188_v33 = vpop.f32.mrb[33].mxu1  ;;  %v2413_v10 = vmul.f32 %v5186_v31, %v5186_v31 }
 0x3a9   :  { %v5190_v35 = vpop.f32.mrb[34].mxu1  ;;  %v2414_v57 = vmul.f32 %v5188_v33, %v5188_v33 }
 0x3aa   :  { %v2383_v13 = vadd.f32 %v5190_v35, %v5186_v31  ;;  %v2416_v0 = vmul.f32 %v5190_v35, %v5190_v35  ;;  %v5198_v37 = vpop.f32.mrb[35].mxu1 }
 0x3ab   :  { %v2392_v19 = vadd.f32 %v5198_v37, %v5188_v33  ;;  %v2417_v22 = vmul.f32 %v5198_v37, %v5198_v37 }
 0x3ac   :  { %v2425_v47 = vadd.f32 %v2416_v0, %v2413_v10 }
 0x3ad   :  { %v2434_v28 = vadd.f32 %v2417_v22, %v2414_v57 }
 0x3af   :  { %v5206_v1 = vpop.f32.mrb[36].mxu1 }
 0x3b0   :  { %v2384_v30 = vadd.f32 %v2383_v13, %v5206_v1  ;;  %v2419_v2 = vmul.f32 %v5206_v1, %v5206_v1  ;;  %v5211_v3 = vpop.f32.mrb[37].mxu1 }
 0x3b1   :  { %v2393_v6 = vadd.f32 %v2392_v19, %v5211_v3  ;;  %v2420_v58 = vmul.f32 %v5211_v3, %v5211_v3  ;;  %v5216_v11 = vpop.f32.mrb[38].mxu1 }
 0x3b2   :  { %v2426_v24 = vadd.f32 %v2425_v47, %v2419_v2  ;;  %v2385_v12 = vadd.f32 %v2384_v30, %v5216_v11  ;;  %v2422_v14 = vmul.f32 %v5216_v11, %v5216_v11  ;;  %v5221_v15 = vpop.f32.mrb[39].mxu1 }
 0x3b3   :  { %v2435_v16 = vadd.f32 %v2434_v28, %v2420_v58  ;;  %v2394_v17 = vadd.f32 %v2393_v6, %v5221_v15  ;;  %v2423_v18 = vmul.f32 %v5221_v15, %v5221_v15 }
 0x3b4   :  { %v2386_v20 = vrot.slane %v2385_v12, 4  ;;  %v2427_v21 = vadd.f32 %v2426_v24, %v2422_v14 }
 0x3b5   :  { %v2395_v26 = vrot.slane %v2394_v17, 4  ;;  %v2436_v7 = vadd.f32 %v2435_v16, %v2423_v18 }
 0x3b6   :  { %v2387_v8 = vadd.f32 %v2386_v20, %v2385_v12  ;;  %v2428_v51 = vrot.slane %v2427_v21, 4 }
 0x3b7   :  { %v2396_v4 = vadd.f32 %v2395_v26, %v2394_v17  ;;  %v2437_v29 = vrot.slane %v2436_v7, 4 }
 0x3b8   :  { %v2388_v38 = vrot.slane %v2387_v8, 2  ;;  %v2429_v42 = vadd.f32 %v2428_v51, %v2427_v21 }
 0x3b9   :  { %v2397_v43 = vrot.slane %v2396_v4, 2  ;;  %v2438_v44 = vadd.f32 %v2437_v29, %v2436_v7 }
 0x3ba   :  { %v2389_v46 = vadd.f32 %v2388_v38, %v2387_v8  ;;  %v2430_v48 = vrot.slane %v2429_v42, 2 }
 0x3bb   :  { %v2398_v50 = vadd.f32 %v2397_v43, %v2396_v4  ;;  %v2439_v52 = vrot.slane %v2438_v44, 2 }
 0x3bc   :  { %v2390_v54 = vrot.slane %v2389_v46, 1  ;;  %v2431_v55 = vadd.f32 %v2430_v48, %v2429_v42 }
 0x3bd   :  { %v2399_v56 = vrot.slane %v2398_v50, 1  ;;  %v2440_v45 = vadd.f32 %v2439_v52, %v2438_v44 }
 0x3be   :  { %v2391_v27 = vadd.f32 %v2390_v54, %v2389_v46  ;;  %v2432_v59 = vrot.slane %v2431_v55, 1 }
 0x3bf   :  { %v2400_v60 = vadd.f32 %v2399_v56, %v2398_v50  ;;  %v2441_v61 = vrot.slane %v2440_v45, 1 }
 0x3c0   :  { %v5226_v49 = vmul.f32 0.03125, %v2391_v27  ;;  %v2433_v62 = vadd.f32 %v2432_v59, %v2431_v55 }
 0x3c1   :  { %v5228_v32 = vmul.f32 0.03125, %v2400_v60  ;;  %v2442_v10 = vadd.f32 %v2441_v61, %v2440_v45 }
 0x3c2   :  { %v2452_v13 = vmul.f32 0.03125, %v2433_v62  ;;  %v2455_v0 = vmul.f32 %v5226_v49, %v5226_v49 }
 0x3c3   :  { %v2453_v57 = vmul.f32 0.03125, %v2442_v10  ;;  %v2456_v19 = vmul.f32 %v5228_v32, %v5228_v32 }
 0x3c4   :  { %v2458_v22 = vsub.f32 %v2452_v13, %v2455_v0 }
 0x3c5   :  { %v2459_v47 = vsub.f32 %v2453_v57, %v2456_v19 }
 0x3c6   :  { %v2461_v28 = vmax.f32 %v2458_v22, 0.0 }
 0x3c7   :  { %v2462_v30 = vmax.f32 %v2459_v47, 0.0  ;;  %v4143_v2 = vpop.f32.mrb[40].mxu1 }
 0x3c8   :  { %v2468_v6 = vadd.f32 1e-05, %v2461_v28  ;;  %v4144_v58 = vpop.f32.mrb[41].mxu1 }
 0x3c9   :  { %v2469_v24 = vadd.f32 1e-05, %v2462_v30  ;;  %v4145_v12 = vadd.f32 %v4144_v58, %v4143_v2  ;;  %v4146_v14 = vpop.f32.mrb[42].mxu1 }
 0x3ca   :  { %4694 = vrsqrt.f32 %v2468_v6  ;;  %v4147_v16 = vpop.f32.mrb[43].mxu1 }
 0x3cb   :  { %4696 = vrsqrt.f32 %v2469_v24  ;;  %v4148_v17 = vadd.f32 %v4147_v16, %v4146_v14  ;;  %v2369_v18 = vadd.f32 %v4145_v12, %v5169_v63 }
 0x3cd   :  { %v2372_v20 = vadd.f32 %v4148_v17, %v5173_v9  ;;  %v2415_v21 = vmul.f32 %v2369_v18, %v2369_v18 }
 0x3cf   :  { %v2401_v26 = vadd.f32 %v2372_v20, %v2369_v18  ;;  %v2418_v7 = vmul.f32 %v2372_v20, %v2372_v20  ;;  %v4149_v8 = vpop.f32.mrb[44].mxu1 }
 0x3d0   :  { %v4150_v51 = vpop.f32.mrb[45].mxu1 }
 0x3d1   :  { %v2443_v4 = vadd.f32 %v2418_v7, %v2415_v21  ;;  %v4151_v29 = vadd.f32 %v4150_v51, %v4149_v8  ;;  %v4152_v38 = vpop.f32.mrb[46].mxu1 }
 0x3d2   :  { %v4153_v42 = vpop.f32.mrb[47].mxu1 }
 0x3d3   :  { %v2377_v43 = vadd.f32 %v5167_v36, %v4151_v29  ;;  %v4154_v44 = vadd.f32 %v4153_v42, %v4152_v38 }
 0x3d4   :  { %v4695_v46 = vpop.eup %4694 }
 0x3d5   :  { %v4697_v48 = vpop.eup %4696  ;;  %v2402_v50 = vadd.f32 %v2401_v26, %v2377_v43  ;;  %v2421_v52 = vmul.f32 %v2377_v43, %v2377_v43  ;;  %v2380_v63 = vadd.f32 %v5171_v5, %v4154_v44 }
 0x3d6   :  { %v2477_v54 = vcombine.low %v4695_v46, %v4697_v48 }
 0x3d7   :  { %v2444_v9 = vadd.f32 %v2443_v4, %v2421_v52  ;;  %v2403_v55 = vadd.f32 %v2402_v50, %v2380_v63  ;;  %v2424_v56 = vmul.f32 %v2380_v63, %v2380_v63 }
 0x3d8   :  { %v2484_v24 = vrot.slane %v2477_v54, %v5099_v25 }
 0x3d9   :  { %v2404_v45 = vrot.slane %v2403_v55, 4  ;;  %v2445_v27 = vadd.f32 %v2444_v9, %v2424_v56 }
 0x3db   :  { %v2405_v59 = vadd.f32 %v2404_v45, %v2403_v55  ;;  %v2446_v60 = vrot.slane %v2445_v27, 4 }
 0x3dd   :  { %v2406_v61 = vrot.slane %v2405_v59, 2  ;;  %v2447_v62 = vadd.f32 %v2446_v60, %v2445_v27 }
 0x3df   :  { %v2407_v10 = vadd.f32 %v2406_v61, %v2405_v59  ;;  %v2448_v13 = vrot.slane %v2447_v62, 2 }
 0x3e1   :  { %v2408_v36 = vrot.slane %v2407_v10, 1  ;;  %v2449_v0 = vadd.f32 %v2448_v13, %v2447_v62 }
 0x3e3   :  { %v2409_v57 = vadd.f32 %v2408_v36, %v2407_v10  ;;  %v2450_v19 = vrot.slane %v2449_v0, 1 }
 0x3e5   :  { %v2412_v22 = vmul.f32 0.03125, %v2409_v57  ;;  %v2451_v47 = vadd.f32 %v2450_v19, %v2449_v0 }
 0x3e7   :  { %v2454_v28 = vmul.f32 0.03125, %v2451_v47  ;;  %v2457_v5 = vmul.f32 %v2412_v22, %v2412_v22 }
 0x3e9   :  { %v2460_v30 = vsub.f32 %v2454_v28, %v2457_v5 }
 0x3eb   :  { %v2463_v2 = vmax.f32 %v2460_v30, 0.0 }
 0x3ed   :  { %v2470_v6 = vadd.f32 1e-05, %v2463_v2 }
 0x3ef   :  { %4698 = vrsqrt.f32 %v2470_v6 }
 0x3f9   :  { %v4699_v58 = vpop.eup %4698 }
 0x3fa   :  { %v2491_v12 = vrot.slane %v4699_v58, %v5099_v25 }
 0x3fc   :  { %v2492_v14 = vcombine.low %v2484_v24, %v2491_v12 }
 0x3fe   :  { %v2499_v16 = vrot.slane %v2492_v14, %v5099_v25 }
 0x400   :  { %v2501_v17 = vmul.f32 %v2499_v16, %v5175_v53 }
 0x402   :  { %v2506_v21 = vrot.slane %v2501_v17, %v5104_v39  ;;  %v2510_v26 = vrot.slane %v2501_v17, %v5106_v40  ;;  %v2514_v7 = vrot.slane %v2501_v17, %v5108_v41 }
 0x404   :  { %v2518_v8 = vmul.f32 %v2506_v21, %v5226_v49  ;;  %v2519_v51 = vmul.f32 %v2510_v26, %v5228_v32  ;;  %v2520_v4 = vmul.f32 %v2514_v7, %v2412_v22  ;;  %v2549_v29 = vmul.f32 %v2506_v21, %v5186_v31 }
 0x405   :  { %v2550_v38 = vmul.f32 %v2510_v26, %v5188_v33  ;;  %v2551_v42 = vmul.f32 %v2514_v7, %v2369_v18  ;;  %v2552_v44 = vmul.f32 %v2506_v21, %v5190_v35  ;;  %v2553_v53 = vmul.f32 %v2510_v26, %v5198_v37 }
 0x406   :  { %v2524_v46 = vcombine.low %v2518_v8, %v2519_v51  ;;  %v2554_v48 = vmul.f32 %v2514_v7, %v2372_v20  ;;  %v2555_v50 = vmul.f32 %v2506_v21, %v5206_v1  ;;  %v2556_v52 = vmul.f32 %v2510_v26, %v5211_v3 }
 0x407   :  { %v2557_v54 = vmul.f32 %v2514_v7, %v2377_v43  ;;  %v2558_v49 = vmul.f32 %v2506_v21, %v5216_v11  ;;  %v2559_v32 = vmul.f32 %v2510_v26, %v5221_v15  ;;  %v2538_v33 = vrot.slane %v2520_v4, %v5099_v25 }
 0x408   :  { %v2531_v31 = vrot.slane %v2524_v46, %v5099_v25  ;;  %v2560_v18 = vmul.f32 %v2514_v7, %v2380_v63 }
 0x40a   :  { %v2539_v9 = vcombine.low %v2531_v31, %v2538_v33 }
 0x40c   :  { %v2546_v35 = vrot.slane %v2539_v9, %v5099_v25 }
 0x40e   :  { %v2548_v37 = vsub.f32 %v5177_v34, %v2546_v35 }
 0x410   :  { %v2565_v20 = vrot.slane %v2548_v37, %v5104_v39  ;;  %v2569_v1 = vrot.slane %v2548_v37, %v5106_v40  ;;  %v2573_v3 = vrot.slane %v2548_v37, %v5108_v41 }
 0x412   :  { %v2577_v43 = vadd.f32 %v2565_v20, %v2549_v29  ;;  %v2578_v11 = vadd.f32 %v2569_v1, %v2550_v38  ;;  %v2579_v55 = vadd.f32 %v2573_v3, %v2551_v42  ;;  %v2580_v15 = vadd.f32 %v2565_v20, %v2552_v44 }
 0x413   :  { %v2581_v56 = vadd.f32 %v2569_v1, %v2553_v53  ;;  %v2582_v45 = vadd.f32 %v2573_v3, %v2554_v48  ;;  %v2583_v27 = vadd.f32 %v2565_v20, %v2555_v50  ;;  %v2584_v59 = vadd.f32 %v2569_v1, %v2556_v52 }
 0x414   :  { %v2585_v63 = vadd.f32 %v2573_v3, %v2557_v54  ;;  %v2586_v60 = vadd.f32 %v2565_v20, %v2558_v49  ;;  %v2587_v61 = vadd.f32 %v2569_v1, %v2559_v32  ;;  %v2588_v62 = vadd.f32 %v2573_v3, %v2560_v18 }
 0x415   :  { %v2589_v10 = vmax.f32 %v2577_v43, 0.0  ;;  %v2590_v34 = vmax.f32 %v2578_v11, 0.0  ;;  %v2591_v13 = vmax.f32 %v2579_v55, 0.0  ;;  %v2592_v36 = vmax.f32 %v2580_v15, 0.0 }
 0x416   :  { %v2593_v0 = vmax.f32 %v2581_v56, 0.0  ;;  %v2594_v57 = vmax.f32 %v2582_v45, 0.0  ;;  %v2595_v19 = vmax.f32 %v2583_v27, 0.0  ;;  %v2596_v22 = vmax.f32 %v2584_v59, 0.0 }
 0x417   :  { %v2597_v47 = vmax.f32 %v2585_v63, 0.0  ;;  %v2598_v28 = vmax.f32 %v2586_v60, 0.0  ;;  %v2599_v5 = vmax.f32 %v2587_v61, 0.0  ;;  %v2600_v30 = vmax.f32 %v2588_v62, 0.0 }
 0x418   :  { %v5262_v2 = vpack.c.bf16 %v2592_v36, %v2589_v10  ;;  %v2602_v6 = vpack.c.bf16 %v2593_v0, %v2590_v34  ;;  %v5264_v58 = vpack.c.bf16 %v2594_v57, %v2591_v13 }
 0x419   :  { %v5266_v24 = vpack.c.bf16 %v2598_v28, %v2595_v19  ;;  %v5268_v12 = vpack.c.bf16 %v2599_v5, %v2596_v22  ;;  %v5270_v14 = vpack.c.bf16 %v2600_v30, %v2597_v47 }
 0x41a   :  { %4828 = dma.done.wait [#allocation4 + $0x1], 9216 }
 0x41b   :  { %4829 = vsyncadd [#allocation4 + $0x1], 4294958080  ;;  %2854 = vmatprep.mubr.bf16.mxu0 %v2602_v6  ;;  %2748 = vmatprep.mubr.bf16.mxu1 %v2602_v6  ;;  %v2645_v16 = vld [vmem:[#allocation2 + $0x248] sm:$0xff]  ;;  %v2670_v17 = vld [vmem:[#allocation2 + $0x310] sm:$0xff] }
 0x41c   :  { %v2644_v21 = vld [vmem:[#allocation2 + $0x240] sm:$0xff]  ;;  %2716 = vmatprep.subr.bf16.mxu1 %v2645_v16  ;;  %4165 = vmatprep.subr.bf16.mxu0 %v2670_v17  ;;  %v2646_v26 = vld [vmem:[#allocation2 + $0x250] sm:$0xff]  ;;  %v2673_v8 = vld [vmem:[#allocation2 + $0x328] sm:$0xff] }
 0x41d   :  { %v2648_v7 = vld [vmem:[#allocation2 + $0x260] sm:$0xff]  ;;  %2717 = vmatpush1.bf16.msra.mxu1 %v2644_v21  ;;  %4166 = vmatpush3.bf16.msra.mxu0 %v2646_v26  ;;  %v2647_v51 = vld [vmem:[#allocation2 + $0x258] sm:$0xff]  ;;  %v2649_v4 = vld [vmem:[#allocation2 + $0x268] sm:$0xff] }
 0x41e   :  { %2718 = vmatprep.subr.bf16.mxu1 %v2648_v7  ;;  %4167 = vmatprep.subr.bf16.mxu0 %v2673_v8  ;;  %v2651_v29 = vld [vmem:[#allocation2 + $0x278] sm:$0xff]  ;;  %v2676_v38 = vld [vmem:[#allocation2 + $0x340] sm:$0xff]  ;;  %v2650_v42 = vld [vmem:[#allocation2 + $0x270] sm:$0xff] }
 0x41f   :  { %v2652_v44 = vld [vmem:[#allocation2 + $0x280] sm:$0xff]  ;;  %v2654_v53 = vld [vmem:[#allocation2 + $0x290] sm:$0xff]  ;;  %v2679_v46 = vld [vmem:[#allocation2 + $0x358] sm:$0xff] }
 0x420   :  { %v2653_v48 = vld [vmem:[#allocation2 + $0x288] sm:$0xff]  ;;  %v2655_v50 = vld [vmem:[#allocation2 + $0x298] sm:$0xff]  ;;  %v2682_v54 = vld [vmem:[#allocation2 + $0x370] sm:$0xff] }
 0x421   :  { %2719 = vmatpush1.bf16.msra.mxu1 %v2647_v51  ;;  %4168 = vmatpush3.bf16.msra.mxu0 %v2649_v4  ;;  %v2657_v52 = vld [vmem:[#allocation2 + $0x2a8] sm:$0xff]  ;;  %v2656_v49 = vld [vmem:[#allocation2 + $0x2a0] sm:$0xff]  ;;  %v2658_v32 = vld [vmem:[#allocation2 + $0x2b0] sm:$0xff] }
 0x422   :  { %2720 = vmatprep.subr.bf16.mxu1 %v2651_v29  ;;  %4169 = vmatprep.subr.bf16.mxu0 %v2676_v38  ;;  %v2660_v31 = vld [vmem:[#allocation2 + $0x2c0] sm:$0xff]  ;;  %v2685_v33 = vld [vmem:[#allocation2 + $0x388] sm:$0xff]  ;;  %v2659_v18 = vld [vmem:[#allocation2 + $0x2b8] sm:$0xff] }
 0x423   :  { %v2661_v9 = vld [vmem:[#allocation2 + $0x2c8] sm:$0xff]  ;;  %v2663_v35 = vld [vmem:[#allocation2 + $0x2d8] sm:$0xff]  ;;  %v2688_v37 = vld [vmem:[#allocation2 + $0x3a0] sm:$0xff] }
 0x424   :  { %v2662_v20 = vld [vmem:[#allocation2 + $0x2d0] sm:$0xff]  ;;  %v2664_v1 = vld [vmem:[#allocation2 + $0x2e0] sm:$0xff]  ;;  %v2691_v43 = vld [vmem:[#allocation2 + $0x3b8] sm:$0xff] }
 0x425   :  { %2721 = vmatpush1.bf16.msra.mxu1 %v2650_v42  ;;  %4170 = vmatpush3.bf16.msra.mxu0 %v2652_v44  ;;  %v2666_v3 = vld [vmem:[#allocation2 + $0x2f0] sm:$0xff]  ;;  %v2665_v11 = vld [vmem:[#allocation2 + $0x2e8] sm:$0xff]  ;;  %v2667_v55 = vld [vmem:[#allocation2 + $0x2f8] sm:$0xff] }
 0x426   :  { %2722 = vmatprep.subr.bf16.mxu1 %v2654_v53  ;;  %4171 = vmatprep.subr.bf16.mxu0 %v2679_v46  ;;  %v2669_v15 = vld [vmem:[#allocation2 + $0x308] sm:$0xff]  ;;  %v2694_v56 = vld [vmem:[#allocation2 + $0x3d0] sm:$0xff]  ;;  %v2668_v45 = vld [vmem:[#allocation2 + $0x300] sm:$0xff] }
 0x427   :  { %v2672_v27 = vld [vmem:[#allocation2 + $0x320] sm:$0xff]  ;;  %v2697_v59 = vld [vmem:[#allocation2 + $0x3e8] sm:$0xff]  ;;  %v2671_v63 = vld [vmem:[#allocation2 + $0x318] sm:$0xff] }
 0x428   :  { %v2675_v60 = vld [vmem:[#allocation2 + $0x338] sm:$0xff]  ;;  %v2700_v61 = vld [vmem:[#allocation2 + $0x400] sm:$0xff]  ;;  %v2674_v62 = vld [vmem:[#allocation2 + $0x330] sm:$0xff] }
 0x429   :  { %2723 = vmatpush1.bf16.msra.mxu1 %v2653_v48  ;;  %4172 = vmatpush3.bf16.msra.mxu0 %v2655_v50  ;;  %v2678_v10 = vld [vmem:[#allocation2 + $0x350] sm:$0xff]  ;;  %v2703_v34 = vld [vmem:[#allocation2 + $0x418] sm:$0xff]  ;;  %v2677_v13 = vld [vmem:[#allocation2 + $0x348] sm:$0xff] }
 0x42a   :  { %2724 = vmatprep.subr.bf16.mxu1 %v2657_v52  ;;  %4173 = vmatprep.subr.bf16.mxu0 %v2682_v54  ;;  %v2681_v36 = vld [vmem:[#allocation2 + $0x368] sm:$0xff]  ;;  %v2706_v0 = vld [vmem:[#allocation2 + $0x430] sm:$0xff]  ;;  %v2680_v57 = vld [vmem:[#allocation2 + $0x360] sm:$0xff] }
 0x42b   :  { %v2684_v19 = vld [vmem:[#allocation2 + $0x380] sm:$0xff]  ;;  %v2709_v22 = vld [vmem:[#allocation2 + $0x448] sm:$0xff]  ;;  %v2683_v47 = vld [vmem:[#allocation2 + $0x378] sm:$0xff] }
 0x42c   :  { %v2687_v28 = vld [vmem:[#allocation2 + $0x398] sm:$0xff]  ;;  %v2712_v5 = vld [vmem:[#allocation2 + $0x460] sm:$0xff]  ;;  %v2686_v30 = vld [vmem:[#allocation2 + $0x390] sm:$0xff] }
 0x42d   :  { %2725 = vmatpush1.bf16.msra.mxu1 %v2656_v49  ;;  %4174 = vmatpush3.bf16.msra.mxu0 %v2658_v32  ;;  %v2690_v6 = vld [vmem:[#allocation2 + $0x3b0] sm:$0xff]  ;;  %v2715_v16 = vld [vmem:[#allocation2 + $0x478] sm:$0xff]  ;;  %v2689_v17 = vld [vmem:[#allocation2 + $0x3a8] sm:$0xff] }
 0x42e   :  { %2726 = vmatprep.subr.bf16.mxu1 %v2660_v31  ;;  %4175 = vmatprep.subr.bf16.mxu0 %v2685_v33  ;;  %v2693_v21 = vld [vmem:[#allocation2 + $0x3c8] sm:$0xff]  ;;  %v2692_v26 = vld [vmem:[#allocation2 + $0x3c0] sm:$0xff]  ;;  %v2695_v8 = vld [vmem:[#allocation2 + $0x3d8] sm:$0xff] }
 0x42f   :  { %v2696_v7 = vld [vmem:[#allocation2 + $0x3e0] sm:$0xff]  ;;  %v2699_v51 = vld [vmem:[#allocation2 + $0x3f8] sm:$0xff]  ;;  %v2698_v4 = vld [vmem:[#allocation2 + $0x3f0] sm:$0xff] }
 0x430   :  { %v2702_v29 = vld [vmem:[#allocation2 + $0x410] sm:$0xff]  ;;  %v2701_v38 = vld [vmem:[#allocation2 + $0x408] sm:$0xff]  ;;  %v2708_v44 = vld [vmem:[#allocation2 + $0x440] sm:$0xff] }
 0x431   :  { %2727 = vmatpush1.bf16.msra.mxu1 %v2659_v18  ;;  %4176 = vmatpush3.bf16.msra.mxu0 %v2661_v9  ;;  %v2705_v42 = vld [vmem:[#allocation2 + $0x428] sm:$0xff]  ;;  %v2711_v53 = vld [vmem:[#allocation2 + $0x458] sm:$0xff]  ;;  %v2710_v46 = vld [vmem:[#allocation2 + $0x450] sm:$0xff] }
 0x432   :  { %2728 = vmatprep.subr.bf16.mxu1 %v2663_v35  ;;  %4177 = vmatprep.subr.bf16.mxu0 %v2688_v37  ;;  %v2714_v48 = vld [vmem:[#allocation2 + $0x470] sm:$0xff] }
 0x435   :  { %2729 = vmatpush1.bf16.msra.mxu1 %v2662_v20  ;;  %4178 = vmatpush3.bf16.msra.mxu0 %v2664_v1 }
 0x436   :  { %2730 = vmatprep.subr.bf16.mxu1 %v2666_v3  ;;  %4179 = vmatprep.subr.bf16.mxu0 %v2691_v43 }
 0x439   :  { %2731 = vmatpush1.bf16.msra.mxu1 %v2665_v11  ;;  %4180 = vmatpush3.bf16.msra.mxu0 %v2667_v55 }
 0x43a   :  { %2732 = vmatprep.subr.bf16.mxu1 %v2669_v15  ;;  %4299 = vmatprep.subr.bf16.mxu0 %v2694_v56 }
 0x43c   :  { %2855 = vmatmul.mubr.bf16.vlgmr.msra.gmra.mrb[12].mxu0 %v5262_v2 }
 0x43d   :  { %2733 = vmatpush1.bf16.msra.mxu1 %v2668_v45  ;;  %4300 = vmatpush3.bf16.msra.mxu0 %v2694_v56 }
 0x43e   :  { %2734 = vmatprep.subr.bf16.mxu1 %v2672_v27  ;;  %4301 = vmatprep.subr.bf16.mxu0 %v2697_v59 }
 0x43f   :  { %2862 = vmatprep.mubr.bf16.mxu0 %v5268_v12 }
 0x441   :  { %2735 = vmatpush1.bf16.msra.mxu1 %v2671_v63  ;;  %4302 = vmatpush3.bf16.msra.mxu0 %v2697_v59 }
 0x442   :  { %2736 = vmatprep.subr.bf16.mxu1 %v2675_v60  ;;  %4303 = vmatprep.subr.bf16.mxu0 %v2700_v61 }
 0x444   :  { %2863 = vmatmul.mubr.bf16.gmra.mrb[16].mxu0 %v5266_v24 }
 0x445   :  { %2737 = vmatpush1.bf16.msra.mxu1 %v2674_v62  ;;  %4304 = vmatpush3.bf16.msra.mxu0 %v2700_v61 }
 0x446   :  { %2738 = vmatprep.subr.bf16.mxu1 %v2678_v10  ;;  %4305 = vmatprep.subr.bf16.mxu0 %v2703_v34 }
 0x447   :  { %4315 = vmatprep.mubr.bf16.mxu0 %v5264_v58 }
 0x449   :  { %2739 = vmatpush1.bf16.msra.mxu1 %v2677_v13  ;;  %4306 = vmatpush3.bf16.msra.mxu0 %v2703_v34 }
 0x44a   :  { %2740 = vmatprep.subr.bf16.mxu1 %v2681_v36  ;;  %4307 = vmatprep.subr.bf16.mxu0 %v2706_v0 }
 0x44d   :  { %2741 = vmatpush1.bf16.msra.mxu1 %v2680_v57  ;;  %4308 = vmatpush3.bf16.msra.mxu0 %v2706_v0 }
 0x44e   :  { %2742 = vmatprep.subr.bf16.mxu1 %v2684_v19  ;;  %4309 = vmatprep.subr.bf16.mxu0 %v2709_v22 }
 0x451   :  { %2743 = vmatpush1.bf16.msra.mxu1 %v2683_v47  ;;  %4310 = vmatpush3.bf16.msra.mxu0 %v2709_v22 }
 0x452   :  { %2744 = vmatprep.subr.bf16.mxu1 %v2687_v28  ;;  %4311 = vmatprep.subr.bf16.mxu0 %v2712_v5 }
 0x455   :  { %2745 = vmatpush1.bf16.msra.mxu1 %v2686_v30  ;;  %4312 = vmatpush3.bf16.msra.mxu0 %v2712_v5 }
 0x456   :  { %2746 = vmatprep.subr.bf16.mxu1 %v2690_v6  ;;  %4313 = vmatprep.subr.bf16.mxu0 %v2715_v16 }
 0x459   :  { %2747 = vmatpush1.bf16.msra.mxu1 %v2689_v17  ;;  %4314 = vmatpush3.bf16.msra.mxu0 %v2715_v16 }
 0x45a   :  { %2769 = vmatprep.subr.bf16.mxu1 %v2693_v21 }
 0x45c   :  { %4316 = vmatmul.mubr.bf16.vlgmr.msra.gmra.mrb[20].mxu0 %v5270_v14  ;;  %2749 = vmatmul.mubr.bf16.vlgmr.msra.gmra.mrb[48].mxu1 %v5262_v2  ;;  %v2704_v2 = vld [vmem:[#allocation2 + $0x420] sm:$0xff] }
 0x45d   :  { %2770 = vmatpush1.bf16.msra.mxu1 %v2692_v26  ;;  %2758 = vmatprep.mubr.bf16.mxu1 %v5268_v12  ;;  %v2707_v12 = vld [vmem:[#allocation2 + $0x438] sm:$0xff] }
 0x45e   :  { %2771 = vmatprep.subr.bf16.mxu1 %v2696_v7 }
 0x461   :  { %2772 = vmatpush1.bf16.msra.mxu1 %v2695_v8 }
 0x462   :  { %2773 = vmatprep.subr.bf16.mxu1 %v2699_v51 }
 0x464   :  { %2759 = vmatmul.mubr.bf16.gmra.mrb[52].mxu1 %v5266_v24  ;;  %v2713_v24 = vld [vmem:[#allocation2 + $0x468] sm:$0xff] }
 0x465   :  { %2774 = vmatpush1.bf16.msra.mxu1 %v2698_v4  ;;  %2801 = vmatprep.mubr.bf16.mxu1 %v4857_v23 }
 0x466   :  { %2775 = vmatprep.subr.bf16.mxu1 %v2702_v29 }
 0x469   :  { %2776 = vmatpush1.bf16.msra.mxu1 %v2701_v38 }
 0x46a   :  { %2777 = vmatprep.subr.bf16.mxu1 %v2705_v42 }
 0x46d   :  { %2778 = vmatpush1.bf16.msra.mxu1 %v2704_v2 }
 0x46e   :  { %2779 = vmatprep.subr.bf16.mxu1 %v2708_v44 }
 0x471   :  { %2780 = vmatpush1.bf16.msra.mxu1 %v2707_v12 }
 0x472   :  { %2781 = vmatprep.subr.bf16.mxu1 %v2711_v53 }
 0x475   :  { %2782 = vmatpush1.bf16.msra.mxu1 %v2710_v46 }
 0x476   :  { %2783 = vmatprep.subr.bf16.mxu1 %v2714_v48 }
 0x479   :  { %2784 = vmatpush1.bf16.msra.mxu1 %v2713_v24 }
 0x47c   :  { %2802 = vmatmul.mubr.bf16.vlgmr.msra.gmra.mrb[48].mxu1 %v5264_v58 }
 0x47d   :  { %2811 = vmatprep.mubr.bf16.mxu1 %v4857_v23 }
 0x484   :  { %2812 = vmatmul.mubr.bf16.gmra.mrb[52].mxu1 %v5270_v14 }
 0x50f   :  { %v4181_v50 = vpop.f32.mrb[12].mxu0 }
 0x510   :  { %v4182_v52 = vpop.f32.mrb[13].mxu0 }
 0x511   :  { %v4183_v54 = vadd.f32 %v4182_v52, %v4181_v50  ;;  %v4184_v49 = vpop.f32.mrb[14].mxu0 }
 0x512   :  { %v4185_v32 = vpop.f32.mrb[15].mxu0 }
 0x513   :  { %v4186_v31 = vadd.f32 %v4185_v32, %v4184_v49 }
 0x517   :  { %v4187_v33 = vpop.f32.mrb[16].mxu0 }
 0x518   :  { %v4188_v18 = vpop.f32.mrb[17].mxu0 }
 0x519   :  { %v4189_v9 = vadd.f32 %v4188_v18, %v4187_v33  ;;  %v4190_v35 = vpop.f32.mrb[18].mxu0 }
 0x51a   :  { %v4191_v37 = vpop.f32.mrb[19].mxu0 }
 0x51b   :  { %v4192_v20 = vadd.f32 %v4191_v37, %v4190_v35 }
 0x52f   :  { %v4317_v1 = vpop.f32.mrb[20].mxu0 }
 0x530   :  { %v5284_v3 = vadd.f32 %v4317_v1, %v4189_v9  ;;  %v2905_v58 = vpop.f32.mrb[21].mxu0 }
 0x531   :  { %v5286_v43 = vadd.f32 %v4183_v54, %v2905_v58  ;;  %v4318_v11 = vpop.f32.mrb[22].mxu0 }
 0x532   :  { %v5288_v14 = vadd.f32 %v4318_v11, %v4192_v20  ;;  %v2908_v55 = vpop.f32.mrb[23].mxu0  ;;  %v2958_v45 = vmul.f32 %v5284_v3, %v5284_v3 }
 0x533   :  { %v2952_v15 = vmul.f32 %v5286_v43, %v5286_v43  ;;  %v5292_v56 = vadd.f32 %v4186_v31, %v2908_v55 }
 0x534   :  { %v2961_v63 = vmul.f32 %v5288_v14, %v5288_v14 }
 0x535   :  { %v2938_v27 = vadd.f32 %v5292_v56, %v5286_v43  ;;  %v2955_v59 = vmul.f32 %v5292_v56, %v5292_v56 }
 0x537   :  { %v2939_v60 = vadd.f32 %v2938_v27, %v5284_v3  ;;  %v2980_v61 = vadd.f32 %v2955_v59, %v2952_v15 }
 0x539   :  { %v2940_v62 = vadd.f32 %v2939_v60, %v5288_v14  ;;  %v2981_v10 = vadd.f32 %v2980_v61, %v2958_v45 }
 0x53b   :  { %v2941_v34 = vrot.slane %v2940_v62, 4  ;;  %v2982_v13 = vadd.f32 %v2981_v10, %v2961_v63 }
 0x53d   :  { %v2942_v36 = vadd.f32 %v2941_v34, %v2940_v62  ;;  %v2983_v0 = vrot.slane %v2982_v13, 4 }
 0x53f   :  { %v2943_v57 = vrot.slane %v2942_v36, 2  ;;  %v2984_v19 = vadd.f32 %v2983_v0, %v2982_v13 }
 0x541   :  { %v2944_v22 = vadd.f32 %v2943_v57, %v2942_v36  ;;  %v2985_v47 = vrot.slane %v2984_v19, 2 }
 0x543   :  { %v2945_v28 = vrot.slane %v2944_v22, 1  ;;  %v2986_v5 = vadd.f32 %v2985_v47, %v2984_v19 }
 0x545   :  { %v2946_v30 = vadd.f32 %v2945_v28, %v2944_v22  ;;  %v2987_v6 = vrot.slane %v2986_v5, 1 }
 0x547   :  { %v5304_v16 = vmul.f32 0.03125, %v2946_v30  ;;  %v2988_v17 = vadd.f32 %v2987_v6, %v2986_v5 }
 0x549   :  { %v2991_v21 = vmul.f32 0.03125, %v2988_v17  ;;  %v2994_v26 = vmul.f32 %v5304_v16, %v5304_v16 }
 0x54b   :  { %v2997_v7 = vsub.f32 %v2991_v21, %v2994_v26 }
 0x54d   :  { %v3000_v26 = vmax.f32 %v2997_v7, 0.0 }
 0x54f   :  { %v5308_v8 = vpop.f32.mrb[48].mxu1 }
 0x550   :  { %v5310_v51 = vpop.f32.mrb[49].mxu1  ;;  %v2950_v29 = vmul.f32 %v5308_v8, %v5308_v8 }
 0x551   :  { %v5312_v4 = vpop.f32.mrb[50].mxu1  ;;  %v2951_v44 = vmul.f32 %v5310_v51, %v5310_v51 }
 0x552   :  { %v2920_v38 = vadd.f32 %v5312_v4, %v5308_v8  ;;  %v2953_v42 = vmul.f32 %v5312_v4, %v5312_v4  ;;  %v5320_v2 = vpop.f32.mrb[51].mxu1 }
 0x553   :  { %v2929_v12 = vadd.f32 %v5320_v2, %v5310_v51  ;;  %v2954_v53 = vmul.f32 %v5320_v2, %v5320_v2 }
 0x554   :  { %v2962_v46 = vadd.f32 %v2953_v42, %v2950_v29 }
 0x555   :  { %v2971_v48 = vadd.f32 %v2954_v53, %v2951_v44 }
 0x557   :  { %v5328_v24 = vpop.f32.mrb[52].mxu1 }
 0x558   :  { %v2921_v50 = vadd.f32 %v2920_v38, %v5328_v24  ;;  %v2956_v52 = vmul.f32 %v5328_v24, %v5328_v24  ;;  %v5333_v54 = vpop.f32.mrb[53].mxu1 }
 0x559   :  { %v2930_v49 = vadd.f32 %v2929_v12, %v5333_v54  ;;  %v2957_v32 = vmul.f32 %v5333_v54, %v5333_v54  ;;  %v5338_v31 = vpop.f32.mrb[54].mxu1 }
 0x55a   :  { %v2963_v33 = vadd.f32 %v2962_v46, %v2956_v52  ;;  %v2922_v18 = vadd.f32 %v2921_v50, %v5338_v31  ;;  %v2959_v9 = vmul.f32 %v5338_v31, %v5338_v31  ;;  %v5343_v35 = vpop.f32.mrb[55].mxu1 }
 0x55b   :  { %v2972_v37 = vadd.f32 %v2971_v48, %v2957_v32  ;;  %v2931_v20 = vadd.f32 %v2930_v49, %v5343_v35  ;;  %v2960_v1 = vmul.f32 %v5343_v35, %v5343_v35  ;;  %v3007_v48 = vadd.f32 1e-05, %v3000_v26 }
 0x55c   :  { %v2923_v58 = vrot.slane %v2922_v18, 4  ;;  %v2964_v11 = vadd.f32 %v2963_v33, %v2959_v9 }
 0x55d   :  { %v2932_v55 = vrot.slane %v2931_v20, 4  ;;  %v2973_v15 = vadd.f32 %v2972_v37, %v2960_v1  ;;  %4700 = vrsqrt.f32 %v3007_v48 }
 0x55e   :  { %v2924_v45 = vadd.f32 %v2923_v58, %v2922_v18  ;;  %v2965_v27 = vrot.slane %v2964_v11, 4 }
 0x55f   :  { %v2933_v59 = vadd.f32 %v2932_v55, %v2931_v20  ;;  %v2974_v63 = vrot.slane %v2973_v15, 4 }
 0x560   :  { %v2925_v60 = vrot.slane %v2924_v45, 2  ;;  %v2966_v61 = vadd.f32 %v2965_v27, %v2964_v11  ;;  %v3002_v11 = vld [vmem:[#allocation10 + $0x2] ss:$8 sm:$0x7] }
 0x561   :  { %v2934_v62 = vrot.slane %v2933_v59, 2  ;;  %v2975_v10 = vadd.f32 %v2974_v63, %v2973_v15 }
 0x562   :  { %v2926_v34 = vadd.f32 %v2925_v60, %v2924_v45  ;;  %v2967_v13 = vrot.slane %v2966_v61, 2 }
 0x563   :  { %v2935_v36 = vadd.f32 %v2934_v62, %v2933_v59  ;;  %v2976_v0 = vrot.slane %v2975_v10, 2 }
 0x564   :  { %v2927_v57 = vrot.slane %v2926_v34, 1  ;;  %v2968_v19 = vadd.f32 %v2967_v13, %v2966_v61 }
 0x565   :  { %v2936_v22 = vrot.slane %v2935_v36, 1  ;;  %v2977_v47 = vadd.f32 %v2976_v0, %v2975_v10 }
 0x566   :  { %v2928_v28 = vadd.f32 %v2927_v57, %v2926_v34  ;;  %v2969_v5 = vrot.slane %v2968_v19, 1 }
 0x567   :  { %v2937_v30 = vadd.f32 %v2936_v22, %v2935_v36  ;;  %v2978_v6 = vrot.slane %v2977_v47, 1  ;;  %v4701_v18 = vpop.eup %4700 }
 0x568   :  { %v2947_v17 = vmul.f32 0.03125, %v2928_v28  ;;  %v2970_v21 = vadd.f32 %v2969_v5, %v2968_v19  ;;  %v3028_v1 = vrot.slane %v4701_v18, %v5099_v25  ;;  %v3004_v28 = vld [vmem:[#allocation10 + $0x6] ss:$8 sm:$0x7] }
 0x569   :  { %v2948_v29 = vmul.f32 0.03125, %v2937_v30  ;;  %v2979_v38 = vadd.f32 %v2978_v6, %v2977_v47 }
 0x56a   :  { %v2989_v42 = vmul.f32 0.03125, %v2970_v21  ;;  %v2992_v44 = vmul.f32 %v2947_v17, %v2947_v17 }
 0x56b   :  { %v2990_v12 = vmul.f32 0.03125, %v2979_v38  ;;  %v2993_v53 = vmul.f32 %v2948_v29, %v2948_v29 }
 0x56c   :  { %v2995_v46 = vsub.f32 %v2989_v42, %v2992_v44 }
 0x56d   :  { %v2996_v50 = vsub.f32 %v2990_v12, %v2993_v53 }
 0x56e   :  { %v2998_v52 = vmax.f32 %v2995_v46, 0.0 }
 0x56f   :  { %v2999_v49 = vmax.f32 %v2996_v50, 0.0 }
 0x570   :  { %v3005_v32 = vadd.f32 1e-05, %v2998_v52 }
 0x571   :  { %v3006_v33 = vadd.f32 1e-05, %v2999_v49 }
 0x572   :  { %4702 = vrsqrt.f32 %v3005_v32 }
 0x573   :  { %4704 = vrsqrt.f32 %v3006_v33 }
 0x57c   :  { %v4703_v9 = vpop.eup %4702 }
 0x57d   :  { %v4705_v37 = vpop.eup %4704 }
 0x57e   :  { %v3014_v7 = vcombine.low %v4703_v9, %v4705_v37 }
 0x580   :  { %v3021_v20 = vrot.slane %v3014_v7, %v5099_v25 }
 0x582   :  { %v3029_v58 = vcombine.low %v3021_v20, %v3028_v1 }
 0x584   :  { %v3036_v55 = vrot.slane %v3029_v58, %v5099_v25 }
 0x586   :  { %v3038_v15 = vmul.f32 %v3036_v55, %v3002_v11 }
 0x588   :  { %v3043_v45 = vrot.slane %v3038_v15, %v5104_v39  ;;  %v3047_v27 = vrot.slane %v3038_v15, %v5106_v40  ;;  %v3051_v59 = vrot.slane %v3038_v15, %v5108_v41 }
 0x58a   :  { %v3055_v63 = vmul.f32 %v3043_v45, %v2947_v17  ;;  %v3056_v60 = vmul.f32 %v3047_v27, %v2948_v29  ;;  %v3057_v61 = vmul.f32 %v3051_v59, %v5304_v16  ;;  %v3086_v62 = vmul.f32 %v3043_v45, %v5308_v8 }
 0x58b   :  { %v3087_v10 = vmul.f32 %v3047_v27, %v5310_v51  ;;  %v3088_v34 = vmul.f32 %v3051_v59, %v5286_v43  ;;  %v3089_v13 = vmul.f32 %v3043_v45, %v5312_v4  ;;  %v3090_v36 = vmul.f32 %v3047_v27, %v5320_v2 }
 0x58c   :  { %v3061_v0 = vcombine.low %v3055_v63, %v3056_v60  ;;  %v3091_v57 = vmul.f32 %v3051_v59, %v5292_v56  ;;  %v3092_v19 = vmul.f32 %v3043_v45, %v5328_v24  ;;  %v3093_v22 = vmul.f32 %v3047_v27, %v5333_v54 }
 0x58d   :  { %v3094_v47 = vmul.f32 %v3051_v59, %v5284_v3  ;;  %v3095_v16 = vmul.f32 %v3043_v45, %v5338_v31  ;;  %v3096_v8 = vmul.f32 %v3047_v27, %v5343_v35  ;;  %v3075_v43 = vrot.slane %v3057_v61, %v5099_v25 }
 0x58e   :  { %v3068_v51 = vrot.slane %v3061_v0, %v5099_v25  ;;  %v3097_v4 = vmul.f32 %v3051_v59, %v5288_v14 }
 0x590   :  { %v3076_v2 = vcombine.low %v3068_v51, %v3075_v43 }
 0x592   :  { %v3083_v56 = vrot.slane %v3076_v2, %v5099_v25 }
 0x594   :  { %v3085_v5 = vsub.f32 %v3004_v28, %v3083_v56 }
 0x596   :  { %v3102_v24 = vrot.slane %v3085_v5, %v5104_v39  ;;  %v3106_v54 = vrot.slane %v3085_v5, %v5106_v40  ;;  %v3110_v3 = vrot.slane %v3085_v5, %v5108_v41 }
 0x598   :  { %v3114_v31 = vadd.f32 %v3102_v24, %v3086_v62  ;;  %v3115_v30 = vadd.f32 %v3106_v54, %v3087_v10  ;;  %v3116_v35 = vadd.f32 %v3110_v3, %v3088_v34  ;;  %v3117_v6 = vadd.f32 %v3102_v24, %v3089_v13 }
 0x599   :  { %v3118_v17 = vadd.f32 %v3106_v54, %v3090_v36  ;;  %v3119_v21 = vadd.f32 %v3110_v3, %v3091_v57  ;;  %v3120_v26 = vadd.f32 %v3102_v24, %v3092_v19  ;;  %v3121_v29 = vadd.f32 %v3106_v54, %v3093_v22 }
 0x59a   :  { %v3122_v14 = vadd.f32 %v3110_v3, %v3094_v47  ;;  %v3123_v38 = vadd.f32 %v3102_v24, %v3095_v16  ;;  %v3124_v42 = vadd.f32 %v3106_v54, %v3096_v8  ;;  %v3125_v44 = vadd.f32 %v3110_v3, %v3097_v4 }
 0x59b   :  { %v3126_v12 = vmax.f32 %v3114_v31, 0.0  ;;  %v3127_v53 = vmax.f32 %v3115_v30, 0.0  ;;  %v3128_v46 = vmax.f32 %v3116_v35, 0.0  ;;  %v3129_v48 = vmax.f32 %v3117_v6, 0.0 }
 0x59c   :  { %v3130_v50 = vmax.f32 %v3118_v17, 0.0  ;;  %v3131_v52 = vmax.f32 %v3119_v21, 0.0  ;;  %v3132_v49 = vmax.f32 %v3120_v26, 0.0  ;;  %v3133_v32 = vmax.f32 %v3121_v29, 0.0 }
 0x59d   :  { %v3134_v33 = vmax.f32 %v3122_v14, 0.0  ;;  %v3135_v18 = vmax.f32 %v3123_v38, 0.0  ;;  %v3136_v9 = vmax.f32 %v3124_v42, 0.0  ;;  %v3137_v37 = vmax.f32 %v3125_v44, 0.0 }
 0x59e   :  { %v5373_v7 = vpack.c.bf16 %v3129_v48, %v3126_v12  ;;  %v3139_v20 = vpack.c.bf16 %v3130_v50, %v3127_v53  ;;  %v5375_v1 = vpack.c.bf16 %v3131_v52, %v3128_v46 }
 0x59f   :  { %v5377_v58 = vpack.c.bf16 %v3135_v18, %v3132_v49  ;;  %v5379_v11 = vpack.c.bf16 %v3136_v9, %v3133_v32  ;;  %v5381_v55 = vpack.c.bf16 %v3137_v37, %v3134_v33 }
 0x5a0   :  { %4830 = dma.done.wait [#allocation4], 9216 }
 0x5a1   :  { %4831 = vsyncadd [#allocation4], 4294958080  ;;  %3356 = vmatprep.mubr.bf16.mxu1 %v3139_v20  ;;  %3250 = vmatprep.mubr.bf16.mxu0 %v3139_v20  ;;  %v3147_v15 = vld [vmem:[#allocation2 + $0x8] sm:$0xff]  ;;  %v3172_v45 = vld [vmem:[#allocation2 + $0xd0] sm:$0xff] }
 0x5a2   :  { %v3146_v27 = vld [vmem:[#allocation2] sm:$0xff]  ;;  %3218 = vmatprep.subr.bf16.mxu0 %v3147_v15  ;;  %4203 = vmatprep.subr.bf16.mxu1 %v3172_v45  ;;  %v3148_v59 = vld [vmem:[#allocation2 + $0x10] sm:$0xff]  ;;  %v3175_v60 = vld [vmem:[#allocation2 + $0xe8] sm:$0xff] }
 0x5a3   :  { %v3150_v63 = vld [vmem:[#allocation2 + $0x20] sm:$0xff]  ;;  %3219 = vmatpush1.bf16.msra.mxu0 %v3146_v27  ;;  %4204 = vmatpush3.bf16.msra.mxu1 %v3148_v59  ;;  %v3149_v61 = vld [vmem:[#allocation2 + $0x18] sm:$0xff]  ;;  %v3151_v62 = vld [vmem:[#allocation2 + $0x28] sm:$0xff] }
 0x5a4   :  { %3220 = vmatprep.subr.bf16.mxu0 %v3150_v63  ;;  %4205 = vmatprep.subr.bf16.mxu1 %v3175_v60  ;;  %v3153_v10 = vld [vmem:[#allocation2 + $0x38] sm:$0xff]  ;;  %v3178_v34 = vld [vmem:[#allocation2 + $0x100] sm:$0xff]  ;;  %v3152_v13 = vld [vmem:[#allocation2 + $0x30] sm:$0xff] }
 0x5a5   :  { %v3154_v36 = vld [vmem:[#allocation2 + $0x40] sm:$0xff]  ;;  %v3156_v0 = vld [vmem:[#allocation2 + $0x50] sm:$0xff]  ;;  %v3181_v57 = vld [vmem:[#allocation2 + $0x118] sm:$0xff] }
 0x5a6   :  { %v3155_v19 = vld [vmem:[#allocation2 + $0x48] sm:$0xff]  ;;  %v3157_v22 = vld [vmem:[#allocation2 + $0x58] sm:$0xff]  ;;  %v3184_v16 = vld [vmem:[#allocation2 + $0x130] sm:$0xff] }
 0x5a7   :  { %3221 = vmatpush1.bf16.msra.mxu0 %v3149_v61  ;;  %4206 = vmatpush3.bf16.msra.mxu1 %v3151_v62  ;;  %v3159_v47 = vld [vmem:[#allocation2 + $0x68] sm:$0xff]  ;;  %v3158_v8 = vld [vmem:[#allocation2 + $0x60] sm:$0xff]  ;;  %v3160_v51 = vld [vmem:[#allocation2 + $0x70] sm:$0xff] }
 0x5a8   :  { %3222 = vmatprep.subr.bf16.mxu0 %v3153_v10  ;;  %4207 = vmatprep.subr.bf16.mxu1 %v3178_v34  ;;  %v3162_v43 = vld [vmem:[#allocation2 + $0x80] sm:$0xff]  ;;  %v3187_v4 = vld [vmem:[#allocation2 + $0x148] sm:$0xff]  ;;  %v3161_v2 = vld [vmem:[#allocation2 + $0x78] sm:$0xff] }
 0x5a9   :  { %v3163_v28 = vld [vmem:[#allocation2 + $0x88] sm:$0xff]  ;;  %v3165_v56 = vld [vmem:[#allocation2 + $0x98] sm:$0xff]  ;;  %v3190_v5 = vld [vmem:[#allocation2 + $0x160] sm:$0xff] }
 0x5aa   :  { %v3164_v24 = vld [vmem:[#allocation2 + $0x90] sm:$0xff]  ;;  %v3166_v54 = vld [vmem:[#allocation2 + $0xa0] sm:$0xff]  ;;  %v3193_v31 = vld [vmem:[#allocation2 + $0x178] sm:$0xff] }
 0x5ab   :  { %3223 = vmatpush1.bf16.msra.mxu0 %v3152_v13  ;;  %4208 = vmatpush3.bf16.msra.mxu1 %v3154_v36  ;;  %v3168_v3 = vld [vmem:[#allocation2 + $0xb0] sm:$0xff]  ;;  %v3167_v30 = vld [vmem:[#allocation2 + $0xa8] sm:$0xff]  ;;  %v3169_v35 = vld [vmem:[#allocation2 + $0xb8] sm:$0xff] }
 0x5ac   :  { %3224 = vmatprep.subr.bf16.mxu0 %v3156_v0  ;;  %4209 = vmatprep.subr.bf16.mxu1 %v3181_v57  ;;  %v3171_v6 = vld [vmem:[#allocation2 + $0xc8] sm:$0xff]  ;;  %v3196_v17 = vld [vmem:[#allocation2 + $0x190] sm:$0xff]  ;;  %v3170_v21 = vld [vmem:[#allocation2 + $0xc0] sm:$0xff] }
 0x5ad   :  { %v3174_v26 = vld [vmem:[#allocation2 + $0xe0] sm:$0xff]  ;;  %v3199_v29 = vld [vmem:[#allocation2 + $0x1a8] sm:$0xff]  ;;  %v3173_v14 = vld [vmem:[#allocation2 + $0xd8] sm:$0xff] }
 0x5ae   :  { %v3177_v38 = vld [vmem:[#allocation2 + $0xf8] sm:$0xff]  ;;  %v3202_v42 = vld [vmem:[#allocation2 + $0x1c0] sm:$0xff]  ;;  %v3176_v44 = vld [vmem:[#allocation2 + $0xf0] sm:$0xff] }
 0x5af   :  { %3225 = vmatpush1.bf16.msra.mxu0 %v3155_v19  ;;  %4210 = vmatpush3.bf16.msra.mxu1 %v3157_v22  ;;  %v3180_v12 = vld [vmem:[#allocation2 + $0x110] sm:$0xff]  ;;  %v3205_v53 = vld [vmem:[#allocation2 + $0x1d8] sm:$0xff]  ;;  %v3179_v46 = vld [vmem:[#allocation2 + $0x108] sm:$0xff] }
 0x5b0   :  { %3226 = vmatprep.subr.bf16.mxu0 %v3159_v47  ;;  %4211 = vmatprep.subr.bf16.mxu1 %v3184_v16  ;;  %v3183_v48 = vld [vmem:[#allocation2 + $0x128] sm:$0xff]  ;;  %v3208_v50 = vld [vmem:[#allocation2 + $0x1f0] sm:$0xff]  ;;  %v3182_v52 = vld [vmem:[#allocation2 + $0x120] sm:$0xff] }
 0x5b1   :  { %v3186_v49 = vld [vmem:[#allocation2 + $0x140] sm:$0xff]  ;;  %v3211_v32 = vld [vmem:[#allocation2 + $0x208] sm:$0xff]  ;;  %v3185_v33 = vld [vmem:[#allocation2 + $0x138] sm:$0xff] }
 0x5b2   :  { %v3189_v18 = vld [vmem:[#allocation2 + $0x158] sm:$0xff]  ;;  %v3214_v9 = vld [vmem:[#allocation2 + $0x220] sm:$0xff]  ;;  %v3188_v37 = vld [vmem:[#allocation2 + $0x150] sm:$0xff] }
 0x5b3   :  { %3227 = vmatpush1.bf16.msra.mxu0 %v3158_v8  ;;  %4212 = vmatpush3.bf16.msra.mxu1 %v3160_v51  ;;  %v3192_v20 = vld [vmem:[#allocation2 + $0x170] sm:$0xff]  ;;  %v3217_v15 = vld [vmem:[#allocation2 + $0x238] sm:$0xff]  ;;  %v3191_v45 = vld [vmem:[#allocation2 + $0x168] sm:$0xff] }
 0x5b4   :  { %3228 = vmatprep.subr.bf16.mxu0 %v3162_v43  ;;  %4213 = vmatprep.subr.bf16.mxu1 %v3187_v4  ;;  %v3195_v27 = vld [vmem:[#allocation2 + $0x188] sm:$0xff]  ;;  %v3194_v59 = vld [vmem:[#allocation2 + $0x180] sm:$0xff]  ;;  %v3197_v60 = vld [vmem:[#allocation2 + $0x198] sm:$0xff] }
 0x5b5   :  { %v3198_v63 = vld [vmem:[#allocation2 + $0x1a0] sm:$0xff]  ;;  %v3201_v61 = vld [vmem:[#allocation2 + $0x1b8] sm:$0xff]  ;;  %v3200_v62 = vld [vmem:[#allocation2 + $0x1b0] sm:$0xff] }
 0x5b6   :  { %v3204_v10 = vld [vmem:[#allocation2 + $0x1d0] sm:$0xff]  ;;  %v3203_v34 = vld [vmem:[#allocation2 + $0x1c8] sm:$0xff]  ;;  %v3210_v36 = vld [vmem:[#allocation2 + $0x200] sm:$0xff] }
 0x5b7   :  { %3229 = vmatpush1.bf16.msra.mxu0 %v3161_v2  ;;  %4214 = vmatpush3.bf16.msra.mxu1 %v3163_v28  ;;  %v3207_v13 = vld [vmem:[#allocation2 + $0x1e8] sm:$0xff]  ;;  %v3213_v0 = vld [vmem:[#allocation2 + $0x218] sm:$0xff]  ;;  %v3212_v57 = vld [vmem:[#allocation2 + $0x210] sm:$0xff] }
 0x5b8   :  { %3230 = vmatprep.subr.bf16.mxu0 %v3165_v56  ;;  %4215 = vmatprep.subr.bf16.mxu1 %v3190_v5  ;;  %v3216_v19 = vld [vmem:[#allocation2 + $0x230] sm:$0xff] }
 0x5bb   :  { %3231 = vmatpush1.bf16.msra.mxu0 %v3164_v24  ;;  %4216 = vmatpush3.bf16.msra.mxu1 %v3166_v54 }
 0x5bc   :  { %3232 = vmatprep.subr.bf16.mxu0 %v3168_v3  ;;  %4217 = vmatprep.subr.bf16.mxu1 %v3193_v31 }
 0x5bf   :  { %3233 = vmatpush1.bf16.msra.mxu0 %v3167_v30  ;;  %4218 = vmatpush3.bf16.msra.mxu1 %v3169_v35 }
 0x5c0   :  { %3234 = vmatprep.subr.bf16.mxu0 %v3171_v6  ;;  %4319 = vmatprep.subr.bf16.mxu1 %v3196_v17 }
 0x5c2   :  { %3357 = vmatmul.mubr.bf16.vlgmr.msra.gmra.mrb[56].mxu1 %v5373_v7 }
 0x5c3   :  { %3235 = vmatpush1.bf16.msra.mxu0 %v3170_v21  ;;  %4320 = vmatpush3.bf16.msra.mxu1 %v3196_v17 }
 0x5c4   :  { %3236 = vmatprep.subr.bf16.mxu0 %v3174_v26  ;;  %4321 = vmatprep.subr.bf16.mxu1 %v3199_v29 }
 0x5c5   :  { %3364 = vmatprep.mubr.bf16.mxu1 %v5379_v11 }
 0x5c7   :  { %3237 = vmatpush1.bf16.msra.mxu0 %v3173_v14  ;;  %4322 = vmatpush3.bf16.msra.mxu1 %v3199_v29 }
 0x5c8   :  { %3238 = vmatprep.subr.bf16.mxu0 %v3177_v38  ;;  %4323 = vmatprep.subr.bf16.mxu1 %v3202_v42 }
 0x5ca   :  { %3365 = vmatmul.mubr.bf16.gmra.mrb[60].mxu1 %v5377_v58 }
 0x5cb   :  { %3239 = vmatpush1.bf16.msra.mxu0 %v3176_v44  ;;  %4324 = vmatpush3.bf16.msra.mxu1 %v3202_v42 }
 0x5cc   :  { %3240 = vmatprep.subr.bf16.mxu0 %v3180_v12  ;;  %4325 = vmatprep.subr.bf16.mxu1 %v3205_v53 }
 0x5cd   :  { %4335 = vmatprep.mubr.bf16.mxu1 %v5375_v1 }
 0x5cf   :  { %3241 = vmatpush1.bf16.msra.mxu0 %v3179_v46  ;;  %4326 = vmatpush3.bf16.msra.mxu1 %v3205_v53 }
 0x5d0   :  { %3242 = vmatprep.subr.bf16.mxu0 %v3183_v48  ;;  %4327 = vmatprep.subr.bf16.mxu1 %v3208_v50 }
 0x5d3   :  { %3243 = vmatpush1.bf16.msra.mxu0 %v3182_v52  ;;  %4328 = vmatpush3.bf16.msra.mxu1 %v3208_v50 }
 0x5d4   :  { %3244 = vmatprep.subr.bf16.mxu0 %v3186_v49  ;;  %4329 = vmatprep.subr.bf16.mxu1 %v3211_v32 }
 0x5d7   :  { %3245 = vmatpush1.bf16.msra.mxu0 %v3185_v33  ;;  %4330 = vmatpush3.bf16.msra.mxu1 %v3211_v32 }
 0x5d8   :  { %3246 = vmatprep.subr.bf16.mxu0 %v3189_v18  ;;  %4331 = vmatprep.subr.bf16.mxu1 %v3214_v9 }
 0x5db   :  { %3247 = vmatpush1.bf16.msra.mxu0 %v3188_v37  ;;  %4332 = vmatpush3.bf16.msra.mxu1 %v3214_v9 }
 0x5dc   :  { %3248 = vmatprep.subr.bf16.mxu0 %v3192_v20  ;;  %4333 = vmatprep.subr.bf16.mxu1 %v3217_v15 }
 0x5df   :  { %3249 = vmatpush1.bf16.msra.mxu0 %v3191_v45  ;;  %4334 = vmatpush3.bf16.msra.mxu1 %v3217_v15 }
 0x5e0   :  { %3271 = vmatprep.subr.bf16.mxu0 %v3195_v27 }
 0x5e2   :  { %4336 = vmatmul.mubr.bf16.vlgmr.msra.gmra.mrb[64].mxu1 %v5381_v55  ;;  %3251 = vmatmul.mubr.bf16.vlgmr.msra.gmra.mrb[24].mxu0 %v5373_v7  ;;  %v3206_v7 = vld [vmem:[#allocation2 + $0x1e0] sm:$0xff] }
 0x5e3   :  { %3272 = vmatpush1.bf16.msra.mxu0 %v3194_v59  ;;  %3260 = vmatprep.mubr.bf16.mxu0 %v5379_v11  ;;  %v3209_v11 = vld [vmem:[#allocation2 + $0x1f8] sm:$0xff] }
 0x5e4   :  { %3273 = vmatprep.subr.bf16.mxu0 %v3198_v63 }
 0x5e7   :  { %3274 = vmatpush1.bf16.msra.mxu0 %v3197_v60 }
 0x5e8   :  { %3275 = vmatprep.subr.bf16.mxu0 %v3201_v61 }
 0x5ea   :  { %3261 = vmatmul.mubr.bf16.gmra.mrb[28].mxu0 %v5377_v58  ;;  %v3215_v58 = vld [vmem:[#allocation2 + $0x228] sm:$0xff] }
 0x5eb   :  { %3276 = vmatpush1.bf16.msra.mxu0 %v3200_v62  ;;  %3303 = vmatprep.mubr.bf16.mxu0 %v4857_v23 }
 0x5ec   :  { %3277 = vmatprep.subr.bf16.mxu0 %v3204_v10 }
 0x5ef   :  { %3278 = vmatpush1.bf16.msra.mxu0 %v3203_v34 }
 0x5f0   :  { %3279 = vmatprep.subr.bf16.mxu0 %v3207_v13 }
 0x5f3   :  { %3280 = vmatpush1.bf16.msra.mxu0 %v3206_v7 }
 0x5f4   :  { %3281 = vmatprep.subr.bf16.mxu0 %v3210_v36 }
 0x5f7   :  { %3282 = vmatpush1.bf16.msra.mxu0 %v3209_v11 }
 0x5f8   :  { %3283 = vmatprep.subr.bf16.mxu0 %v3213_v0 }
 0x5fb   :  { %3284 = vmatpush1.bf16.msra.mxu0 %v3212_v57 }
 0x5fc   :  { %3285 = vmatprep.subr.bf16.mxu0 %v3216_v19 }
 0x5ff   :  { %3286 = vmatpush1.bf16.msra.mxu0 %v3215_v58 }
 0x602   :  { %3304 = vmatmul.mubr.bf16.vlgmr.msra.gmra.mrb[24].mxu0 %v5375_v1 }
 0x603   :  { %3313 = vmatprep.mubr.bf16.mxu0 %v4857_v23 }
 0x60a   :  { %3314 = vmatmul.mubr.bf16.gmra.mrb[28].mxu0 %v5381_v55 }
 0x695   :  { %v4219_v22 = vpop.f32.mrb[56].mxu1 }
 0x696   :  { %v4220_v47 = vpop.f32.mrb[57].mxu1 }
 0x697   :  { %v4221_v16 = vadd.f32 %v4220_v47, %v4219_v22  ;;  %v4222_v8 = vpop.f32.mrb[58].mxu1 }
 0x698   :  { %v4223_v51 = vpop.f32.mrb[59].mxu1 }
 0x699   :  { %v4224_v43 = vadd.f32 %v4223_v51, %v4222_v8 }
 0x69d   :  { %v4225_v4 = vpop.f32.mrb[60].mxu1 }
 0x69e   :  { %v4226_v2 = vpop.f32.mrb[61].mxu1 }
 0x69f   :  { %v4227_v28 = vadd.f32 %v4226_v2, %v4225_v4  ;;  %v4228_v56 = vpop.f32.mrb[62].mxu1 }
 0x6a0   :  { %v4229_v5 = vpop.f32.mrb[63].mxu1 }
 0x6a1   :  { %v4230_v24 = vadd.f32 %v4229_v5, %v4228_v56 }
 0x6b5   :  { %v4337_v54 = vpop.f32.mrb[64].mxu1 }
 0x6b6   :  { %v5395_v3 = vadd.f32 %v4337_v54, %v4227_v28  ;;  %v3407_v1 = vpop.f32.mrb[65].mxu1 }
 0x6b7   :  { %v5397_v31 = vadd.f32 %v4221_v16, %v3407_v1  ;;  %v4338_v23 = vpop.f32.mrb[66].mxu1 }
 0x6b8   :  { %v5399_v55 = vadd.f32 %v4338_v23, %v4230_v24  ;;  %v3410_v30 = vpop.f32.mrb[67].mxu1  ;;  %v3460_v17 = vmul.f32 %v5395_v3, %v5395_v3 }
 0x6b9   :  { %v3454_v35 = vmul.f32 %v5397_v31, %v5397_v31  ;;  %v5403_v6 = vadd.f32 %v4224_v43, %v3410_v30 }
 0x6ba   :  { %v3463_v29 = vmul.f32 %v5399_v55, %v5399_v55 }
 0x6bb   :  { %v3440_v21 = vadd.f32 %v5403_v6, %v5397_v31  ;;  %v3457_v26 = vmul.f32 %v5403_v6, %v5403_v6 }
 0x6bd   :  { %v3441_v14 = vadd.f32 %v3440_v21, %v5395_v3  ;;  %v3482_v38 = vadd.f32 %v3457_v26, %v3454_v35 }
 0x6bf   :  { %v3442_v42 = vadd.f32 %v3441_v14, %v5399_v55  ;;  %v3483_v44 = vadd.f32 %v3482_v38, %v3460_v17 }
 0x6c1   :  { %v3443_v12 = vrot.slane %v3442_v42, 4  ;;  %v3484_v53 = vadd.f32 %v3483_v44, %v3463_v29 }
 0x6c3   :  { %v3444_v46 = vadd.f32 %v3443_v12, %v3442_v42  ;;  %v3485_v48 = vrot.slane %v3484_v53, 4 }
 0x6c5   :  { %v3445_v50 = vrot.slane %v3444_v46, 2  ;;  %v3486_v52 = vadd.f32 %v3485_v48, %v3484_v53 }
 0x6c7   :  { %v3446_v49 = vadd.f32 %v3445_v50, %v3444_v46  ;;  %v3487_v32 = vrot.slane %v3486_v52, 2 }
 0x6c9   :  { %v3447_v33 = vrot.slane %v3446_v49, 1  ;;  %v3488_v18 = vadd.f32 %v3487_v32, %v3486_v52 }
 0x6cb   :  { %v3448_v9 = vadd.f32 %v3447_v33, %v3446_v49  ;;  %v3489_v37 = vrot.slane %v3488_v18, 1 }
 0x6cd   :  { %v5415_v20 = vmul.f32 0.03125, %v3448_v9  ;;  %v3490_v15 = vadd.f32 %v3489_v37, %v3488_v18 }
 0x6cf   :  { %v3493_v45 = vmul.f32 0.03125, %v3490_v15  ;;  %v3496_v27 = vmul.f32 %v5415_v20, %v5415_v20 }
 0x6d1   :  { %v3499_v59 = vsub.f32 %v3493_v45, %v3496_v27 }
 0x6d3   :  { %v3502_v45 = vmax.f32 %v3499_v59, 0.0 }
 0x6d5   :  { %v5419_v63 = vpop.f32.mrb[24].mxu0 }
 0x6d6   :  { %v5421_v60 = vpop.f32.mrb[25].mxu0  ;;  %v3452_v62 = vmul.f32 %v5419_v63, %v5419_v63 }
 0x6d7   :  { %v5423_v61 = vpop.f32.mrb[26].mxu0  ;;  %v3453_v7 = vmul.f32 %v5421_v60, %v5421_v60 }
 0x6d8   :  { %v3422_v10 = vadd.f32 %v5423_v61, %v5419_v63  ;;  %v3455_v34 = vmul.f32 %v5423_v61, %v5423_v61  ;;  %v5431_v13 = vpop.f32.mrb[27].mxu0 }
 0x6d9   :  { %v3431_v36 = vadd.f32 %v5431_v13, %v5421_v60  ;;  %v3456_v11 = vmul.f32 %v5431_v13, %v5431_v13 }
 0x6da   :  { %v3464_v0 = vadd.f32 %v3455_v34, %v3452_v62 }
 0x6db   :  { %v3473_v57 = vadd.f32 %v3456_v11, %v3453_v7 }
 0x6dd   :  { %v5439_v19 = vpop.f32.mrb[28].mxu0 }
 0x6de   :  { %v3423_v58 = vadd.f32 %v3422_v10, %v5439_v19  ;;  %v3458_v22 = vmul.f32 %v5439_v19, %v5439_v19  ;;  %v5444_v47 = vpop.f32.mrb[29].mxu0 }
 0x6df   :  { %v3432_v16 = vadd.f32 %v3431_v36, %v5444_v47  ;;  %v3459_v8 = vmul.f32 %v5444_v47, %v5444_v47  ;;  %v5449_v51 = vpop.f32.mrb[30].mxu0 }
 0x6e0   :  { %v3465_v43 = vadd.f32 %v3464_v0, %v3458_v22  ;;  %v3424_v4 = vadd.f32 %v3423_v58, %v5449_v51  ;;  %v3461_v2 = vmul.f32 %v5449_v51, %v5449_v51  ;;  %v5454_v28 = vpop.f32.mrb[31].mxu0  ;;  %v3509_v0 = vadd.f32 1e-05, %v3502_v45 }
 0x6e1   :  { %v3474_v56 = vadd.f32 %v3473_v57, %v3459_v8  ;;  %v3433_v5 = vadd.f32 %v3432_v16, %v5454_v28  ;;  %v3462_v24 = vmul.f32 %v5454_v28, %v5454_v28 }
 0x6e2   :  { %v3425_v54 = vrot.slane %v3424_v4, 4  ;;  %v3466_v1 = vadd.f32 %v3465_v43, %v3461_v2  ;;  %4706 = vrsqrt.f32 %v3509_v0 }
 0x6e3   :  { %v3434_v23 = vrot.slane %v3433_v5, 4  ;;  %v3475_v30 = vadd.f32 %v3474_v56, %v3462_v24 }
 0x6e4   :  { %v3426_v35 = vadd.f32 %v3425_v54, %v3424_v4  ;;  %v3467_v17 = vrot.slane %v3466_v1, 4  ;;  %v3504_v54 = vld [vmem:[#allocation10 + $0x3] ss:$8 sm:$0x7] }
 0x6e5   :  { %v3435_v21 = vadd.f32 %v3434_v23, %v3433_v5  ;;  %v3476_v26 = vrot.slane %v3475_v30, 4 }
 0x6e6   :  { %v3427_v29 = vrot.slane %v3426_v35, 2  ;;  %v3468_v14 = vadd.f32 %v3467_v17, %v3466_v1 }
 0x6e7   :  { %v3436_v38 = vrot.slane %v3435_v21, 2  ;;  %v3477_v42 = vadd.f32 %v3476_v26, %v3475_v30 }
 0x6e8   :  { %v3428_v44 = vadd.f32 %v3427_v29, %v3426_v35  ;;  %v3469_v12 = vrot.slane %v3468_v14, 2 }
 0x6e9   :  { %v3437_v53 = vadd.f32 %v3436_v38, %v3435_v21  ;;  %v3478_v46 = vrot.slane %v3477_v42, 2 }
 0x6ea   :  { %v3429_v48 = vrot.slane %v3428_v44, 1  ;;  %v3470_v50 = vadd.f32 %v3469_v12, %v3468_v14 }
 0x6eb   :  { %v3438_v52 = vrot.slane %v3437_v53, 1  ;;  %v3479_v49 = vadd.f32 %v3478_v46, %v3477_v42 }
 0x6ec   :  { %v3430_v32 = vadd.f32 %v3429_v48, %v3428_v44  ;;  %v3471_v33 = vrot.slane %v3470_v50, 1  ;;  %v4707_v43 = vpop.eup %4706 }
 0x6ed   :  { %v3439_v18 = vadd.f32 %v3438_v52, %v3437_v53  ;;  %v3480_v9 = vrot.slane %v3479_v49, 1  ;;  %v3530_v5 = vrot.slane %v4707_v43, %v5099_v25 }
 0x6ee   :  { %v3449_v37 = vmul.f32 0.03125, %v3430_v32  ;;  %v3472_v15 = vadd.f32 %v3471_v33, %v3470_v50 }
 0x6ef   :  { %v3450_v27 = vmul.f32 0.03125, %v3439_v18  ;;  %v3481_v62 = vadd.f32 %v3480_v9, %v3479_v49  ;;  %v3506_v49 = vld [vmem:[#allocation10 + $0x7] ss:$8 sm:$0x7] }
 0x6f0   :  { %v3491_v10 = vmul.f32 0.03125, %v3472_v15  ;;  %v3494_v34 = vmul.f32 %v3449_v37, %v3449_v37 }
 0x6f1   :  { %v3492_v7 = vmul.f32 0.03125, %v3481_v62  ;;  %v3495_v36 = vmul.f32 %v3450_v27, %v3450_v27 }
 0x6f2   :  { %v3497_v11 = vsub.f32 %v3491_v10, %v3494_v34 }
 0x6f3   :  { %v3498_v57 = vsub.f32 %v3492_v7, %v3495_v36 }
 0x6f4   :  { %v3500_v58 = vmax.f32 %v3497_v11, 0.0 }
 0x6f5   :  { %v3501_v22 = vmax.f32 %v3498_v57, 0.0 }
 0x6f6   :  { %v3507_v16 = vadd.f32 1e-05, %v3500_v58 }
 0x6f7   :  { %v3508_v8 = vadd.f32 1e-05, %v3501_v22 }
 0x6f8   :  { %4708 = vrsqrt.f32 %v3507_v16 }
 0x6f9   :  { %4710 = vrsqrt.f32 %v3508_v8 }
 0x702   :  { %v4709_v4 = vpop.eup %4708 }
 0x703   :  { %v4711_v2 = vpop.eup %4710 }
 0x704   :  { %v3516_v59 = vcombine.low %v4709_v4, %v4711_v2 }
 0x706   :  { %v3523_v56 = vrot.slane %v3516_v59, %v5099_v25 }
 0x708   :  { %v3531_v24 = vcombine.low %v3523_v56, %v3530_v5 }
 0x70a   :  { %v3538_v1 = vrot.slane %v3531_v24, %v5099_v25 }
 0x70c   :  { %v3540_v23 = vmul.f32 %v3538_v1, %v3504_v54 }
 0x70e   :  { %v3545_v30 = vrot.slane %v3540_v23, %v5104_v39  ;;  %v3549_v35 = vrot.slane %v3540_v23, %v5106_v40  ;;  %v3553_v17 = vrot.slane %v3540_v23, %v5108_v41 }
 0x710   :  { %v3557_v21 = vmul.f32 %v3545_v30, %v3449_v37  ;;  %v3558_v26 = vmul.f32 %v3549_v35, %v3450_v27  ;;  %v3559_v29 = vmul.f32 %v3553_v17, %v5415_v20  ;;  %v3588_v14 = vmul.f32 %v3545_v30, %v5419_v63 }
 0x711   :  { %v3589_v38 = vmul.f32 %v3549_v35, %v5421_v60  ;;  %v3590_v42 = vmul.f32 %v3553_v17, %v5397_v31  ;;  %v3591_v44 = vmul.f32 %v3545_v30, %v5423_v61  ;;  %v3592_v12 = vmul.f32 %v3549_v35, %v5431_v13 }
 0x712   :  { %v3563_v53 = vcombine.low %v3557_v21, %v3558_v26  ;;  %v3593_v46 = vmul.f32 %v3553_v17, %v5403_v6  ;;  %v3594_v48 = vmul.f32 %v3545_v30, %v5439_v19  ;;  %v3595_v50 = vmul.f32 %v3549_v35, %v5444_v47 }
 0x713   :  { %v3596_v52 = vmul.f32 %v3553_v17, %v5395_v3  ;;  %v3597_v20 = vmul.f32 %v3545_v30, %v5449_v51  ;;  %v3598_v63 = vmul.f32 %v3549_v35, %v5454_v28  ;;  %v3577_v31 = vrot.slane %v3559_v29, %v5099_v25 }
 0x714   :  { %v3570_v60 = vrot.slane %v3563_v53, %v5099_v25  ;;  %v3599_v61 = vmul.f32 %v3553_v17, %v5399_v55 }
 0x716   :  { %v3578_v13 = vcombine.low %v3570_v60, %v3577_v31 }
 0x718   :  { %v3585_v6 = vrot.slane %v3578_v13, %v5099_v25 }
 0x71a   :  { %v3587_v32 = vsub.f32 %v3506_v49, %v3585_v6 }
 0x71c   :  { %v3604_v19 = vrot.slane %v3587_v32, %v5104_v39  ;;  %v3608_v47 = vrot.slane %v3587_v32, %v5106_v40  ;;  %v3612_v3 = vrot.slane %v3587_v32, %v5108_v41 }
 0x71e   :  { %v3616_v51 = vadd.f32 %v3604_v19, %v3588_v14  ;;  %v3617_v33 = vadd.f32 %v3608_v47, %v3589_v38  ;;  %v3618_v28 = vadd.f32 %v3612_v3, %v3590_v42  ;;  %v3619_v18 = vadd.f32 %v3604_v19, %v3591_v44 }
 0x71f   :  { %v3620_v9 = vadd.f32 %v3608_v47, %v3592_v12  ;;  %v3621_v37 = vadd.f32 %v3612_v3, %v3593_v46  ;;  %v3622_v15 = vadd.f32 %v3604_v19, %v3594_v48  ;;  %v3623_v45 = vadd.f32 %v3608_v47, %v3595_v50 }
 0x720   :  { %v3624_v55 = vadd.f32 %v3612_v3, %v3596_v52  ;;  %v3625_v27 = vadd.f32 %v3604_v19, %v3597_v20  ;;  %v3626_v62 = vadd.f32 %v3608_v47, %v3598_v63  ;;  %v3627_v10 = vadd.f32 %v3612_v3, %v3599_v61 }
 0x721   :  { %v3628_v25 = vmax.f32 %v3616_v51, 0.0  ;;  %v3629_v34 = vmax.f32 %v3617_v33, 0.0  ;;  %v3630_v7 = vmax.f32 %v3618_v28, 0.0  ;;  %v3631_v39 = vmax.f32 %v3619_v18, 0.0 }
 0x722   :  { %v3632_v36 = vmax.f32 %v3620_v9, 0.0  ;;  %v3633_v40 = vmax.f32 %v3621_v37, 0.0  ;;  %v3634_v11 = vmax.f32 %v3622_v15, 0.0  ;;  %v3635_v41 = vmax.f32 %v3623_v45, 0.0 }
 0x723   :  { %v3636_v0 = vmax.f32 %v3624_v55, 0.0  ;;  %v3637_v57 = vmax.f32 %v3625_v27, 0.0  ;;  %v3638_v58 = vmax.f32 %v3626_v62, 0.0  ;;  %v3639_v22 = vmax.f32 %v3627_v10, 0.0 }
 0x724   :  { %v5484_v16 = vpack.c.bf16 %v3631_v39, %v3628_v25  ;;  %v3641_v8 = vpack.c.bf16 %v3632_v36, %v3629_v34  ;;  %v3642_v43 = vpack.c.bf16 %v3633_v40, %v3630_v7 }
 0x725   :  { %v5486_v4 = vpack.c.bf16 %v3637_v57, %v3634_v11  ;;  %v5488_v2 = vpack.c.bf16 %v3638_v58, %v3635_v41  ;;  %v3645_v59 = vpack.c.bf16 %v3639_v22, %v3636_v0 }
 0x726   :  { %4832 = dma.done.wait [#allocation4 + $0x2], 3072 }
 0x727   :  { %4833 = vsyncadd [#allocation4 + $0x2], 4294964224  ;;  %3706 = vmatprep.mubr.bf16.mxu1 %v3641_v8  ;;  %4355 = vmatprep.mubr.bf16.mxu0 %v3642_v43  ;;  %v3657_v56 = vld [vmem:[#allocation3 + $0x40] sm:$0xff]  ;;  %v3658_v24 = vld [vmem:[#allocation3 + $0x48] sm:$0xff]  ;;  %s4859_s2 = smov [#allocation11]  }
 0x728   :  { %v3649_v5 = vld [vmem:[#allocation3] sm:$0xff]  ;;  %4241 = vmatprep.subr.bf16.mxu1 %v3657_v56  ;;  %v3666_v1 = vld [vmem:[#allocation3 + $0x88] sm:$0xff]  ;;  %v3659_v30 = vld [vmem:[#allocation3 + $0x50] sm:$0xff]  ;;  %s3781_s11 = sshll.u32 %s4859_s2, 4  ;;  %s3782_s11 = int_to_ptr.vmem [resolvable:$true] %s3781_s11 }
 0x729   :  { %v3665_v54 = vld [vmem:[#allocation3 + $0x80] sm:$0xff]  ;;  %4242 = vmatpush3.bf16.msra.mxu1 %v3649_v5  ;;  %v3650_v23 = vld [vmem:[#allocation3 + $0x8] sm:$0xff]  ;;  %v3667_v35 = vld [vmem:[#allocation3 + $0x90] sm:$0xff]  ;;  %s4800_s4 = scalar_lea.vmem %s3782_s11, 512  ;;  %p4805_p5 = scmp.lt.s32.totalorder %s3782_s11, %s3782_s11 }
 0x72a   :  { %4339 = vmatprep.subr.bf16.mxu0 %v3665_v54  ;;  %4243 = vmatprep.subr.bf16.mxu1 %v3658_v24  ;;  %v3651_v17 = vld [vmem:[#allocation3 + $0x10] sm:$0xff]  ;;  %v3660_v21 = vld [vmem:[#allocation3 + $0x58] sm:$0xff]  ;;  %v3661_v14 = vld [vmem:[#allocation3 + $0x60] sm:$0xff]  ;;  %p4801_p4 = scmp.ne.s32.totalorder %s3782_s11, %s4800_s4  ;;  %p4806_p6 = scmp.lt.s32.totalorder %s4800_s4, %s4800_s4 }
 0x72b   :  { %4340 = vmatpush3.bf16.msra.mxu0 %v3665_v54  ;;  %v3668_v26 = vld [vmem:[#allocation3 + $0x98] sm:$0xff]  ;;  %v3669_v38 = vld [vmem:[#allocation3 + $0xa0] sm:$0xff]  ;;  %v3662_v44 = vld [vmem:[#allocation3 + $0x68] sm:$0xff] }
 0x72c   :  { %4341 = vmatprep.subr.bf16.mxu0 %v3666_v1  ;;  %v3652_v29 = vld [vmem:[#allocation3 + $0x18] sm:$0xff]  ;;  %v3653_v42 = vld [vmem:[#allocation3 + $0x20] sm:$0xff]  ;;  %v3670_v12 = vld [vmem:[#allocation3 + $0xa8] sm:$0xff]  ;;  %p4807_p7 = por %p4806_p6, %p4805_p5 }
 0x72d   :  { %4244 = vmatpush3.bf16.msra.mxu1 %v3650_v23  ;;  %v3654_v53 = vld [vmem:[#allocation3 + $0x28] sm:$0xff]  ;;  %v3663_v46 = vld [vmem:[#allocation3 + $0x70] sm:$0xff]  ;;  %v3664_v52 = vld [vmem:[#allocation3 + $0x78] sm:$0xff] }
 0x72e   :  { %4245 = vmatprep.subr.bf16.mxu1 %v3659_v30  ;;  %v3671_v48 = vld [vmem:[#allocation3 + $0xb0] sm:$0xff]  ;;  %v3672_v20 = vld [vmem:[#allocation3 + $0xb8] sm:$0xff]  ;;  %p4808_p8 = pnand %p4807_p7, %p4801_p4 }
 0x72f   :  { %4342 = vmatpush3.bf16.msra.mxu0 %v3666_v1  ;;  %v3655_v50 = vld [vmem:[#allocation3 + $0x30] sm:$0xff]  ;;  %v3656_v63 = vld [vmem:[#allocation3 + $0x38] sm:$0xff] }
 0x730   :  { %4343 = vmatprep.subr.bf16.mxu0 %v3667_v35  ;;  %v3673_v13 = vld [vmem:[#allocation10 + $0x18] ss:$0 sm:$0xff] }
 0x731   :  { %4246 = vmatpush3.bf16.msra.mxu1 %v3651_v17 }
 0x732   :  { %4247 = vmatprep.subr.bf16.mxu1 %v3660_v21 }
 0x733   :  { %4344 = vmatpush3.bf16.msra.mxu0 %v3667_v35 }
 0x734   :  { %4345 = vmatprep.subr.bf16.mxu0 %v3668_v26 }
 0x735   :  { %4248 = vmatpush3.bf16.msra.mxu1 %v3652_v29 }
 0x736   :  { %4249 = vmatprep.subr.bf16.mxu1 %v3661_v14 }
 0x737   :  { %4346 = vmatpush3.bf16.msra.mxu0 %v3668_v26 }
 0x738   :  { %4347 = vmatprep.subr.bf16.mxu0 %v3669_v38 }
 0x739   :  { %4250 = vmatpush3.bf16.msra.mxu1 %v3653_v42 }
 0x73a   :  { %4251 = vmatprep.subr.bf16.mxu1 %v3662_v44 }
 0x73b   :  { %4348 = vmatpush3.bf16.msra.mxu0 %v3669_v38 }
 0x73c   :  { %4349 = vmatprep.subr.bf16.mxu0 %v3670_v12 }
 0x73d   :  { %4252 = vmatpush3.bf16.msra.mxu1 %v3654_v53 }
 0x73e   :  { %4253 = vmatprep.subr.bf16.mxu1 %v3663_v46 }
 0x73f   :  { %4350 = vmatpush3.bf16.msra.mxu0 %v3670_v12 }
 0x740   :  { %4351 = vmatprep.subr.bf16.mxu0 %v3671_v48 }
 0x741   :  { %4254 = vmatpush3.bf16.msra.mxu1 %v3655_v50 }
 0x742   :  { %4255 = vmatprep.subr.bf16.mxu1 %v3664_v52 }
 0x743   :  { %4352 = vmatpush3.bf16.msra.mxu0 %v3671_v48 }
 0x744   :  { %4353 = vmatprep.subr.bf16.mxu0 %v3672_v20 }
 0x745   :  { %4256 = vmatpush3.bf16.msra.mxu1 %v3656_v63 }
 0x747   :  { %4354 = vmatpush3.bf16.msra.mxu0 %v3672_v20 }
 0x748   :  { %3707 = vmatmul.mubr.bf16.vlgmr.msra.gmra.mrb[68].mxu1 %v5484_v16 }
 0x749   :  { %3714 = vmatprep.mubr.bf16.mxu1 %v5488_v2 }
 0x74a   :  { %4356 = vmatmul.mubr.bf16.vlgmr.msra.gmra.mrb[32].mxu0 %v3645_v59 }
 0x750   :  { %3715 = vmatmul.mubr.bf16.gmra.mrb[72].mxu1 %v5486_v4 }
 0x81b   :  { %v4257_v60 = vpop.f32.mrb[68].mxu1 }
 0x81c   :  { %v4258_v31 = vpop.f32.mrb[69].mxu1 }
 0x81d   :  { %v4357_v61 = vpop.f32.mrb[32].mxu0  ;;  %v4259_v49 = vadd.f32 %v4258_v31, %v4257_v60  ;;  %v4260_v6 = vpop.f32.mrb[70].mxu1 }
 0x81e   :  { %v3757_v32 = vpop.f32.mrb[33].mxu0  ;;  %v4261_v19 = vpop.f32.mrb[71].mxu1 }
 0x81f   :  { %v4358_v47 = vpop.f32.mrb[34].mxu0  ;;  %v4262_v3 = vadd.f32 %v4261_v19, %v4260_v6  ;;  %v3709_v51 = vadd.f32 %v4259_v49, %v3673_v13 }
 0x820   :  { %v3760_v33 = vpop.f32.mrb[35].mxu0 }
 0x821   :  { %v3758_v28 = vadd.f32 %v3757_v32, %v3709_v51  ;;  %v3712_v18 = vadd.f32 %v4262_v3, %v3673_v13 }
 0x823   :  { %3772 = vst [vmem:[#allocation11] sm:$0xff] %v3758_v28  ;;  %v3761_v9 = vadd.f32 %v3760_v33, %v3712_v18  ;;  %v4263_v37 = vpop.f32.mrb[72].mxu1 }
 0x824   :  { %v4264_v15 = vpop.f32.mrb[73].mxu1 }
 0x825   :  { %3773 = vst [vmem:[#allocation11 + $0x8] sm:$0xff] %v3761_v9  ;;  %v4265_v45 = vadd.f32 %v4264_v15, %v4263_v37  ;;  %v4266_v55 = vpop.f32.mrb[74].mxu1 }
 0x826   :  { %v4267_v27 = vpop.f32.mrb[75].mxu1 }
 0x827   :  { %v3717_v62 = vadd.f32 %v4265_v45, %v3673_v13  ;;  %v4268_v10 = vadd.f32 %v4267_v27, %v4266_v55 }
 0x829   :  { %v3766_v25 = vadd.f32 %v4357_v61, %v3717_v62  ;;  %v3720_v34 = vadd.f32 %v4268_v10, %v3673_v13 }
 0x82b   :  { %3774 = vst [vmem:[#allocation11 + $0x10] sm:$0xff] %v3766_v25  ;;  %v3769_v7 = vadd.f32 %v4358_v47, %v3720_v34 }
 0x82d   :  { %3775 = vst [vmem:[#allocation11 + $0x18] sm:$0xff] %v3769_v7 }
 0x82e   :  { %4811 = shalt.err (!%p4808_p8)
}
 0x82f   :  { %s4812_s16 = scalar_lea.hbm %s5512_s5, 512 }
 0x830   :  { %p4813_p9 = scmp.ne.s32.totalorder %s5512_s5, %s4812_s16  ;;  %p4816_p10 = scmp.lt.u32.totalorder %s4812_s16, %s5512_s5 }
 0x832   :  { %p4818_p11 = pnand %p4816_p10, %p4813_p9 }
 0x834   :  { %4821 = shalt.err (!%p4818_p11)
}
 0x835   :  { %s4860_s25 = smov 8  }
 0x836   :  { %3787 = dma.vmem_to_hbm [thread:$0]  %s3782_s11, 512, %s5512_s5, [#allocation7], %s4847_s13, %s4847_s13, %s4860_s25  }
 0x837   :  { %4834 = dma.done.wait [#allocation7], 512  }
 0x838   :  { %4835 = vsyncadd [#allocation7], 4294966784 }
 0x839   :  { %3791 = vsyncpa [#allocation6], 1 }
 0x83a   :  { %3792 = vsyncpa [#allocation9], 1 }
 0x83b   :  { %3793 = vsyncpa [#allocation7], 1 }
 0x83c   :  { %3794 = vsyncmov [#allocation4] }
 0x83f   :  { %s3795_s29 = vpop.sfrf %3794 }
 0x840   :  { %p4012_p12 = scmp.ne.s32.totalorder %s3795_s29, 0 }
 0x842   :  { %3799 = shalt.err (%p4012_p12)  }
 0x843   :  { %3801 = vsyncmov [#allocation4 + $0x1] }
 0x846   :  { %s3802_s30 = vpop.sfrf %3801 }
 0x847   :  { %p4013_p13 = scmp.ne.s32.totalorder %s3802_s30, 0 }
 0x849   :  { %3806 = shalt.err (%p4013_p13)  }
 0x84a   :  { %3808 = vsyncmov [#allocation4 + $0x2] }
 0x84d   :  { %s3809_s6 = vpop.sfrf %3808 }
 0x84e   :  { %p4014_p0 = scmp.ne.s32.totalorder %s3809_s6, 0 }
 0x850   :  { %3813 = shalt.err (%p4014_p0)  }

</bundles_post_ra>
